<compile_context>
chip_gen: v7x
topology: tpu7x:2x2x1
jax: 0.10.0
libtpu: 0.0.40
codegen_flags: <defaults>
</compile_context>

<pallas_src>
import functools

import jax
import jax.numpy as jnp
from jax import lax
from jax.experimental import pallas as pl
from jax.experimental.pallas import tpu as pltpu

F32 = jnp.float32


# --------------------------- one fused kernel ---------------------------------

def _embedding_d_kernel(y_d_ref, a_w_ref, mask_ref,
                        w1_ref, b1_ref, w2_ref, b2_ref,
                        wlin_ref, asrc_ref, adst_ref, aedge_ref, wedge_ref,
                        gbias_ref,
                        fc1_w_ref, fc1_b_ref, fc2_w_ref, fc2_b_ref,
                        cw_ref, cb_ref,
                        o_ref, slab_ref, *, dn, fd, view, layers):
    """Per view v: y1 = relu(GCN1(x)); y2 = relu(GAT(y1, heads=2, mean));
    y3 = relu(GCN2(y1)).  Channels ordered (y3, y2, y1) per view (s, f, g) to
    match torch.cat(...).  Then global-avg-pool -> fc1 -> relu -> fc2 -> sigmoid
    channel attention, relu scaling, and the 1x1 conv (weighted channel sum +
    bias).  Output already in (dn, fd) layout (final torch transpose is a no-op
    because every stage after the cat is channel-scalar / elementwise)."""
    x = y_d_ref[...]                                       # (dn, fd)

    row = lax.broadcasted_iota(jnp.int32, (dn, dn), 0)
    col = lax.broadcasted_iota(jnp.int32, (dn, dn), 1)
    eye = jnp.where(row == col, 1.0, 0.0).astype(F32)

    inv_hw = 1.0 / float(dn * fd)
    pooled = []                                            # C x (1, 1) avg-pool values

    for v in range(view):                                  # static unroll over views
        a_w = a_w_ref[v]                                   # (dn, dn) dense edge weights
        mask = mask_ref[v]                                 # (dn, dn) 0/1 edge mask

        # ---- dense PyG gcn_norm: D^{-1/2} (A + I) D^{-1/2} ----
        a_hat = a_w + eye                                  # self-loops, weight 1.0
        dinv_r = lax.rsqrt(jnp.sum(a_hat, axis=1, keepdims=True))   # (dn, 1)
        dinv_c = lax.rsqrt(jnp.sum(a_hat, axis=0, keepdims=True))   # (1, dn)
        norm_adj = dinv_r * a_hat * dinv_c

        # ---- GCN layer 1: relu(norm_adj @ (x @ W1) + b1) ----
        y1 = jnp.dot(norm_adj,
                     jnp.dot(x, w1_ref[v], preferred_element_type=F32),
                     preferred_element_type=F32) + b1_ref[v]
        y1 = jnp.maximum(y1, 0.0)

        # ---- GAT (heads=2, concat=False -> mean, edge_dim=1) ----
        s_all = jnp.dot(y1, wlin_ref[v], preferred_element_type=F32)   # (dn, 2*fd)
        # self-loop edge attr = mean of existing edge weights (fill_value='mean')
        sum_w = jnp.sum(jnp.sum(a_w, axis=1, keepdims=True), axis=0, keepdims=True)
        n_edge = jnp.sum(jnp.sum(mask, axis=1, keepdims=True), axis=0, keepdims=True)
        mean_w = sum_w * pl.reciprocal(jnp.maximum(n_edge, 1.0), approx=True)
        a_w_sl = a_w + mean_w * eye
        mask_sl = (mask + eye) > 0.0

        asrc, adst = asrc_ref[v], adst_ref[v]              # (2, fd) each
        aedge, wedge = aedge_ref[v], wedge_ref[v]          # (2, fd) each
        head_sum = jnp.zeros((dn, fd), F32)
        for h in range(2):                                 # both heads fused
            s_h = s_all[:, h * fd:(h + 1) * fd]            # (dn, fd)
            al_src = lax.dot_general(                      # (1, dn): per-source score
                asrc[h:h + 1], s_h, (((1,), (1,)), ((), ())),
                preferred_element_type=F32)
            al_dst = jnp.sum(s_h * adst[h:h + 1], axis=-1, keepdims=True)   # (dn, 1)
            c_h = jnp.sum(wedge[h:h + 1] * aedge[h:h + 1],
                          axis=-1, keepdims=True)          # (1, 1) edge-attr coeff
            logits = al_dst + al_src + a_w_sl * c_h        # (dn, dn)
            logits = jnp.where(logits > 0.0, logits, 0.2 * logits)   # LeakyReLU(0.2)
            logits = jnp.where(mask_sl, logits, -1e30)
            m = jnp.max(logits, axis=-1, keepdims=True)
            p = jnp.where(mask_sl, jnp.exp(logits - m), 0.0)
            # self-loop guarantees >= 1 unmasked entry per row -> denom > 0
            alpha = p * pl.reciprocal(jnp.sum(p, axis=-1, keepdims=True),
                                      approx=True)
            head_sum = head_sum + jnp.dot(alpha, s_h, preferred_element_type=F32)
        y2 = jnp.maximum(0.5 * head_sum + gbias_ref[v], 0.0)   # mean heads + bias

        # ---- GCN layer 2 on y1 ----
        y3 = jnp.dot(norm_adj,
                     jnp.dot(y1, w2_ref[v], preferred_element_type=F32),
                     preferred_element_type=F32) + b2_ref[v]
        y3 = jnp.maximum(y3, 0.0)

        # stash channels (torch channel order within a view: y3, y2, y1) and pool
        for k, ch in enumerate((y3, y2, y1)):
            slab_ref[layers * v + k] = ch
            s = jnp.sum(jnp.sum(ch, axis=1, keepdims=True), axis=0, keepdims=True)
            pooled.append(s * inv_hw)                      # (1, 1)

    # ---- channel attention: fc1 -> relu -> fc2 -> sigmoid (rank-1 form) ----
    n_ch = view * layers
    h_att = fc1_b_ref[...]                                 # (1, 5C)
    fc1_w = fc1_w_ref[...]                                 # (C, 5C)
    for c in range(n_ch):
        h_att = h_att + pooled[c] * fc1_w[c:c + 1, :]
    h_att = jnp.maximum(h_att, 0.0)

    fc2_w = fc2_w_ref[...]                                 # (C, 5C) nn.Linear weight
    fc2_b = fc2_b_ref[...]                                 # (C, 1)
    cw = cw_ref[...]                                       # (C, 1) 1x1-conv weights
    acc = jnp.zeros((dn, fd), F32) + cb_ref[...]           # conv bias, broadcast
    for c in range(n_ch):
        att_c = jax.nn.sigmoid(
            jnp.sum(h_att * fc2_w[c:c + 1, :], axis=1, keepdims=True)
            + fc2_b[c:c + 1, :])                           # (1, 1)
        acc = acc + cw[c:c + 1, :] * jnp.maximum(att_c * slab_ref[c], 0.0)
    o_ref[...] = acc


# ------------------------------- module glue -----------------------------------

def init_params(key, fd, view=3, gcn_layers=3):
    c = view * gcn_layers
    ks = iter(jax.random.split(key, 32))

    def nrm(shape, scale=0.1):
        return scale * jax.random.normal(next(ks), shape, dtype=F32)

    return {
        # per-view GCN / GAT parameters stacked over the view axis (order: s, f, g)
        "gcn1_w": nrm((view, fd, fd)), "gcn1_b": nrm((view, 1, fd)),
        "gcn2_w": nrm((view, fd, fd)), "gcn2_b": nrm((view, 1, fd)),
        "gat_wlin": nrm((view, fd, 2 * fd)),
        "gat_asrc": nrm((view, 2, fd)),
        "gat_adst": nrm((view, 2, fd)),
        "gat_aedge": nrm((view, 2, fd)),
        "gat_wedge": nrm((view, 2, fd)),
        "gat_bias": nrm((view, 1, fd)),
        # channel attention + 1x1 conv
        "fc1_w": nrm((c, 5 * c)), "fc1_b": nrm((1, 5 * c)),
        "fc2_w": nrm((c, 5 * c)), "fc2_b": nrm((c, 1)),
        "conv_w": nrm((c, 1)), "conv_b": nrm((1, 1)),
    }


def embedding_d_forward(params, y_d, a_w_stack, mask_stack, dn, fd,
                        view=3, gcn_layers=3):
    vmem = pl.BlockSpec(memory_space=pltpu.MemorySpace.VMEM)
    kernel = functools.partial(_embedding_d_kernel, dn=dn, fd=fd,
                               view=view, layers=gcn_layers)
    out = pl.pallas_call(
        kernel,
        out_shape=jax.ShapeDtypeStruct((dn, fd), F32),
        in_specs=[vmem] * 19,
        out_specs=vmem,
        scratch_shapes=[pltpu.VMEM((view * gcn_layers, dn, fd), F32)],
    )(y_d.astype(F32), a_w_stack.astype(F32), mask_stack.astype(F32),
      params["gcn1_w"], params["gcn1_b"], params["gcn2_w"], params["gcn2_b"],
      params["gat_wlin"], params["gat_asrc"], params["gat_adst"],
      params["gat_aedge"], params["gat_wedge"], params["gat_bias"],
      params["fc1_w"], params["fc1_b"], params["fc2_w"], params["fc2_b"],
      params["conv_w"], params["conv_b"])
    # Equals torch `y.view(fd, dn).t()`: every stage after the cat is
    # channel-scalar / elementwise, channels were kept un-transposed (dn, fd),
    # so no final transpose is needed.
    return out


if __name__ == "__main__":
    # args: disease_number=16, fd=fm=32 (avg-pool requires fm == fd), view=3, gcn_layers=3
    dn, fd, view, gcn_layers = 16, 32, 3, 3
    key = jax.random.PRNGKey(0)
    k_p, k_x, k_s, k_f, k_g = jax.random.split(key, 5)

    params = init_params(k_p, fd, view, gcn_layers)
    y_d = jax.random.normal(k_x, (dn, fd), dtype=F32)   # torch.randn(disease_number, fd)

    def make_graph(k):
        w = jax.random.uniform(k, (dn, dn), dtype=F32)
        w = 0.5 * (w + w.T)
        w = w * (1.0 - jnp.eye(dn, dtype=F32))
        m = (w > 0.4).astype(F32)
        return w * m, m

    graphs = [make_graph(k_s), make_graph(k_f), make_graph(k_g)]   # order: s, f, g
    a_w_stack = jnp.stack([g[0] for g in graphs], axis=0)          # (3, dn, dn)
    mask_stack = jnp.stack([g[1] for g in graphs], axis=0)         # (3, dn, dn)

    y = embedding_d_forward(params, y_d, a_w_stack, mask_stack, dn, fd,
                            view, gcn_layers)
    y = jax.block_until_ready(y)
    assert y.shape == (dn, fd) and y.dtype == F32
    assert bool(jnp.all(jnp.isfinite(y)))
    print("KERNEL_OK")
</pallas_src>

<mosaic_0001>
module attributes {stable_mosaic.version = 11 : i64} {
  func.func @_embedding_d_kernel(%arg0: memref<16x32xf32, #tpu.memory_space<vmem>>, %arg1: memref<3x16x16xf32, #tpu.memory_space<vmem>>, %arg2: memref<3x16x16xf32, #tpu.memory_space<vmem>>, %arg3: memref<3x32x32xf32, #tpu.memory_space<vmem>>, %arg4: memref<3x1x32xf32, #tpu.memory_space<vmem>>, %arg5: memref<3x32x32xf32, #tpu.memory_space<vmem>>, %arg6: memref<3x1x32xf32, #tpu.memory_space<vmem>>, %arg7: memref<3x32x64xf32, #tpu.memory_space<vmem>>, %arg8: memref<3x2x32xf32, #tpu.memory_space<vmem>>, %arg9: memref<3x2x32xf32, #tpu.memory_space<vmem>>, %arg10: memref<3x2x32xf32, #tpu.memory_space<vmem>>, %arg11: memref<3x2x32xf32, #tpu.memory_space<vmem>>, %arg12: memref<3x1x32xf32, #tpu.memory_space<vmem>>, %arg13: memref<9x45xf32, #tpu.memory_space<vmem>>, %arg14: memref<1x45xf32, #tpu.memory_space<vmem>>, %arg15: memref<9x45xf32, #tpu.memory_space<vmem>>, %arg16: memref<9x1xf32, #tpu.memory_space<vmem>>, %arg17: memref<9x1xf32, #tpu.memory_space<vmem>>, %arg18: memref<1x1xf32, #tpu.memory_space<vmem>>, %arg19: memref<16x32xf32, #tpu.memory_space<vmem>>, %arg20: memref<9x16x32xf32, #tpu.memory_space<vmem>>) attributes {dimension_semantics = [], scalar_prefetch = 0 : i64, scratch_operands = 1 : i64, tpu.core_type = #tpu.core_type<tc>} {
    %c0 = arith.constant 0 : index
    %c0_0 = arith.constant 0 : index
    %0 = vector.load %arg0[%c0, %c0_0] : memref<16x32xf32, #tpu.memory_space<vmem>>, vector<16x32xf32>
    %1 = tpu.iota {dimensions = array<i32: 0>} : vector<16x16xi32>
    %2 = tpu.iota {dimensions = array<i32: 1>} : vector<16x16xi32>
    %3 = arith.cmpi eq, %1, %2 : vector<16x16xi32>
    %cst = arith.constant 1.000000e+00 : f32
    %cst_1 = arith.constant 0.000000e+00 : f32
    %4 = vector.broadcast %cst : f32 to vector<16x16xf32>
    %5 = vector.broadcast %cst_1 : f32 to vector<16x16xf32>
    %6 = arith.select %3, %4, %5 : vector<16x16xi1>, vector<16x16xf32>
    %c0_2 = arith.constant 0 : index
    %c0_3 = arith.constant 0 : index
    %c0_4 = arith.constant 0 : index
    %7 = vector.load %arg1[%c0_2, %c0_3, %c0_4] : memref<3x16x16xf32, #tpu.memory_space<vmem>>, vector<1x16x16xf32>
    %8 = vector.shape_cast %7 : vector<1x16x16xf32> to vector<16x16xf32>
    %c0_5 = arith.constant 0 : index
    %c0_6 = arith.constant 0 : index
    %c0_7 = arith.constant 0 : index
    %9 = vector.load %arg2[%c0_5, %c0_6, %c0_7] : memref<3x16x16xf32, #tpu.memory_space<vmem>>, vector<1x16x16xf32>
    %10 = vector.shape_cast %9 : vector<1x16x16xf32> to vector<16x16xf32>
    %11 = arith.addf %8, %6 : vector<16x16xf32>
    %cst_8 = arith.constant dense<0.000000e+00> : vector<16xf32>
    %12 = vector.multi_reduction <add>, %11, %cst_8 [1] : vector<16x16xf32> to vector<16xf32>
    %13 = vector.shape_cast %12 : vector<16xf32> to vector<16x1xf32>
    %14 = math.rsqrt %13 : vector<16x1xf32>
    %cst_9 = arith.constant dense<0.000000e+00> : vector<16xf32>
    %15 = vector.multi_reduction <add>, %11, %cst_9 [0] : vector<16x16xf32> to vector<16xf32>
    %16 = vector.shape_cast %15 : vector<16xf32> to vector<1x16xf32>
    %17 = math.rsqrt %16 : vector<1x16xf32>
    %18 = vector.broadcast %14 : vector<16x1xf32> to vector<16x16xf32>
    %19 = arith.mulf %18, %11 : vector<16x16xf32>
    %20 = vector.broadcast %17 : vector<1x16xf32> to vector<16x16xf32>
    %21 = arith.mulf %19, %20 : vector<16x16xf32>
    %c0_10 = arith.constant 0 : index
    %c0_11 = arith.constant 0 : index
    %c0_12 = arith.constant 0 : index
    %22 = vector.load %arg3[%c0_10, %c0_11, %c0_12] : memref<3x32x32xf32, #tpu.memory_space<vmem>>, vector<1x32x32xf32>
    %23 = vector.shape_cast %22 : vector<1x32x32xf32> to vector<32x32xf32>
    %cst_13 = arith.constant dense<0.000000e+00> : vector<16x32xf32>
    %24 = tpu.matmul %0, %23, %cst_13 {dimension_numbers = #tpu.dot_dimension_numbers<[1], [0], [0], [1], [0, 0, 1, 1], [], []>} : vector<16x32xf32>, vector<32x32xf32>, vector<16x32xf32> -> vector<16x32xf32>
    %cst_14 = arith.constant dense<0.000000e+00> : vector<16x32xf32>
    %25 = tpu.matmul %21, %24, %cst_14 {dimension_numbers = #tpu.dot_dimension_numbers<[1], [0], [0], [1], [0, 0, 1, 1], [], []>} : vector<16x16xf32>, vector<16x32xf32>, vector<16x32xf32> -> vector<16x32xf32>
    %c0_15 = arith.constant 0 : index
    %c0_16 = arith.constant 0 : index
    %c0_17 = arith.constant 0 : index
    %26 = vector.load %arg4[%c0_15, %c0_16, %c0_17] : memref<3x1x32xf32, #tpu.memory_space<vmem>>, vector<1x1x32xf32>
    %27 = vector.shape_cast %26 : vector<1x1x32xf32> to vector<1x32xf32>
    %28 = vector.broadcast %27 : vector<1x32xf32> to vector<16x32xf32>
    %29 = arith.addf %25, %28 : vector<16x32xf32>
    %cst_18 = arith.constant 0.000000e+00 : f32
    %30 = vector.broadcast %cst_18 : f32 to vector<16x32xf32>
    %31 = arith.maximumf %29, %30 : vector<16x32xf32>
    %c0_19 = arith.constant 0 : index
    %c0_20 = arith.constant 0 : index
    %c0_21 = arith.constant 0 : index
    %32 = vector.load %arg7[%c0_19, %c0_20, %c0_21] : memref<3x32x64xf32, #tpu.memory_space<vmem>>, vector<1x32x64xf32>
    %33 = vector.shape_cast %32 : vector<1x32x64xf32> to vector<32x64xf32>
    %cst_22 = arith.constant dense<0.000000e+00> : vector<16x64xf32>
    %34 = tpu.matmul %31, %33, %cst_22 {dimension_numbers = #tpu.dot_dimension_numbers<[1], [0], [0], [1], [0, 0, 1, 1], [], []>} : vector<16x32xf32>, vector<32x64xf32>, vector<16x64xf32> -> vector<16x64xf32>
    %cst_23 = arith.constant dense<0.000000e+00> : vector<16xf32>
    %35 = vector.multi_reduction <add>, %8, %cst_23 [1] : vector<16x16xf32> to vector<16xf32>
    %36 = vector.shape_cast %35 : vector<16xf32> to vector<16x1xf32>
    %cst_24 = arith.constant dense<0.000000e+00> : vector<1xf32>
    %37 = vector.multi_reduction <add>, %36, %cst_24 [0] : vector<16x1xf32> to vector<1xf32>
    %38 = vector.shape_cast %37 : vector<1xf32> to vector<1x1xf32>
    %cst_25 = arith.constant dense<0.000000e+00> : vector<16xf32>
    %39 = vector.multi_reduction <add>, %10, %cst_25 [1] : vector<16x16xf32> to vector<16xf32>
    %40 = vector.shape_cast %39 : vector<16xf32> to vector<16x1xf32>
    %cst_26 = arith.constant dense<0.000000e+00> : vector<1xf32>
    %41 = vector.multi_reduction <add>, %40, %cst_26 [0] : vector<16x1xf32> to vector<1xf32>
    %42 = vector.shape_cast %41 : vector<1xf32> to vector<1x1xf32>
    %cst_27 = arith.constant 1.000000e+00 : f32
    %43 = vector.broadcast %cst_27 : f32 to vector<1x1xf32>
    %44 = arith.maximumf %42, %43 : vector<1x1xf32>
    %45 = tpu.reciprocal %44 {approx = true} : vector<1x1xf32> -> vector<1x1xf32>
    %46 = arith.mulf %38, %45 : vector<1x1xf32>
    %47 = vector.broadcast %46 : vector<1x1xf32> to vector<16x16xf32>
    %48 = arith.mulf %47, %6 : vector<16x16xf32>
    %49 = arith.addf %8, %48 : vector<16x16xf32>
    %50 = arith.addf %10, %6 : vector<16x16xf32>
    %cst_28 = arith.constant 0.000000e+00 : f32
    %51 = vector.broadcast %cst_28 : f32 to vector<16x16xf32>
    %52 = arith.cmpf ogt, %50, %51 : vector<16x16xf32>
    %c0_29 = arith.constant 0 : index
    %c0_30 = arith.constant 0 : index
    %c0_31 = arith.constant 0 : index
    %53 = vector.load %arg8[%c0_29, %c0_30, %c0_31] : memref<3x2x32xf32, #tpu.memory_space<vmem>>, vector<1x2x32xf32>
    %54 = vector.shape_cast %53 : vector<1x2x32xf32> to vector<2x32xf32>
    %c0_32 = arith.constant 0 : index
    %c0_33 = arith.constant 0 : index
    %c0_34 = arith.constant 0 : index
    %55 = vector.load %arg9[%c0_32, %c0_33, %c0_34] : memref<3x2x32xf32, #tpu.memory_space<vmem>>, vector<1x2x32xf32>
    %56 = vector.shape_cast %55 : vector<1x2x32xf32> to vector<2x32xf32>
    %c0_35 = arith.constant 0 : index
    %c0_36 = arith.constant 0 : index
    %c0_37 = arith.constant 0 : index
    %57 = vector.load %arg10[%c0_35, %c0_36, %c0_37] : memref<3x2x32xf32, #tpu.memory_space<vmem>>, vector<1x2x32xf32>
    %58 = vector.shape_cast %57 : vector<1x2x32xf32> to vector<2x32xf32>
    %c0_38 = arith.constant 0 : index
    %c0_39 = arith.constant 0 : index
    %c0_40 = arith.constant 0 : index
    %59 = vector.load %arg11[%c0_38, %c0_39, %c0_40] : memref<3x2x32xf32, #tpu.memory_space<vmem>>, vector<1x2x32xf32>
    %60 = vector.shape_cast %59 : vector<1x2x32xf32> to vector<2x32xf32>
    %cst_41 = arith.constant 0.000000e+00 : f32
    %61 = vector.broadcast %cst_41 : f32 to vector<16x32xf32>
    %62 = vector.extract_strided_slice %34 {offsets = [0, 0], sizes = [16, 32], strides = [1, 1]} : vector<16x64xf32> to vector<16x32xf32>
    %63 = vector.extract_strided_slice %54 {offsets = [0, 0], sizes = [1, 32], strides = [1, 1]} : vector<2x32xf32> to vector<1x32xf32>
    %cst_42 = arith.constant dense<0.000000e+00> : vector<1x16xf32>
    %64 = tpu.matmul %63, %62, %cst_42 {dimension_numbers = #tpu.dot_dimension_numbers<[1], [1], [0], [0], [0, 0, 1, 0], [], []>} : vector<1x32xf32>, vector<16x32xf32>, vector<1x16xf32> -> vector<1x16xf32>
    %65 = vector.extract_strided_slice %56 {offsets = [0, 0], sizes = [1, 32], strides = [1, 1]} : vector<2x32xf32> to vector<1x32xf32>
    %66 = vector.broadcast %65 : vector<1x32xf32> to vector<16x32xf32>
    %67 = arith.mulf %62, %66 : vector<16x32xf32>
    %cst_43 = arith.constant dense<0.000000e+00> : vector<16xf32>
    %68 = vector.multi_reduction <add>, %67, %cst_43 [1] : vector<16x32xf32> to vector<16xf32>
    %69 = vector.shape_cast %68 : vector<16xf32> to vector<16x1xf32>
    %70 = vector.extract_strided_slice %60 {offsets = [0, 0], sizes = [1, 32], strides = [1, 1]} : vector<2x32xf32> to vector<1x32xf32>
    %71 = vector.extract_strided_slice %58 {offsets = [0, 0], sizes = [1, 32], strides = [1, 1]} : vector<2x32xf32> to vector<1x32xf32>
    %72 = arith.mulf %70, %71 : vector<1x32xf32>
    %cst_44 = arith.constant dense<0.000000e+00> : vector<1xf32>
    %73 = vector.multi_reduction <add>, %72, %cst_44 [1] : vector<1x32xf32> to vector<1xf32>
    %74 = vector.shape_cast %73 : vector<1xf32> to vector<1x1xf32>
    %75 = vector.broadcast %69 : vector<16x1xf32> to vector<16x16xf32>
    %76 = vector.broadcast %64 : vector<1x16xf32> to vector<16x16xf32>
    %77 = arith.addf %75, %76 : vector<16x16xf32>
    %78 = vector.broadcast %74 : vector<1x1xf32> to vector<16x16xf32>
    %79 = arith.mulf %49, %78 : vector<16x16xf32>
    %80 = arith.addf %77, %79 : vector<16x16xf32>
    %cst_45 = arith.constant 0.000000e+00 : f32
    %81 = vector.broadcast %cst_45 : f32 to vector<16x16xf32>
    %82 = arith.cmpf ogt, %80, %81 : vector<16x16xf32>
    %cst_46 = arith.constant 2.000000e-01 : f32
    %83 = vector.broadcast %cst_46 : f32 to vector<16x16xf32>
    %84 = arith.mulf %83, %80 : vector<16x16xf32>
    %85 = arith.select %82, %80, %84 : vector<16x16xi1>, vector<16x16xf32>
    %cst_47 = arith.constant -1.000000e+30 : f32
    %86 = vector.broadcast %cst_47 : f32 to vector<16x16xf32>
    %87 = arith.select %52, %85, %86 : vector<16x16xi1>, vector<16x16xf32>
    %cst_48 = arith.constant dense<0xFF800000> : vector<16xf32>
    %88 = vector.multi_reduction <maximumf>, %87, %cst_48 [1] : vector<16x16xf32> to vector<16xf32>
    %89 = vector.shape_cast %88 : vector<16xf32> to vector<16x1xf32>
    %90 = vector.broadcast %89 : vector<16x1xf32> to vector<16x16xf32>
    %91 = arith.subf %87, %90 : vector<16x16xf32>
    %92 = math.exp %91 : vector<16x16xf32>
    %cst_49 = arith.constant 0.000000e+00 : f32
    %93 = vector.broadcast %cst_49 : f32 to vector<16x16xf32>
    %94 = arith.select %52, %92, %93 : vector<16x16xi1>, vector<16x16xf32>
    %cst_50 = arith.constant dense<0.000000e+00> : vector<16xf32>
    %95 = vector.multi_reduction <add>, %94, %cst_50 [1] : vector<16x16xf32> to vector<16xf32>
    %96 = vector.shape_cast %95 : vector<16xf32> to vector<16x1xf32>
    %97 = tpu.reciprocal %96 {approx = true} : vector<16x1xf32> -> vector<16x1xf32>
    %98 = vector.broadcast %97 : vector<16x1xf32> to vector<16x16xf32>
    %99 = arith.mulf %94, %98 : vector<16x16xf32>
    %cst_51 = arith.constant dense<0.000000e+00> : vector<16x32xf32>
    %100 = tpu.matmul %99, %62, %cst_51 {dimension_numbers = #tpu.dot_dimension_numbers<[1], [0], [0], [1], [0, 0, 1, 1], [], []>} : vector<16x16xf32>, vector<16x32xf32>, vector<16x32xf32> -> vector<16x32xf32>
    %101 = arith.addf %61, %100 : vector<16x32xf32>
    %102 = vector.extract_strided_slice %34 {offsets = [0, 32], sizes = [16, 32], strides = [1, 1]} : vector<16x64xf32> to vector<16x32xf32>
    %103 = vector.extract_strided_slice %54 {offsets = [1, 0], sizes = [1, 32], strides = [1, 1]} : vector<2x32xf32> to vector<1x32xf32>
    %cst_52 = arith.constant dense<0.000000e+00> : vector<1x16xf32>
    %104 = tpu.matmul %103, %102, %cst_52 {dimension_numbers = #tpu.dot_dimension_numbers<[1], [1], [0], [0], [0, 0, 1, 0], [], []>} : vector<1x32xf32>, vector<16x32xf32>, vector<1x16xf32> -> vector<1x16xf32>
    %105 = vector.extract_strided_slice %56 {offsets = [1, 0], sizes = [1, 32], strides = [1, 1]} : vector<2x32xf32> to vector<1x32xf32>
    %106 = vector.broadcast %105 : vector<1x32xf32> to vector<16x32xf32>
    %107 = arith.mulf %102, %106 : vector<16x32xf32>
    %cst_53 = arith.constant dense<0.000000e+00> : vector<16xf32>
    %108 = vector.multi_reduction <add>, %107, %cst_53 [1] : vector<16x32xf32> to vector<16xf32>
    %109 = vector.shape_cast %108 : vector<16xf32> to vector<16x1xf32>
    %110 = vector.extract_strided_slice %60 {offsets = [1, 0], sizes = [1, 32], strides = [1, 1]} : vector<2x32xf32> to vector<1x32xf32>
    %111 = vector.extract_strided_slice %58 {offsets = [1, 0], sizes = [1, 32], strides = [1, 1]} : vector<2x32xf32> to vector<1x32xf32>
    %112 = arith.mulf %110, %111 : vector<1x32xf32>
    %cst_54 = arith.constant dense<0.000000e+00> : vector<1xf32>
    %113 = vector.multi_reduction <add>, %112, %cst_54 [1] : vector<1x32xf32> to vector<1xf32>
    %114 = vector.shape_cast %113 : vector<1xf32> to vector<1x1xf32>
    %115 = vector.broadcast %109 : vector<16x1xf32> to vector<16x16xf32>
    %116 = vector.broadcast %104 : vector<1x16xf32> to vector<16x16xf32>
    %117 = arith.addf %115, %116 : vector<16x16xf32>
    %118 = vector.broadcast %114 : vector<1x1xf32> to vector<16x16xf32>
    %119 = arith.mulf %49, %118 : vector<16x16xf32>
    %120 = arith.addf %117, %119 : vector<16x16xf32>
    %cst_55 = arith.constant 0.000000e+00 : f32
    %121 = vector.broadcast %cst_55 : f32 to vector<16x16xf32>
    %122 = arith.cmpf ogt, %120, %121 : vector<16x16xf32>
    %cst_56 = arith.constant 2.000000e-01 : f32
    %123 = vector.broadcast %cst_56 : f32 to vector<16x16xf32>
    %124 = arith.mulf %123, %120 : vector<16x16xf32>
    %125 = arith.select %122, %120, %124 : vector<16x16xi1>, vector<16x16xf32>
    %cst_57 = arith.constant -1.000000e+30 : f32
    %126 = vector.broadcast %cst_57 : f32 to vector<16x16xf32>
    %127 = arith.select %52, %125, %126 : vector<16x16xi1>, vector<16x16xf32>
    %cst_58 = arith.constant dense<0xFF800000> : vector<16xf32>
    %128 = vector.multi_reduction <maximumf>, %127, %cst_58 [1] : vector<16x16xf32> to vector<16xf32>
    %129 = vector.shape_cast %128 : vector<16xf32> to vector<16x1xf32>
    %130 = vector.broadcast %129 : vector<16x1xf32> to vector<16x16xf32>
    %131 = arith.subf %127, %130 : vector<16x16xf32>
    %132 = math.exp %131 : vector<16x16xf32>
    %cst_59 = arith.constant 0.000000e+00 : f32
    %133 = vector.broadcast %cst_59 : f32 to vector<16x16xf32>
    %134 = arith.select %52, %132, %133 : vector<16x16xi1>, vector<16x16xf32>
    %cst_60 = arith.constant dense<0.000000e+00> : vector<16xf32>
    %135 = vector.multi_reduction <add>, %134, %cst_60 [1] : vector<16x16xf32> to vector<16xf32>
    %136 = vector.shape_cast %135 : vector<16xf32> to vector<16x1xf32>
    %137 = tpu.reciprocal %136 {approx = true} : vector<16x1xf32> -> vector<16x1xf32>
    %138 = vector.broadcast %137 : vector<16x1xf32> to vector<16x16xf32>
    %139 = arith.mulf %134, %138 : vector<16x16xf32>
    %cst_61 = arith.constant dense<0.000000e+00> : vector<16x32xf32>
    %140 = tpu.matmul %139, %102, %cst_61 {dimension_numbers = #tpu.dot_dimension_numbers<[1], [0], [0], [1], [0, 0, 1, 1], [], []>} : vector<16x16xf32>, vector<16x32xf32>, vector<16x32xf32> -> vector<16x32xf32>
    %141 = arith.addf %101, %140 : vector<16x32xf32>
    %cst_62 = arith.constant 5.000000e-01 : f32
    %142 = vector.broadcast %cst_62 : f32 to vector<16x32xf32>
    %143 = arith.mulf %142, %141 : vector<16x32xf32>
    %c0_63 = arith.constant 0 : index
    %c0_64 = arith.constant 0 : index
    %c0_65 = arith.constant 0 : index
    %144 = vector.load %arg12[%c0_63, %c0_64, %c0_65] : memref<3x1x32xf32, #tpu.memory_space<vmem>>, vector<1x1x32xf32>
    %145 = vector.shape_cast %144 : vector<1x1x32xf32> to vector<1x32xf32>
    %146 = vector.broadcast %145 : vector<1x32xf32> to vector<16x32xf32>
    %147 = arith.addf %143, %146 : vector<16x32xf32>
    %cst_66 = arith.constant 0.000000e+00 : f32
    %148 = vector.broadcast %cst_66 : f32 to vector<16x32xf32>
    %149 = arith.maximumf %147, %148 : vector<16x32xf32>
    %c0_67 = arith.constant 0 : index
    %c0_68 = arith.constant 0 : index
    %c0_69 = arith.constant 0 : index
    %150 = vector.load %arg5[%c0_67, %c0_68, %c0_69] : memref<3x32x32xf32, #tpu.memory_space<vmem>>, vector<1x32x32xf32>
    %151 = vector.shape_cast %150 : vector<1x32x32xf32> to vector<32x32xf32>
    %cst_70 = arith.constant dense<0.000000e+00> : vector<16x32xf32>
    %152 = tpu.matmul %31, %151, %cst_70 {dimension_numbers = #tpu.dot_dimension_numbers<[1], [0], [0], [1], [0, 0, 1, 1], [], []>} : vector<16x32xf32>, vector<32x32xf32>, vector<16x32xf32> -> vector<16x32xf32>
    %cst_71 = arith.constant dense<0.000000e+00> : vector<16x32xf32>
    %153 = tpu.matmul %21, %152, %cst_71 {dimension_numbers = #tpu.dot_dimension_numbers<[1], [0], [0], [1], [0, 0, 1, 1], [], []>} : vector<16x16xf32>, vector<16x32xf32>, vector<16x32xf32> -> vector<16x32xf32>
    %c0_72 = arith.constant 0 : index
    %c0_73 = arith.constant 0 : index
    %c0_74 = arith.constant 0 : index
    %154 = vector.load %arg6[%c0_72, %c0_73, %c0_74] : memref<3x1x32xf32, #tpu.memory_space<vmem>>, vector<1x1x32xf32>
    %155 = vector.shape_cast %154 : vector<1x1x32xf32> to vector<1x32xf32>
    %156 = vector.broadcast %155 : vector<1x32xf32> to vector<16x32xf32>
    %157 = arith.addf %153, %156 : vector<16x32xf32>
    %cst_75 = arith.constant 0.000000e+00 : f32
    %158 = vector.broadcast %cst_75 : f32 to vector<16x32xf32>
    %159 = arith.maximumf %157, %158 : vector<16x32xf32>
    %c0_76 = arith.constant 0 : index
    %c0_77 = arith.constant 0 : index
    %c0_78 = arith.constant 0 : index
    %160 = vector.load %arg20[%c0_76, %c0_77, %c0_78] : memref<9x16x32xf32, #tpu.memory_space<vmem>>, vector<1x16x32xf32>
    %161 = vector.shape_cast %160 : vector<1x16x32xf32> to vector<16x32xf32>
    %162 = vector.shape_cast %159 : vector<16x32xf32> to vector<1x16x32xf32>
    tpu.vector_store %arg20[%c0_76, %c0_77, %c0_78], %162 {strides = array<i32>} : memref<9x16x32xf32, #tpu.memory_space<vmem>>, vector<1x16x32xf32>,
    %cst_79 = arith.constant dense<0.000000e+00> : vector<16xf32>
    %163 = vector.multi_reduction <add>, %159, %cst_79 [1] : vector<16x32xf32> to vector<16xf32>
    %164 = vector.shape_cast %163 : vector<16xf32> to vector<16x1xf32>
    %cst_80 = arith.constant dense<0.000000e+00> : vector<1xf32>
    %165 = vector.multi_reduction <add>, %164, %cst_80 [0] : vector<16x1xf32> to vector<1xf32>
    %166 = vector.shape_cast %165 : vector<1xf32> to vector<1x1xf32>
    %cst_81 = arith.constant 0.001953125 : f32
    %167 = vector.broadcast %cst_81 : f32 to vector<1x1xf32>
    %168 = arith.mulf %166, %167 : vector<1x1xf32>
    %c1 = arith.constant 1 : index
    %c0_82 = arith.constant 0 : index
    %c0_83 = arith.constant 0 : index
    %169 = vector.load %arg20[%c1, %c0_82, %c0_83] : memref<9x16x32xf32, #tpu.memory_space<vmem>>, vector<1x16x32xf32>
    %170 = vector.shape_cast %169 : vector<1x16x32xf32> to vector<16x32xf32>
    %171 = vector.shape_cast %149 : vector<16x32xf32> to vector<1x16x32xf32>
    tpu.vector_store %arg20[%c1, %c0_82, %c0_83], %171 {strides = array<i32>} : memref<9x16x32xf32, #tpu.memory_space<vmem>>, vector<1x16x32xf32>,
    %cst_84 = arith.constant dense<0.000000e+00> : vector<16xf32>
    %172 = vector.multi_reduction <add>, %149, %cst_84 [1] : vector<16x32xf32> to vector<16xf32>
    %173 = vector.shape_cast %172 : vector<16xf32> to vector<16x1xf32>
    %cst_85 = arith.constant dense<0.000000e+00> : vector<1xf32>
    %174 = vector.multi_reduction <add>, %173, %cst_85 [0] : vector<16x1xf32> to vector<1xf32>
    %175 = vector.shape_cast %174 : vector<1xf32> to vector<1x1xf32>
    %cst_86 = arith.constant 0.001953125 : f32
    %176 = vector.broadcast %cst_86 : f32 to vector<1x1xf32>
    %177 = arith.mulf %175, %176 : vector<1x1xf32>
    %c2 = arith.constant 2 : index
    %c0_87 = arith.constant 0 : index
    %c0_88 = arith.constant 0 : index
    %178 = vector.load %arg20[%c2, %c0_87, %c0_88] : memref<9x16x32xf32, #tpu.memory_space<vmem>>, vector<1x16x32xf32>
    %179 = vector.shape_cast %178 : vector<1x16x32xf32> to vector<16x32xf32>
    %180 = vector.shape_cast %31 : vector<16x32xf32> to vector<1x16x32xf32>
    tpu.vector_store %arg20[%c2, %c0_87, %c0_88], %180 {strides = array<i32>} : memref<9x16x32xf32, #tpu.memory_space<vmem>>, vector<1x16x32xf32>,
    %cst_89 = arith.constant dense<0.000000e+00> : vector<16xf32>
    %181 = vector.multi_reduction <add>, %31, %cst_89 [1] : vector<16x32xf32> to vector<16xf32>
    %182 = vector.shape_cast %181 : vector<16xf32> to vector<16x1xf32>
    %cst_90 = arith.constant dense<0.000000e+00> : vector<1xf32>
    %183 = vector.multi_reduction <add>, %182, %cst_90 [0] : vector<16x1xf32> to vector<1xf32>
    %184 = vector.shape_cast %183 : vector<1xf32> to vector<1x1xf32>
    %cst_91 = arith.constant 0.001953125 : f32
    %185 = vector.broadcast %cst_91 : f32 to vector<1x1xf32>
    %186 = arith.mulf %184, %185 : vector<1x1xf32>
    %c1_92 = arith.constant 1 : index
    %c0_93 = arith.constant 0 : index
    %c0_94 = arith.constant 0 : index
    %187 = vector.load %arg1[%c1_92, %c0_93, %c0_94] : memref<3x16x16xf32, #tpu.memory_space<vmem>>, vector<1x16x16xf32>
    %188 = vector.shape_cast %187 : vector<1x16x16xf32> to vector<16x16xf32>
    %c1_95 = arith.constant 1 : index
    %c0_96 = arith.constant 0 : index
    %c0_97 = arith.constant 0 : index
    %189 = vector.load %arg2[%c1_95, %c0_96, %c0_97] : memref<3x16x16xf32, #tpu.memory_space<vmem>>, vector<1x16x16xf32>
    %190 = vector.shape_cast %189 : vector<1x16x16xf32> to vector<16x16xf32>
    %191 = arith.addf %188, %6 : vector<16x16xf32>
    %cst_98 = arith.constant dense<0.000000e+00> : vector<16xf32>
    %192 = vector.multi_reduction <add>, %191, %cst_98 [1] : vector<16x16xf32> to vector<16xf32>
    %193 = vector.shape_cast %192 : vector<16xf32> to vector<16x1xf32>
    %194 = math.rsqrt %193 : vector<16x1xf32>
    %cst_99 = arith.constant dense<0.000000e+00> : vector<16xf32>
    %195 = vector.multi_reduction <add>, %191, %cst_99 [0] : vector<16x16xf32> to vector<16xf32>
    %196 = vector.shape_cast %195 : vector<16xf32> to vector<1x16xf32>
    %197 = math.rsqrt %196 : vector<1x16xf32>
    %198 = vector.broadcast %194 : vector<16x1xf32> to vector<16x16xf32>
    %199 = arith.mulf %198, %191 : vector<16x16xf32>
    %200 = vector.broadcast %197 : vector<1x16xf32> to vector<16x16xf32>
    %201 = arith.mulf %199, %200 : vector<16x16xf32>
    %c1_100 = arith.constant 1 : index
    %c0_101 = arith.constant 0 : index
    %c0_102 = arith.constant 0 : index
    %202 = vector.load %arg3[%c1_100, %c0_101, %c0_102] : memref<3x32x32xf32, #tpu.memory_space<vmem>>, vector<1x32x32xf32>
    %203 = vector.shape_cast %202 : vector<1x32x32xf32> to vector<32x32xf32>
    %cst_103 = arith.constant dense<0.000000e+00> : vector<16x32xf32>
    %204 = tpu.matmul %0, %203, %cst_103 {dimension_numbers = #tpu.dot_dimension_numbers<[1], [0], [0], [1], [0, 0, 1, 1], [], []>} : vector<16x32xf32>, vector<32x32xf32>, vector<16x32xf32> -> vector<16x32xf32>
    %cst_104 = arith.constant dense<0.000000e+00> : vector<16x32xf32>
    %205 = tpu.matmul %201, %204, %cst_104 {dimension_numbers = #tpu.dot_dimension_numbers<[1], [0], [0], [1], [0, 0, 1, 1], [], []>} : vector<16x16xf32>, vector<16x32xf32>, vector<16x32xf32> -> vector<16x32xf32>
    %c1_105 = arith.constant 1 : index
    %c0_106 = arith.constant 0 : index
    %c0_107 = arith.constant 0 : index
    %206 = vector.load %arg4[%c1_105, %c0_106, %c0_107] : memref<3x1x32xf32, #tpu.memory_space<vmem>>, vector<1x1x32xf32>
    %207 = vector.shape_cast %206 : vector<1x1x32xf32> to vector<1x32xf32>
    %208 = vector.broadcast %207 : vector<1x32xf32> to vector<16x32xf32>
    %209 = arith.addf %205, %208 : vector<16x32xf32>
    %cst_108 = arith.constant 0.000000e+00 : f32
    %210 = vector.broadcast %cst_108 : f32 to vector<16x32xf32>
    %211 = arith.maximumf %209, %210 : vector<16x32xf32>
    %c1_109 = arith.constant 1 : index
    %c0_110 = arith.constant 0 : index
    %c0_111 = arith.constant 0 : index
    %212 = vector.load %arg7[%c1_109, %c0_110, %c0_111] : memref<3x32x64xf32, #tpu.memory_space<vmem>>, vector<1x32x64xf32>
    %213 = vector.shape_cast %212 : vector<1x32x64xf32> to vector<32x64xf32>
    %cst_112 = arith.constant dense<0.000000e+00> : vector<16x64xf32>
    %214 = tpu.matmul %211, %213, %cst_112 {dimension_numbers = #tpu.dot_dimension_numbers<[1], [0], [0], [1], [0, 0, 1, 1], [], []>} : vector<16x32xf32>, vector<32x64xf32>, vector<16x64xf32> -> vector<16x64xf32>
    %cst_113 = arith.constant dense<0.000000e+00> : vector<16xf32>
    %215 = vector.multi_reduction <add>, %188, %cst_113 [1] : vector<16x16xf32> to vector<16xf32>
    %216 = vector.shape_cast %215 : vector<16xf32> to vector<16x1xf32>
    %cst_114 = arith.constant dense<0.000000e+00> : vector<1xf32>
    %217 = vector.multi_reduction <add>, %216, %cst_114 [0] : vector<16x1xf32> to vector<1xf32>
    %218 = vector.shape_cast %217 : vector<1xf32> to vector<1x1xf32>
    %cst_115 = arith.constant dense<0.000000e+00> : vector<16xf32>
    %219 = vector.multi_reduction <add>, %190, %cst_115 [1] : vector<16x16xf32> to vector<16xf32>
    %220 = vector.shape_cast %219 : vector<16xf32> to vector<16x1xf32>
    %cst_116 = arith.constant dense<0.000000e+00> : vector<1xf32>
    %221 = vector.multi_reduction <add>, %220, %cst_116 [0] : vector<16x1xf32> to vector<1xf32>
    %222 = vector.shape_cast %221 : vector<1xf32> to vector<1x1xf32>
    %cst_117 = arith.constant 1.000000e+00 : f32
    %223 = vector.broadcast %cst_117 : f32 to vector<1x1xf32>
    %224 = arith.maximumf %222, %223 : vector<1x1xf32>
    %225 = tpu.reciprocal %224 {approx = true} : vector<1x1xf32> -> vector<1x1xf32>
    %226 = arith.mulf %218, %225 : vector<1x1xf32>
    %227 = vector.broadcast %226 : vector<1x1xf32> to vector<16x16xf32>
    %228 = arith.mulf %227, %6 : vector<16x16xf32>
    %229 = arith.addf %188, %228 : vector<16x16xf32>
    %230 = arith.addf %190, %6 : vector<16x16xf32>
    %cst_118 = arith.constant 0.000000e+00 : f32
    %231 = vector.broadcast %cst_118 : f32 to vector<16x16xf32>
    %232 = arith.cmpf ogt, %230, %231 : vector<16x16xf32>
    %c1_119 = arith.constant 1 : index
    %c0_120 = arith.constant 0 : index
    %c0_121 = arith.constant 0 : index
    %233 = vector.load %arg8[%c1_119, %c0_120, %c0_121] : memref<3x2x32xf32, #tpu.memory_space<vmem>>, vector<1x2x32xf32>
    %234 = vector.shape_cast %233 : vector<1x2x32xf32> to vector<2x32xf32>
    %c1_122 = arith.constant 1 : index
    %c0_123 = arith.constant 0 : index
    %c0_124 = arith.constant 0 : index
    %235 = vector.load %arg9[%c1_122, %c0_123, %c0_124] : memref<3x2x32xf32, #tpu.memory_space<vmem>>, vector<1x2x32xf32>
    %236 = vector.shape_cast %235 : vector<1x2x32xf32> to vector<2x32xf32>
    %c1_125 = arith.constant 1 : index
    %c0_126 = arith.constant 0 : index
    %c0_127 = arith.constant 0 : index
    %237 = vector.load %arg10[%c1_125, %c0_126, %c0_127] : memref<3x2x32xf32, #tpu.memory_space<vmem>>, vector<1x2x32xf32>
    %238 = vector.shape_cast %237 : vector<1x2x32xf32> to vector<2x32xf32>
    %c1_128 = arith.constant 1 : index
    %c0_129 = arith.constant 0 : index
    %c0_130 = arith.constant 0 : index
    %239 = vector.load %arg11[%c1_128, %c0_129, %c0_130] : memref<3x2x32xf32, #tpu.memory_space<vmem>>, vector<1x2x32xf32>
    %240 = vector.shape_cast %239 : vector<1x2x32xf32> to vector<2x32xf32>
    %cst_131 = arith.constant 0.000000e+00 : f32
    %241 = vector.broadcast %cst_131 : f32 to vector<16x32xf32>
    %242 = vector.extract_strided_slice %214 {offsets = [0, 0], sizes = [16, 32], strides = [1, 1]} : vector<16x64xf32> to vector<16x32xf32>
    %243 = vector.extract_strided_slice %234 {offsets = [0, 0], sizes = [1, 32], strides = [1, 1]} : vector<2x32xf32> to vector<1x32xf32>
    %cst_132 = arith.constant dense<0.000000e+00> : vector<1x16xf32>
    %244 = tpu.matmul %243, %242, %cst_132 {dimension_numbers = #tpu.dot_dimension_numbers<[1], [1], [0], [0], [0, 0, 1, 0], [], []>} : vector<1x32xf32>, vector<16x32xf32>, vector<1x16xf32> -> vector<1x16xf32>
    %245 = vector.extract_strided_slice %236 {offsets = [0, 0], sizes = [1, 32], strides = [1, 1]} : vector<2x32xf32> to vector<1x32xf32>
    %246 = vector.broadcast %245 : vector<1x32xf32> to vector<16x32xf32>
    %247 = arith.mulf %242, %246 : vector<16x32xf32>
    %cst_133 = arith.constant dense<0.000000e+00> : vector<16xf32>
    %248 = vector.multi_reduction <add>, %247, %cst_133 [1] : vector<16x32xf32> to vector<16xf32>
    %249 = vector.shape_cast %248 : vector<16xf32> to vector<16x1xf32>
    %250 = vector.extract_strided_slice %240 {offsets = [0, 0], sizes = [1, 32], strides = [1, 1]} : vector<2x32xf32> to vector<1x32xf32>
    %251 = vector.extract_strided_slice %238 {offsets = [0, 0], sizes = [1, 32], strides = [1, 1]} : vector<2x32xf32> to vector<1x32xf32>
    %252 = arith.mulf %250, %251 : vector<1x32xf32>
    %cst_134 = arith.constant dense<0.000000e+00> : vector<1xf32>
    %253 = vector.multi_reduction <add>, %252, %cst_134 [1] : vector<1x32xf32> to vector<1xf32>
    %254 = vector.shape_cast %253 : vector<1xf32> to vector<1x1xf32>
    %255 = vector.broadcast %249 : vector<16x1xf32> to vector<16x16xf32>
    %256 = vector.broadcast %244 : vector<1x16xf32> to vector<16x16xf32>
    %257 = arith.addf %255, %256 : vector<16x16xf32>
    %258 = vector.broadcast %254 : vector<1x1xf32> to vector<16x16xf32>
    %259 = arith.mulf %229, %258 : vector<16x16xf32>
    %260 = arith.addf %257, %259 : vector<16x16xf32>
    %cst_135 = arith.constant 0.000000e+00 : f32
    %261 = vector.broadcast %cst_135 : f32 to vector<16x16xf32>
    %262 = arith.cmpf ogt, %260, %261 : vector<16x16xf32>
    %cst_136 = arith.constant 2.000000e-01 : f32
    %263 = vector.broadcast %cst_136 : f32 to vector<16x16xf32>
    %264 = arith.mulf %263, %260 : vector<16x16xf32>
    %265 = arith.select %262, %260, %264 : vector<16x16xi1>, vector<16x16xf32>
    %cst_137 = arith.constant -1.000000e+30 : f32
    %266 = vector.broadcast %cst_137 : f32 to vector<16x16xf32>
    %267 = arith.select %232, %265, %266 : vector<16x16xi1>, vector<16x16xf32>
    %cst_138 = arith.constant dense<0xFF800000> : vector<16xf32>
    %268 = vector.multi_reduction <maximumf>, %267, %cst_138 [1] : vector<16x16xf32> to vector<16xf32>
    %269 = vector.shape_cast %268 : vector<16xf32> to vector<16x1xf32>
    %270 = vector.broadcast %269 : vector<16x1xf32> to vector<16x16xf32>
    %271 = arith.subf %267, %270 : vector<16x16xf32>
    %272 = math.exp %271 : vector<16x16xf32>
    %cst_139 = arith.constant 0.000000e+00 : f32
    %273 = vector.broadcast %cst_139 : f32 to vector<16x16xf32>
    %274 = arith.select %232, %272, %273 : vector<16x16xi1>, vector<16x16xf32>
    %cst_140 = arith.constant dense<0.000000e+00> : vector<16xf32>
    %275 = vector.multi_reduction <add>, %274, %cst_140 [1] : vector<16x16xf32> to vector<16xf32>
    %276 = vector.shape_cast %275 : vector<16xf32> to vector<16x1xf32>
    %277 = tpu.reciprocal %276 {approx = true} : vector<16x1xf32> -> vector<16x1xf32>
    %278 = vector.broadcast %277 : vector<16x1xf32> to vector<16x16xf32>
    %279 = arith.mulf %274, %278 : vector<16x16xf32>
    %cst_141 = arith.constant dense<0.000000e+00> : vector<16x32xf32>
    %280 = tpu.matmul %279, %242, %cst_141 {dimension_numbers = #tpu.dot_dimension_numbers<[1], [0], [0], [1], [0, 0, 1, 1], [], []>} : vector<16x16xf32>, vector<16x32xf32>, vector<16x32xf32> -> vector<16x32xf32>
    %281 = arith.addf %241, %280 : vector<16x32xf32>
    %282 = vector.extract_strided_slice %214 {offsets = [0, 32], sizes = [16, 32], strides = [1, 1]} : vector<16x64xf32> to vector<16x32xf32>
    %283 = vector.extract_strided_slice %234 {offsets = [1, 0], sizes = [1, 32], strides = [1, 1]} : vector<2x32xf32> to vector<1x32xf32>
    %cst_142 = arith.constant dense<0.000000e+00> : vector<1x16xf32>
    %284 = tpu.matmul %283, %282, %cst_142 {dimension_numbers = #tpu.dot_dimension_numbers<[1], [1], [0], [0], [0, 0, 1, 0], [], []>} : vector<1x32xf32>, vector<16x32xf32>, vector<1x16xf32> -> vector<1x16xf32>
    %285 = vector.extract_strided_slice %236 {offsets = [1, 0], sizes = [1, 32], strides = [1, 1]} : vector<2x32xf32> to vector<1x32xf32>
    %286 = vector.broadcast %285 : vector<1x32xf32> to vector<16x32xf32>
    %287 = arith.mulf %282, %286 : vector<16x32xf32>
    %cst_143 = arith.constant dense<0.000000e+00> : vector<16xf32>
    %288 = vector.multi_reduction <add>, %287, %cst_143 [1] : vector<16x32xf32> to vector<16xf32>
    %289 = vector.shape_cast %288 : vector<16xf32> to vector<16x1xf32>
    %290 = vector.extract_strided_slice %240 {offsets = [1, 0], sizes = [1, 32], strides = [1, 1]} : vector<2x32xf32> to vector<1x32xf32>
    %291 = vector.extract_strided_slice %238 {offsets = [1, 0], sizes = [1, 32], strides = [1, 1]} : vector<2x32xf32> to vector<1x32xf32>
    %292 = arith.mulf %290, %291 : vector<1x32xf32>
    %cst_144 = arith.constant dense<0.000000e+00> : vector<1xf32>
    %293 = vector.multi_reduction <add>, %292, %cst_144 [1] : vector<1x32xf32> to vector<1xf32>
    %294 = vector.shape_cast %293 : vector<1xf32> to vector<1x1xf32>
    %295 = vector.broadcast %289 : vector<16x1xf32> to vector<16x16xf32>
    %296 = vector.broadcast %284 : vector<1x16xf32> to vector<16x16xf32>
    %297 = arith.addf %295, %296 : vector<16x16xf32>
    %298 = vector.broadcast %294 : vector<1x1xf32> to vector<16x16xf32>
    %299 = arith.mulf %229, %298 : vector<16x16xf32>
    %300 = arith.addf %297, %299 : vector<16x16xf32>
    %cst_145 = arith.constant 0.000000e+00 : f32
    %301 = vector.broadcast %cst_145 : f32 to vector<16x16xf32>
    %302 = arith.cmpf ogt, %300, %301 : vector<16x16xf32>
    %cst_146 = arith.constant 2.000000e-01 : f32
    %303 = vector.broadcast %cst_146 : f32 to vector<16x16xf32>
    %304 = arith.mulf %303, %300 : vector<16x16xf32>
    %305 = arith.select %302, %300, %304 : vector<16x16xi1>, vector<16x16xf32>
    %cst_147 = arith.constant -1.000000e+30 : f32
    %306 = vector.broadcast %cst_147 : f32 to vector<16x16xf32>
    %307 = arith.select %232, %305, %306 : vector<16x16xi1>, vector<16x16xf32>
    %cst_148 = arith.constant dense<0xFF800000> : vector<16xf32>
    %308 = vector.multi_reduction <maximumf>, %307, %cst_148 [1] : vector<16x16xf32> to vector<16xf32>
    %309 = vector.shape_cast %308 : vector<16xf32> to vector<16x1xf32>
    %310 = vector.broadcast %309 : vector<16x1xf32> to vector<16x16xf32>
    %311 = arith.subf %307, %310 : vector<16x16xf32>
    %312 = math.exp %311 : vector<16x16xf32>
    %cst_149 = arith.constant 0.000000e+00 : f32
    %313 = vector.broadcast %cst_149 : f32 to vector<16x16xf32>
    %314 = arith.select %232, %312, %313 : vector<16x16xi1>, vector<16x16xf32>
    %cst_150 = arith.constant dense<0.000000e+00> : vector<16xf32>
    %315 = vector.multi_reduction <add>, %314, %cst_150 [1] : vector<16x16xf32> to vector<16xf32>
    %316 = vector.shape_cast %315 : vector<16xf32> to vector<16x1xf32>
    %317 = tpu.reciprocal %316 {approx = true} : vector<16x1xf32> -> vector<16x1xf32>
    %318 = vector.broadcast %317 : vector<16x1xf32> to vector<16x16xf32>
    %319 = arith.mulf %314, %318 : vector<16x16xf32>
    %cst_151 = arith.constant dense<0.000000e+00> : vector<16x32xf32>
    %320 = tpu.matmul %319, %282, %cst_151 {dimension_numbers = #tpu.dot_dimension_numbers<[1], [0], [0], [1], [0, 0, 1, 1], [], []>} : vector<16x16xf32>, vector<16x32xf32>, vector<16x32xf32> -> vector<16x32xf32>
    %321 = arith.addf %281, %320 : vector<16x32xf32>
    %cst_152 = arith.constant 5.000000e-01 : f32
    %322 = vector.broadcast %cst_152 : f32 to vector<16x32xf32>
    %323 = arith.mulf %322, %321 : vector<16x32xf32>
    %c1_153 = arith.constant 1 : index
    %c0_154 = arith.constant 0 : index
    %c0_155 = arith.constant 0 : index
    %324 = vector.load %arg12[%c1_153, %c0_154, %c0_155] : memref<3x1x32xf32, #tpu.memory_space<vmem>>, vector<1x1x32xf32>
    %325 = vector.shape_cast %324 : vector<1x1x32xf32> to vector<1x32xf32>
    %326 = vector.broadcast %325 : vector<1x32xf32> to vector<16x32xf32>
    %327 = arith.addf %323, %326 : vector<16x32xf32>
    %cst_156 = arith.constant 0.000000e+00 : f32
    %328 = vector.broadcast %cst_156 : f32 to vector<16x32xf32>
    %329 = arith.maximumf %327, %328 : vector<16x32xf32>
    %c1_157 = arith.constant 1 : index
    %c0_158 = arith.constant 0 : index
    %c0_159 = arith.constant 0 : index
    %330 = vector.load %arg5[%c1_157, %c0_158, %c0_159] : memref<3x32x32xf32, #tpu.memory_space<vmem>>, vector<1x32x32xf32>
    %331 = vector.shape_cast %330 : vector<1x32x32xf32> to vector<32x32xf32>
    %cst_160 = arith.constant dense<0.000000e+00> : vector<16x32xf32>
    %332 = tpu.matmul %211, %331, %cst_160 {dimension_numbers = #tpu.dot_dimension_numbers<[1], [0], [0], [1], [0, 0, 1, 1], [], []>} : vector<16x32xf32>, vector<32x32xf32>, vector<16x32xf32> -> vector<16x32xf32>
    %cst_161 = arith.constant dense<0.000000e+00> : vector<16x32xf32>
    %333 = tpu.matmul %201, %332, %cst_161 {dimension_numbers = #tpu.dot_dimension_numbers<[1], [0], [0], [1], [0, 0, 1, 1], [], []>} : vector<16x16xf32>, vector<16x32xf32>, vector<16x32xf32> -> vector<16x32xf32>
    %c1_162 = arith.constant 1 : index
    %c0_163 = arith.constant 0 : index
    %c0_164 = arith.constant 0 : index
    %334 = vector.load %arg6[%c1_162, %c0_163, %c0_164] : memref<3x1x32xf32, #tpu.memory_space<vmem>>, vector<1x1x32xf32>
    %335 = vector.shape_cast %334 : vector<1x1x32xf32> to vector<1x32xf32>
    %336 = vector.broadcast %335 : vector<1x32xf32> to vector<16x32xf32>
    %337 = arith.addf %333, %336 : vector<16x32xf32>
    %cst_165 = arith.constant 0.000000e+00 : f32
    %338 = vector.broadcast %cst_165 : f32 to vector<16x32xf32>
    %339 = arith.maximumf %337, %338 : vector<16x32xf32>
    %c3 = arith.constant 3 : index
    %c0_166 = arith.constant 0 : index
    %c0_167 = arith.constant 0 : index
    %340 = vector.load %arg20[%c3, %c0_166, %c0_167] : memref<9x16x32xf32, #tpu.memory_space<vmem>>, vector<1x16x32xf32>
    %341 = vector.shape_cast %340 : vector<1x16x32xf32> to vector<16x32xf32>
    %342 = vector.shape_cast %339 : vector<16x32xf32> to vector<1x16x32xf32>
    tpu.vector_store %arg20[%c3, %c0_166, %c0_167], %342 {strides = array<i32>} : memref<9x16x32xf32, #tpu.memory_space<vmem>>, vector<1x16x32xf32>,
    %cst_168 = arith.constant dense<0.000000e+00> : vector<16xf32>
    %343 = vector.multi_reduction <add>, %339, %cst_168 [1] : vector<16x32xf32> to vector<16xf32>
    %344 = vector.shape_cast %343 : vector<16xf32> to vector<16x1xf32>
    %cst_169 = arith.constant dense<0.000000e+00> : vector<1xf32>
    %345 = vector.multi_reduction <add>, %344, %cst_169 [0] : vector<16x1xf32> to vector<1xf32>
    %346 = vector.shape_cast %345 : vector<1xf32> to vector<1x1xf32>
    %cst_170 = arith.constant 0.001953125 : f32
    %347 = vector.broadcast %cst_170 : f32 to vector<1x1xf32>
    %348 = arith.mulf %346, %347 : vector<1x1xf32>
    %c4 = arith.constant 4 : index
    %c0_171 = arith.constant 0 : index
    %c0_172 = arith.constant 0 : index
    %349 = vector.load %arg20[%c4, %c0_171, %c0_172] : memref<9x16x32xf32, #tpu.memory_space<vmem>>, vector<1x16x32xf32>
    %350 = vector.shape_cast %349 : vector<1x16x32xf32> to vector<16x32xf32>
    %351 = vector.shape_cast %329 : vector<16x32xf32> to vector<1x16x32xf32>
    tpu.vector_store %arg20[%c4, %c0_171, %c0_172], %351 {strides = array<i32>} : memref<9x16x32xf32, #tpu.memory_space<vmem>>, vector<1x16x32xf32>,
    %cst_173 = arith.constant dense<0.000000e+00> : vector<16xf32>
    %352 = vector.multi_reduction <add>, %329, %cst_173 [1] : vector<16x32xf32> to vector<16xf32>
    %353 = vector.shape_cast %352 : vector<16xf32> to vector<16x1xf32>
    %cst_174 = arith.constant dense<0.000000e+00> : vector<1xf32>
    %354 = vector.multi_reduction <add>, %353, %cst_174 [0] : vector<16x1xf32> to vector<1xf32>
    %355 = vector.shape_cast %354 : vector<1xf32> to vector<1x1xf32>
    %cst_175 = arith.constant 0.001953125 : f32
    %356 = vector.broadcast %cst_175 : f32 to vector<1x1xf32>
    %357 = arith.mulf %355, %356 : vector<1x1xf32>
    %c5 = arith.constant 5 : index
    %c0_176 = arith.constant 0 : index
    %c0_177 = arith.constant 0 : index
    %358 = vector.load %arg20[%c5, %c0_176, %c0_177] : memref<9x16x32xf32, #tpu.memory_space<vmem>>, vector<1x16x32xf32>
    %359 = vector.shape_cast %358 : vector<1x16x32xf32> to vector<16x32xf32>
    %360 = vector.shape_cast %211 : vector<16x32xf32> to vector<1x16x32xf32>
    tpu.vector_store %arg20[%c5, %c0_176, %c0_177], %360 {strides = array<i32>} : memref<9x16x32xf32, #tpu.memory_space<vmem>>, vector<1x16x32xf32>,
    %cst_178 = arith.constant dense<0.000000e+00> : vector<16xf32>
    %361 = vector.multi_reduction <add>, %211, %cst_178 [1] : vector<16x32xf32> to vector<16xf32>
    %362 = vector.shape_cast %361 : vector<16xf32> to vector<16x1xf32>
    %cst_179 = arith.constant dense<0.000000e+00> : vector<1xf32>
    %363 = vector.multi_reduction <add>, %362, %cst_179 [0] : vector<16x1xf32> to vector<1xf32>
    %364 = vector.shape_cast %363 : vector<1xf32> to vector<1x1xf32>
    %cst_180 = arith.constant 0.001953125 : f32
    %365 = vector.broadcast %cst_180 : f32 to vector<1x1xf32>
    %366 = arith.mulf %364, %365 : vector<1x1xf32>
    %c2_181 = arith.constant 2 : index
    %c0_182 = arith.constant 0 : index
    %c0_183 = arith.constant 0 : index
    %367 = vector.load %arg1[%c2_181, %c0_182, %c0_183] : memref<3x16x16xf32, #tpu.memory_space<vmem>>, vector<1x16x16xf32>
    %368 = vector.shape_cast %367 : vector<1x16x16xf32> to vector<16x16xf32>
    %c2_184 = arith.constant 2 : index
    %c0_185 = arith.constant 0 : index
    %c0_186 = arith.constant 0 : index
    %369 = vector.load %arg2[%c2_184, %c0_185, %c0_186] : memref<3x16x16xf32, #tpu.memory_space<vmem>>, vector<1x16x16xf32>
    %370 = vector.shape_cast %369 : vector<1x16x16xf32> to vector<16x16xf32>
    %371 = arith.addf %368, %6 : vector<16x16xf32>
    %cst_187 = arith.constant dense<0.000000e+00> : vector<16xf32>
    %372 = vector.multi_reduction <add>, %371, %cst_187 [1] : vector<16x16xf32> to vector<16xf32>
    %373 = vector.shape_cast %372 : vector<16xf32> to vector<16x1xf32>
    %374 = math.rsqrt %373 : vector<16x1xf32>
    %cst_188 = arith.constant dense<0.000000e+00> : vector<16xf32>
    %375 = vector.multi_reduction <add>, %371, %cst_188 [0] : vector<16x16xf32> to vector<16xf32>
    %376 = vector.shape_cast %375 : vector<16xf32> to vector<1x16xf32>
    %377 = math.rsqrt %376 : vector<1x16xf32>
    %378 = vector.broadcast %374 : vector<16x1xf32> to vector<16x16xf32>
    %379 = arith.mulf %378, %371 : vector<16x16xf32>
    %380 = vector.broadcast %377 : vector<1x16xf32> to vector<16x16xf32>
    %381 = arith.mulf %379, %380 : vector<16x16xf32>
    %c2_189 = arith.constant 2 : index
    %c0_190 = arith.constant 0 : index
    %c0_191 = arith.constant 0 : index
    %382 = vector.load %arg3[%c2_189, %c0_190, %c0_191] : memref<3x32x32xf32, #tpu.memory_space<vmem>>, vector<1x32x32xf32>
    %383 = vector.shape_cast %382 : vector<1x32x32xf32> to vector<32x32xf32>
    %cst_192 = arith.constant dense<0.000000e+00> : vector<16x32xf32>
    %384 = tpu.matmul %0, %383, %cst_192 {dimension_numbers = #tpu.dot_dimension_numbers<[1], [0], [0], [1], [0, 0, 1, 1], [], []>} : vector<16x32xf32>, vector<32x32xf32>, vector<16x32xf32> -> vector<16x32xf32>
    %cst_193 = arith.constant dense<0.000000e+00> : vector<16x32xf32>
    %385 = tpu.matmul %381, %384, %cst_193 {dimension_numbers = #tpu.dot_dimension_numbers<[1], [0], [0], [1], [0, 0, 1, 1], [], []>} : vector<16x16xf32>, vector<16x32xf32>, vector<16x32xf32> -> vector<16x32xf32>
    %c2_194 = arith.constant 2 : index
    %c0_195 = arith.constant 0 : index
    %c0_196 = arith.constant 0 : index
    %386 = vector.load %arg4[%c2_194, %c0_195, %c0_196] : memref<3x1x32xf32, #tpu.memory_space<vmem>>, vector<1x1x32xf32>
    %387 = vector.shape_cast %386 : vector<1x1x32xf32> to vector<1x32xf32>
    %388 = vector.broadcast %387 : vector<1x32xf32> to vector<16x32xf32>
    %389 = arith.addf %385, %388 : vector<16x32xf32>
    %cst_197 = arith.constant 0.000000e+00 : f32
    %390 = vector.broadcast %cst_197 : f32 to vector<16x32xf32>
    %391 = arith.maximumf %389, %390 : vector<16x32xf32>
    %c2_198 = arith.constant 2 : index
    %c0_199 = arith.constant 0 : index
    %c0_200 = arith.constant 0 : index
    %392 = vector.load %arg7[%c2_198, %c0_199, %c0_200] : memref<3x32x64xf32, #tpu.memory_space<vmem>>, vector<1x32x64xf32>
    %393 = vector.shape_cast %392 : vector<1x32x64xf32> to vector<32x64xf32>
    %cst_201 = arith.constant dense<0.000000e+00> : vector<16x64xf32>
    %394 = tpu.matmul %391, %393, %cst_201 {dimension_numbers = #tpu.dot_dimension_numbers<[1], [0], [0], [1], [0, 0, 1, 1], [], []>} : vector<16x32xf32>, vector<32x64xf32>, vector<16x64xf32> -> vector<16x64xf32>
    %cst_202 = arith.constant dense<0.000000e+00> : vector<16xf32>
    %395 = vector.multi_reduction <add>, %368, %cst_202 [1] : vector<16x16xf32> to vector<16xf32>
    %396 = vector.shape_cast %395 : vector<16xf32> to vector<16x1xf32>
    %cst_203 = arith.constant dense<0.000000e+00> : vector<1xf32>
    %397 = vector.multi_reduction <add>, %396, %cst_203 [0] : vector<16x1xf32> to vector<1xf32>
    %398 = vector.shape_cast %397 : vector<1xf32> to vector<1x1xf32>
    %cst_204 = arith.constant dense<0.000000e+00> : vector<16xf32>
    %399 = vector.multi_reduction <add>, %370, %cst_204 [1] : vector<16x16xf32> to vector<16xf32>
    %400 = vector.shape_cast %399 : vector<16xf32> to vector<16x1xf32>
    %cst_205 = arith.constant dense<0.000000e+00> : vector<1xf32>
    %401 = vector.multi_reduction <add>, %400, %cst_205 [0] : vector<16x1xf32> to vector<1xf32>
    %402 = vector.shape_cast %401 : vector<1xf32> to vector<1x1xf32>
    %cst_206 = arith.constant 1.000000e+00 : f32
    %403 = vector.broadcast %cst_206 : f32 to vector<1x1xf32>
    %404 = arith.maximumf %402, %403 : vector<1x1xf32>
    %405 = tpu.reciprocal %404 {approx = true} : vector<1x1xf32> -> vector<1x1xf32>
    %406 = arith.mulf %398, %405 : vector<1x1xf32>
    %407 = vector.broadcast %406 : vector<1x1xf32> to vector<16x16xf32>
    %408 = arith.mulf %407, %6 : vector<16x16xf32>
    %409 = arith.addf %368, %408 : vector<16x16xf32>
    %410 = arith.addf %370, %6 : vector<16x16xf32>
    %cst_207 = arith.constant 0.000000e+00 : f32
    %411 = vector.broadcast %cst_207 : f32 to vector<16x16xf32>
    %412 = arith.cmpf ogt, %410, %411 : vector<16x16xf32>
    %c2_208 = arith.constant 2 : index
    %c0_209 = arith.constant 0 : index
    %c0_210 = arith.constant 0 : index
    %413 = vector.load %arg8[%c2_208, %c0_209, %c0_210] : memref<3x2x32xf32, #tpu.memory_space<vmem>>, vector<1x2x32xf32>
    %414 = vector.shape_cast %413 : vector<1x2x32xf32> to vector<2x32xf32>
    %c2_211 = arith.constant 2 : index
    %c0_212 = arith.constant 0 : index
    %c0_213 = arith.constant 0 : index
    %415 = vector.load %arg9[%c2_211, %c0_212, %c0_213] : memref<3x2x32xf32, #tpu.memory_space<vmem>>, vector<1x2x32xf32>
    %416 = vector.shape_cast %415 : vector<1x2x32xf32> to vector<2x32xf32>
    %c2_214 = arith.constant 2 : index
    %c0_215 = arith.constant 0 : index
    %c0_216 = arith.constant 0 : index
    %417 = vector.load %arg10[%c2_214, %c0_215, %c0_216] : memref<3x2x32xf32, #tpu.memory_space<vmem>>, vector<1x2x32xf32>
    %418 = vector.shape_cast %417 : vector<1x2x32xf32> to vector<2x32xf32>
    %c2_217 = arith.constant 2 : index
    %c0_218 = arith.constant 0 : index
    %c0_219 = arith.constant 0 : index
    %419 = vector.load %arg11[%c2_217, %c0_218, %c0_219] : memref<3x2x32xf32, #tpu.memory_space<vmem>>, vector<1x2x32xf32>
    %420 = vector.shape_cast %419 : vector<1x2x32xf32> to vector<2x32xf32>
    %cst_220 = arith.constant 0.000000e+00 : f32
    %421 = vector.broadcast %cst_220 : f32 to vector<16x32xf32>
    %422 = vector.extract_strided_slice %394 {offsets = [0, 0], sizes = [16, 32], strides = [1, 1]} : vector<16x64xf32> to vector<16x32xf32>
    %423 = vector.extract_strided_slice %414 {offsets = [0, 0], sizes = [1, 32], strides = [1, 1]} : vector<2x32xf32> to vector<1x32xf32>
    %cst_221 = arith.constant dense<0.000000e+00> : vector<1x16xf32>
    %424 = tpu.matmul %423, %422, %cst_221 {dimension_numbers = #tpu.dot_dimension_numbers<[1], [1], [0], [0], [0, 0, 1, 0], [], []>} : vector<1x32xf32>, vector<16x32xf32>, vector<1x16xf32> -> vector<1x16xf32>
    %425 = vector.extract_strided_slice %416 {offsets = [0, 0], sizes = [1, 32], strides = [1, 1]} : vector<2x32xf32> to vector<1x32xf32>
    %426 = vector.broadcast %425 : vector<1x32xf32> to vector<16x32xf32>
    %427 = arith.mulf %422, %426 : vector<16x32xf32>
    %cst_222 = arith.constant dense<0.000000e+00> : vector<16xf32>
    %428 = vector.multi_reduction <add>, %427, %cst_222 [1] : vector<16x32xf32> to vector<16xf32>
    %429 = vector.shape_cast %428 : vector<16xf32> to vector<16x1xf32>
    %430 = vector.extract_strided_slice %420 {offsets = [0, 0], sizes = [1, 32], strides = [1, 1]} : vector<2x32xf32> to vector<1x32xf32>
    %431 = vector.extract_strided_slice %418 {offsets = [0, 0], sizes = [1, 32], strides = [1, 1]} : vector<2x32xf32> to vector<1x32xf32>
    %432 = arith.mulf %430, %431 : vector<1x32xf32>
    %cst_223 = arith.constant dense<0.000000e+00> : vector<1xf32>
    %433 = vector.multi_reduction <add>, %432, %cst_223 [1] : vector<1x32xf32> to vector<1xf32>
    %434 = vector.shape_cast %433 : vector<1xf32> to vector<1x1xf32>
    %435 = vector.broadcast %429 : vector<16x1xf32> to vector<16x16xf32>
    %436 = vector.broadcast %424 : vector<1x16xf32> to vector<16x16xf32>
    %437 = arith.addf %435, %436 : vector<16x16xf32>
    %438 = vector.broadcast %434 : vector<1x1xf32> to vector<16x16xf32>
    %439 = arith.mulf %409, %438 : vector<16x16xf32>
    %440 = arith.addf %437, %439 : vector<16x16xf32>
    %cst_224 = arith.constant 0.000000e+00 : f32
    %441 = vector.broadcast %cst_224 : f32 to vector<16x16xf32>
    %442 = arith.cmpf ogt, %440, %441 : vector<16x16xf32>
    %cst_225 = arith.constant 2.000000e-01 : f32
    %443 = vector.broadcast %cst_225 : f32 to vector<16x16xf32>
    %444 = arith.mulf %443, %440 : vector<16x16xf32>
    %445 = arith.select %442, %440, %444 : vector<16x16xi1>, vector<16x16xf32>
    %cst_226 = arith.constant -1.000000e+30 : f32
    %446 = vector.broadcast %cst_226 : f32 to vector<16x16xf32>
    %447 = arith.select %412, %445, %446 : vector<16x16xi1>, vector<16x16xf32>
    %cst_227 = arith.constant dense<0xFF800000> : vector<16xf32>
    %448 = vector.multi_reduction <maximumf>, %447, %cst_227 [1] : vector<16x16xf32> to vector<16xf32>
    %449 = vector.shape_cast %448 : vector<16xf32> to vector<16x1xf32>
    %450 = vector.broadcast %449 : vector<16x1xf32> to vector<16x16xf32>
    %451 = arith.subf %447, %450 : vector<16x16xf32>
    %452 = math.exp %451 : vector<16x16xf32>
    %cst_228 = arith.constant 0.000000e+00 : f32
    %453 = vector.broadcast %cst_228 : f32 to vector<16x16xf32>
    %454 = arith.select %412, %452, %453 : vector<16x16xi1>, vector<16x16xf32>
    %cst_229 = arith.constant dense<0.000000e+00> : vector<16xf32>
    %455 = vector.multi_reduction <add>, %454, %cst_229 [1] : vector<16x16xf32> to vector<16xf32>
    %456 = vector.shape_cast %455 : vector<16xf32> to vector<16x1xf32>
    %457 = tpu.reciprocal %456 {approx = true} : vector<16x1xf32> -> vector<16x1xf32>
    %458 = vector.broadcast %457 : vector<16x1xf32> to vector<16x16xf32>
    %459 = arith.mulf %454, %458 : vector<16x16xf32>
    %cst_230 = arith.constant dense<0.000000e+00> : vector<16x32xf32>
    %460 = tpu.matmul %459, %422, %cst_230 {dimension_numbers = #tpu.dot_dimension_numbers<[1], [0], [0], [1], [0, 0, 1, 1], [], []>} : vector<16x16xf32>, vector<16x32xf32>, vector<16x32xf32> -> vector<16x32xf32>
    %461 = arith.addf %421, %460 : vector<16x32xf32>
    %462 = vector.extract_strided_slice %394 {offsets = [0, 32], sizes = [16, 32], strides = [1, 1]} : vector<16x64xf32> to vector<16x32xf32>
    %463 = vector.extract_strided_slice %414 {offsets = [1, 0], sizes = [1, 32], strides = [1, 1]} : vector<2x32xf32> to vector<1x32xf32>
    %cst_231 = arith.constant dense<0.000000e+00> : vector<1x16xf32>
    %464 = tpu.matmul %463, %462, %cst_231 {dimension_numbers = #tpu.dot_dimension_numbers<[1], [1], [0], [0], [0, 0, 1, 0], [], []>} : vector<1x32xf32>, vector<16x32xf32>, vector<1x16xf32> -> vector<1x16xf32>
    %465 = vector.extract_strided_slice %416 {offsets = [1, 0], sizes = [1, 32], strides = [1, 1]} : vector<2x32xf32> to vector<1x32xf32>
    %466 = vector.broadcast %465 : vector<1x32xf32> to vector<16x32xf32>
    %467 = arith.mulf %462, %466 : vector<16x32xf32>
    %cst_232 = arith.constant dense<0.000000e+00> : vector<16xf32>
    %468 = vector.multi_reduction <add>, %467, %cst_232 [1] : vector<16x32xf32> to vector<16xf32>
    %469 = vector.shape_cast %468 : vector<16xf32> to vector<16x1xf32>
    %470 = vector.extract_strided_slice %420 {offsets = [1, 0], sizes = [1, 32], strides = [1, 1]} : vector<2x32xf32> to vector<1x32xf32>
    %471 = vector.extract_strided_slice %418 {offsets = [1, 0], sizes = [1, 32], strides = [1, 1]} : vector<2x32xf32> to vector<1x32xf32>
    %472 = arith.mulf %470, %471 : vector<1x32xf32>
    %cst_233 = arith.constant dense<0.000000e+00> : vector<1xf32>
    %473 = vector.multi_reduction <add>, %472, %cst_233 [1] : vector<1x32xf32> to vector<1xf32>
    %474 = vector.shape_cast %473 : vector<1xf32> to vector<1x1xf32>
    %475 = vector.broadcast %469 : vector<16x1xf32> to vector<16x16xf32>
    %476 = vector.broadcast %464 : vector<1x16xf32> to vector<16x16xf32>
    %477 = arith.addf %475, %476 : vector<16x16xf32>
    %478 = vector.broadcast %474 : vector<1x1xf32> to vector<16x16xf32>
    %479 = arith.mulf %409, %478 : vector<16x16xf32>
    %480 = arith.addf %477, %479 : vector<16x16xf32>
    %cst_234 = arith.constant 0.000000e+00 : f32
    %481 = vector.broadcast %cst_234 : f32 to vector<16x16xf32>
    %482 = arith.cmpf ogt, %480, %481 : vector<16x16xf32>
    %cst_235 = arith.constant 2.000000e-01 : f32
    %483 = vector.broadcast %cst_235 : f32 to vector<16x16xf32>
    %484 = arith.mulf %483, %480 : vector<16x16xf32>
    %485 = arith.select %482, %480, %484 : vector<16x16xi1>, vector<16x16xf32>
    %cst_236 = arith.constant -1.000000e+30 : f32
    %486 = vector.broadcast %cst_236 : f32 to vector<16x16xf32>
    %487 = arith.select %412, %485, %486 : vector<16x16xi1>, vector<16x16xf32>
    %cst_237 = arith.constant dense<0xFF800000> : vector<16xf32>
    %488 = vector.multi_reduction <maximumf>, %487, %cst_237 [1] : vector<16x16xf32> to vector<16xf32>
    %489 = vector.shape_cast %488 : vector<16xf32> to vector<16x1xf32>
    %490 = vector.broadcast %489 : vector<16x1xf32> to vector<16x16xf32>
    %491 = arith.subf %487, %490 : vector<16x16xf32>
    %492 = math.exp %491 : vector<16x16xf32>
    %cst_238 = arith.constant 0.000000e+00 : f32
    %493 = vector.broadcast %cst_238 : f32 to vector<16x16xf32>
    %494 = arith.select %412, %492, %493 : vector<16x16xi1>, vector<16x16xf32>
    %cst_239 = arith.constant dense<0.000000e+00> : vector<16xf32>
    %495 = vector.multi_reduction <add>, %494, %cst_239 [1] : vector<16x16xf32> to vector<16xf32>
    %496 = vector.shape_cast %495 : vector<16xf32> to vector<16x1xf32>
    %497 = tpu.reciprocal %496 {approx = true} : vector<16x1xf32> -> vector<16x1xf32>
    %498 = vector.broadcast %497 : vector<16x1xf32> to vector<16x16xf32>
    %499 = arith.mulf %494, %498 : vector<16x16xf32>
    %cst_240 = arith.constant dense<0.000000e+00> : vector<16x32xf32>
    %500 = tpu.matmul %499, %462, %cst_240 {dimension_numbers = #tpu.dot_dimension_numbers<[1], [0], [0], [1], [0, 0, 1, 1], [], []>} : vector<16x16xf32>, vector<16x32xf32>, vector<16x32xf32> -> vector<16x32xf32>
    %501 = arith.addf %461, %500 : vector<16x32xf32>
    %cst_241 = arith.constant 5.000000e-01 : f32
    %502 = vector.broadcast %cst_241 : f32 to vector<16x32xf32>
    %503 = arith.mulf %502, %501 : vector<16x32xf32>
    %c2_242 = arith.constant 2 : index
    %c0_243 = arith.constant 0 : index
    %c0_244 = arith.constant 0 : index
    %504 = vector.load %arg12[%c2_242, %c0_243, %c0_244] : memref<3x1x32xf32, #tpu.memory_space<vmem>>, vector<1x1x32xf32>
    %505 = vector.shape_cast %504 : vector<1x1x32xf32> to vector<1x32xf32>
    %506 = vector.broadcast %505 : vector<1x32xf32> to vector<16x32xf32>
    %507 = arith.addf %503, %506 : vector<16x32xf32>
    %cst_245 = arith.constant 0.000000e+00 : f32
    %508 = vector.broadcast %cst_245 : f32 to vector<16x32xf32>
    %509 = arith.maximumf %507, %508 : vector<16x32xf32>
    %c2_246 = arith.constant 2 : index
    %c0_247 = arith.constant 0 : index
    %c0_248 = arith.constant 0 : index
    %510 = vector.load %arg5[%c2_246, %c0_247, %c0_248] : memref<3x32x32xf32, #tpu.memory_space<vmem>>, vector<1x32x32xf32>
    %511 = vector.shape_cast %510 : vector<1x32x32xf32> to vector<32x32xf32>
    %cst_249 = arith.constant dense<0.000000e+00> : vector<16x32xf32>
    %512 = tpu.matmul %391, %511, %cst_249 {dimension_numbers = #tpu.dot_dimension_numbers<[1], [0], [0], [1], [0, 0, 1, 1], [], []>} : vector<16x32xf32>, vector<32x32xf32>, vector<16x32xf32> -> vector<16x32xf32>
    %cst_250 = arith.constant dense<0.000000e+00> : vector<16x32xf32>
    %513 = tpu.matmul %381, %512, %cst_250 {dimension_numbers = #tpu.dot_dimension_numbers<[1], [0], [0], [1], [0, 0, 1, 1], [], []>} : vector<16x16xf32>, vector<16x32xf32>, vector<16x32xf32> -> vector<16x32xf32>
    %c2_251 = arith.constant 2 : index
    %c0_252 = arith.constant 0 : index
    %c0_253 = arith.constant 0 : index
    %514 = vector.load %arg6[%c2_251, %c0_252, %c0_253] : memref<3x1x32xf32, #tpu.memory_space<vmem>>, vector<1x1x32xf32>
    %515 = vector.shape_cast %514 : vector<1x1x32xf32> to vector<1x32xf32>
    %516 = vector.broadcast %515 : vector<1x32xf32> to vector<16x32xf32>
    %517 = arith.addf %513, %516 : vector<16x32xf32>
    %cst_254 = arith.constant 0.000000e+00 : f32
    %518 = vector.broadcast %cst_254 : f32 to vector<16x32xf32>
    %519 = arith.maximumf %517, %518 : vector<16x32xf32>
    %c6 = arith.constant 6 : index
    %c0_255 = arith.constant 0 : index
    %c0_256 = arith.constant 0 : index
    %520 = vector.load %arg20[%c6, %c0_255, %c0_256] : memref<9x16x32xf32, #tpu.memory_space<vmem>>, vector<1x16x32xf32>
    %521 = vector.shape_cast %520 : vector<1x16x32xf32> to vector<16x32xf32>
    %522 = vector.shape_cast %519 : vector<16x32xf32> to vector<1x16x32xf32>
    tpu.vector_store %arg20[%c6, %c0_255, %c0_256], %522 {strides = array<i32>} : memref<9x16x32xf32, #tpu.memory_space<vmem>>, vector<1x16x32xf32>,
    %cst_257 = arith.constant dense<0.000000e+00> : vector<16xf32>
    %523 = vector.multi_reduction <add>, %519, %cst_257 [1] : vector<16x32xf32> to vector<16xf32>
    %524 = vector.shape_cast %523 : vector<16xf32> to vector<16x1xf32>
    %cst_258 = arith.constant dense<0.000000e+00> : vector<1xf32>
    %525 = vector.multi_reduction <add>, %524, %cst_258 [0] : vector<16x1xf32> to vector<1xf32>
    %526 = vector.shape_cast %525 : vector<1xf32> to vector<1x1xf32>
    %cst_259 = arith.constant 0.001953125 : f32
    %527 = vector.broadcast %cst_259 : f32 to vector<1x1xf32>
    %528 = arith.mulf %526, %527 : vector<1x1xf32>
    %c7 = arith.constant 7 : index
    %c0_260 = arith.constant 0 : index
    %c0_261 = arith.constant 0 : index
    %529 = vector.load %arg20[%c7, %c0_260, %c0_261] : memref<9x16x32xf32, #tpu.memory_space<vmem>>, vector<1x16x32xf32>
    %530 = vector.shape_cast %529 : vector<1x16x32xf32> to vector<16x32xf32>
    %531 = vector.shape_cast %509 : vector<16x32xf32> to vector<1x16x32xf32>
    tpu.vector_store %arg20[%c7, %c0_260, %c0_261], %531 {strides = array<i32>} : memref<9x16x32xf32, #tpu.memory_space<vmem>>, vector<1x16x32xf32>,
    %cst_262 = arith.constant dense<0.000000e+00> : vector<16xf32>
    %532 = vector.multi_reduction <add>, %509, %cst_262 [1] : vector<16x32xf32> to vector<16xf32>
    %533 = vector.shape_cast %532 : vector<16xf32> to vector<16x1xf32>
    %cst_263 = arith.constant dense<0.000000e+00> : vector<1xf32>
    %534 = vector.multi_reduction <add>, %533, %cst_263 [0] : vector<16x1xf32> to vector<1xf32>
    %535 = vector.shape_cast %534 : vector<1xf32> to vector<1x1xf32>
    %cst_264 = arith.constant 0.001953125 : f32
    %536 = vector.broadcast %cst_264 : f32 to vector<1x1xf32>
    %537 = arith.mulf %535, %536 : vector<1x1xf32>
    %c8 = arith.constant 8 : index
    %c0_265 = arith.constant 0 : index
    %c0_266 = arith.constant 0 : index
    %538 = vector.load %arg20[%c8, %c0_265, %c0_266] : memref<9x16x32xf32, #tpu.memory_space<vmem>>, vector<1x16x32xf32>
    %539 = vector.shape_cast %538 : vector<1x16x32xf32> to vector<16x32xf32>
    %540 = vector.shape_cast %391 : vector<16x32xf32> to vector<1x16x32xf32>
    tpu.vector_store %arg20[%c8, %c0_265, %c0_266], %540 {strides = array<i32>} : memref<9x16x32xf32, #tpu.memory_space<vmem>>, vector<1x16x32xf32>,
    %cst_267 = arith.constant dense<0.000000e+00> : vector<16xf32>
    %541 = vector.multi_reduction <add>, %391, %cst_267 [1] : vector<16x32xf32> to vector<16xf32>
    %542 = vector.shape_cast %541 : vector<16xf32> to vector<16x1xf32>
    %cst_268 = arith.constant dense<0.000000e+00> : vector<1xf32>
    %543 = vector.multi_reduction <add>, %542, %cst_268 [0] : vector<16x1xf32> to vector<1xf32>
    %544 = vector.shape_cast %543 : vector<1xf32> to vector<1x1xf32>
    %cst_269 = arith.constant 0.001953125 : f32
    %545 = vector.broadcast %cst_269 : f32 to vector<1x1xf32>
    %546 = arith.mulf %544, %545 : vector<1x1xf32>
    %c0_270 = arith.constant 0 : index
    %c0_271 = arith.constant 0 : index
    %547 = vector.load %arg14[%c0_270, %c0_271] : memref<1x45xf32, #tpu.memory_space<vmem>>, vector<1x45xf32>
    %c0_272 = arith.constant 0 : index
    %c0_273 = arith.constant 0 : index
    %548 = vector.load %arg13[%c0_272, %c0_273] : memref<9x45xf32, #tpu.memory_space<vmem>>, vector<9x45xf32>
    %549 = vector.extract_strided_slice %548 {offsets = [0, 0], sizes = [1, 45], strides = [1, 1]} : vector<9x45xf32> to vector<1x45xf32>
    %550 = vector.broadcast %168 : vector<1x1xf32> to vector<1x45xf32>
    %551 = arith.mulf %550, %549 : vector<1x45xf32>
    %552 = arith.addf %547, %551 : vector<1x45xf32>
    %553 = vector.extract_strided_slice %548 {offsets = [1, 0], sizes = [1, 45], strides = [1, 1]} : vector<9x45xf32> to vector<1x45xf32>
    %554 = vector.broadcast %177 : vector<1x1xf32> to vector<1x45xf32>
    %555 = arith.mulf %554, %553 : vector<1x45xf32>
    %556 = arith.addf %552, %555 : vector<1x45xf32>
    %557 = vector.extract_strided_slice %548 {offsets = [2, 0], sizes = [1, 45], strides = [1, 1]} : vector<9x45xf32> to vector<1x45xf32>
    %558 = vector.broadcast %186 : vector<1x1xf32> to vector<1x45xf32>
    %559 = arith.mulf %558, %557 : vector<1x45xf32>
    %560 = arith.addf %556, %559 : vector<1x45xf32>
    %561 = vector.extract_strided_slice %548 {offsets = [3, 0], sizes = [1, 45], strides = [1, 1]} : vector<9x45xf32> to vector<1x45xf32>
    %562 = vector.broadcast %348 : vector<1x1xf32> to vector<1x45xf32>
    %563 = arith.mulf %562, %561 : vector<1x45xf32>
    %564 = arith.addf %560, %563 : vector<1x45xf32>
    %565 = vector.extract_strided_slice %548 {offsets = [4, 0], sizes = [1, 45], strides = [1, 1]} : vector<9x45xf32> to vector<1x45xf32>
    %566 = vector.broadcast %357 : vector<1x1xf32> to vector<1x45xf32>
    %567 = arith.mulf %566, %565 : vector<1x45xf32>
    %568 = arith.addf %564, %567 : vector<1x45xf32>
    %569 = vector.extract_strided_slice %548 {offsets = [5, 0], sizes = [1, 45], strides = [1, 1]} : vector<9x45xf32> to vector<1x45xf32>
    %570 = vector.broadcast %366 : vector<1x1xf32> to vector<1x45xf32>
    %571 = arith.mulf %570, %569 : vector<1x45xf32>
    %572 = arith.addf %568, %571 : vector<1x45xf32>
    %573 = vector.extract_strided_slice %548 {offsets = [6, 0], sizes = [1, 45], strides = [1, 1]} : vector<9x45xf32> to vector<1x45xf32>
    %574 = vector.broadcast %528 : vector<1x1xf32> to vector<1x45xf32>
    %575 = arith.mulf %574, %573 : vector<1x45xf32>
    %576 = arith.addf %572, %575 : vector<1x45xf32>
    %577 = vector.extract_strided_slice %548 {offsets = [7, 0], sizes = [1, 45], strides = [1, 1]} : vector<9x45xf32> to vector<1x45xf32>
    %578 = vector.broadcast %537 : vector<1x1xf32> to vector<1x45xf32>
    %579 = arith.mulf %578, %577 : vector<1x45xf32>
    %580 = arith.addf %576, %579 : vector<1x45xf32>
    %581 = vector.extract_strided_slice %548 {offsets = [8, 0], sizes = [1, 45], strides = [1, 1]} : vector<9x45xf32> to vector<1x45xf32>
    %582 = vector.broadcast %546 : vector<1x1xf32> to vector<1x45xf32>
    %583 = arith.mulf %582, %581 : vector<1x45xf32>
    %584 = arith.addf %580, %583 : vector<1x45xf32>
    %cst_274 = arith.constant 0.000000e+00 : f32
    %585 = vector.broadcast %cst_274 : f32 to vector<1x45xf32>
    %586 = arith.maximumf %584, %585 : vector<1x45xf32>
    %c0_275 = arith.constant 0 : index
    %c0_276 = arith.constant 0 : index
    %587 = vector.load %arg15[%c0_275, %c0_276] : memref<9x45xf32, #tpu.memory_space<vmem>>, vector<9x45xf32>
    %c0_277 = arith.constant 0 : index
    %c0_278 = arith.constant 0 : index
    %588 = vector.load %arg16[%c0_277, %c0_278] : memref<9x1xf32, #tpu.memory_space<vmem>>, vector<9x1xf32>
    %c0_279 = arith.constant 0 : index
    %c0_280 = arith.constant 0 : index
    %589 = vector.load %arg17[%c0_279, %c0_280] : memref<9x1xf32, #tpu.memory_space<vmem>>, vector<9x1xf32>
    %cst_281 = arith.constant 0.000000e+00 : f32
    %590 = vector.broadcast %cst_281 : f32 to vector<16x32xf32>
    %c0_282 = arith.constant 0 : index
    %c0_283 = arith.constant 0 : index
    %591 = vector.load %arg18[%c0_282, %c0_283] : memref<1x1xf32, #tpu.memory_space<vmem>>, vector<1x1xf32>
    %592 = vector.broadcast %591 : vector<1x1xf32> to vector<16x32xf32>
    %593 = arith.addf %590, %592 : vector<16x32xf32>
    %594 = vector.extract_strided_slice %587 {offsets = [0, 0], sizes = [1, 45], strides = [1, 1]} : vector<9x45xf32> to vector<1x45xf32>
    %595 = arith.mulf %586, %594 : vector<1x45xf32>
    %cst_284 = arith.constant dense<0.000000e+00> : vector<1xf32>
    %596 = vector.multi_reduction <add>, %595, %cst_284 [1] : vector<1x45xf32> to vector<1xf32>
    %597 = vector.shape_cast %596 : vector<1xf32> to vector<1x1xf32>
    %598 = vector.extract_strided_slice %588 {offsets = [0, 0], sizes = [1, 1], strides = [1, 1]} : vector<9x1xf32> to vector<1x1xf32>
    %599 = arith.addf %597, %598 : vector<1x1xf32>
    %600 = arith.negf %599 : vector<1x1xf32>
    %601 = math.exp %600 : vector<1x1xf32>
    %cst_285 = arith.constant 1.000000e+00 : f32
    %602 = vector.broadcast %cst_285 : f32 to vector<1x1xf32>
    %603 = arith.addf %602, %601 : vector<1x1xf32>
    %604 = arith.divf %602, %603 : vector<1x1xf32>
    %605 = vector.extract_strided_slice %589 {offsets = [0, 0], sizes = [1, 1], strides = [1, 1]} : vector<9x1xf32> to vector<1x1xf32>
    %c0_286 = arith.constant 0 : index
    %c0_287 = arith.constant 0 : index
    %c0_288 = arith.constant 0 : index
    %606 = vector.load %arg20[%c0_286, %c0_287, %c0_288] : memref<9x16x32xf32, #tpu.memory_space<vmem>>, vector<1x16x32xf32>
    %607 = vector.shape_cast %606 : vector<1x16x32xf32> to vector<16x32xf32>
    %608 = vector.broadcast %604 : vector<1x1xf32> to vector<16x32xf32>
    %609 = arith.mulf %608, %607 : vector<16x32xf32>
    %cst_289 = arith.constant 0.000000e+00 : f32
    %610 = vector.broadcast %cst_289 : f32 to vector<16x32xf32>
    %611 = arith.maximumf %609, %610 : vector<16x32xf32>
    %612 = vector.broadcast %605 : vector<1x1xf32> to vector<16x32xf32>
    %613 = arith.mulf %612, %611 : vector<16x32xf32>
    %614 = arith.addf %593, %613 : vector<16x32xf32>
    %615 = vector.extract_strided_slice %587 {offsets = [1, 0], sizes = [1, 45], strides = [1, 1]} : vector<9x45xf32> to vector<1x45xf32>
    %616 = arith.mulf %586, %615 : vector<1x45xf32>
    %cst_290 = arith.constant dense<0.000000e+00> : vector<1xf32>
    %617 = vector.multi_reduction <add>, %616, %cst_290 [1] : vector<1x45xf32> to vector<1xf32>
    %618 = vector.shape_cast %617 : vector<1xf32> to vector<1x1xf32>
    %619 = vector.extract_strided_slice %588 {offsets = [1, 0], sizes = [1, 1], strides = [1, 1]} : vector<9x1xf32> to vector<1x1xf32>
    %620 = arith.addf %618, %619 : vector<1x1xf32>
    %621 = arith.negf %620 : vector<1x1xf32>
    %622 = math.exp %621 : vector<1x1xf32>
    %cst_291 = arith.constant 1.000000e+00 : f32
    %623 = vector.broadcast %cst_291 : f32 to vector<1x1xf32>
    %624 = arith.addf %623, %622 : vector<1x1xf32>
    %625 = arith.divf %623, %624 : vector<1x1xf32>
    %626 = vector.extract_strided_slice %589 {offsets = [1, 0], sizes = [1, 1], strides = [1, 1]} : vector<9x1xf32> to vector<1x1xf32>
    %c1_292 = arith.constant 1 : index
    %c0_293 = arith.constant 0 : index
    %c0_294 = arith.constant 0 : index
    %627 = vector.load %arg20[%c1_292, %c0_293, %c0_294] : memref<9x16x32xf32, #tpu.memory_space<vmem>>, vector<1x16x32xf32>
    %628 = vector.shape_cast %627 : vector<1x16x32xf32> to vector<16x32xf32>
    %629 = vector.broadcast %625 : vector<1x1xf32> to vector<16x32xf32>
    %630 = arith.mulf %629, %628 : vector<16x32xf32>
    %cst_295 = arith.constant 0.000000e+00 : f32
    %631 = vector.broadcast %cst_295 : f32 to vector<16x32xf32>
    %632 = arith.maximumf %630, %631 : vector<16x32xf32>
    %633 = vector.broadcast %626 : vector<1x1xf32> to vector<16x32xf32>
    %634 = arith.mulf %633, %632 : vector<16x32xf32>
    %635 = arith.addf %614, %634 : vector<16x32xf32>
    %636 = vector.extract_strided_slice %587 {offsets = [2, 0], sizes = [1, 45], strides = [1, 1]} : vector<9x45xf32> to vector<1x45xf32>
    %637 = arith.mulf %586, %636 : vector<1x45xf32>
    %cst_296 = arith.constant dense<0.000000e+00> : vector<1xf32>
    %638 = vector.multi_reduction <add>, %637, %cst_296 [1] : vector<1x45xf32> to vector<1xf32>
    %639 = vector.shape_cast %638 : vector<1xf32> to vector<1x1xf32>
    %640 = vector.extract_strided_slice %588 {offsets = [2, 0], sizes = [1, 1], strides = [1, 1]} : vector<9x1xf32> to vector<1x1xf32>
    %641 = arith.addf %639, %640 : vector<1x1xf32>
    %642 = arith.negf %641 : vector<1x1xf32>
    %643 = math.exp %642 : vector<1x1xf32>
    %cst_297 = arith.constant 1.000000e+00 : f32
    %644 = vector.broadcast %cst_297 : f32 to vector<1x1xf32>
    %645 = arith.addf %644, %643 : vector<1x1xf32>
    %646 = arith.divf %644, %645 : vector<1x1xf32>
    %647 = vector.extract_strided_slice %589 {offsets = [2, 0], sizes = [1, 1], strides = [1, 1]} : vector<9x1xf32> to vector<1x1xf32>
    %c2_298 = arith.constant 2 : index
    %c0_299 = arith.constant 0 : index
    %c0_300 = arith.constant 0 : index
    %648 = vector.load %arg20[%c2_298, %c0_299, %c0_300] : memref<9x16x32xf32, #tpu.memory_space<vmem>>, vector<1x16x32xf32>
    %649 = vector.shape_cast %648 : vector<1x16x32xf32> to vector<16x32xf32>
    %650 = vector.broadcast %646 : vector<1x1xf32> to vector<16x32xf32>
    %651 = arith.mulf %650, %649 : vector<16x32xf32>
    %cst_301 = arith.constant 0.000000e+00 : f32
    %652 = vector.broadcast %cst_301 : f32 to vector<16x32xf32>
    %653 = arith.maximumf %651, %652 : vector<16x32xf32>
    %654 = vector.broadcast %647 : vector<1x1xf32> to vector<16x32xf32>
    %655 = arith.mulf %654, %653 : vector<16x32xf32>
    %656 = arith.addf %635, %655 : vector<16x32xf32>
    %657 = vector.extract_strided_slice %587 {offsets = [3, 0], sizes = [1, 45], strides = [1, 1]} : vector<9x45xf32> to vector<1x45xf32>
    %658 = arith.mulf %586, %657 : vector<1x45xf32>
    %cst_302 = arith.constant dense<0.000000e+00> : vector<1xf32>
    %659 = vector.multi_reduction <add>, %658, %cst_302 [1] : vector<1x45xf32> to vector<1xf32>
    %660 = vector.shape_cast %659 : vector<1xf32> to vector<1x1xf32>
    %661 = vector.extract_strided_slice %588 {offsets = [3, 0], sizes = [1, 1], strides = [1, 1]} : vector<9x1xf32> to vector<1x1xf32>
    %662 = arith.addf %660, %661 : vector<1x1xf32>
    %663 = arith.negf %662 : vector<1x1xf32>
    %664 = math.exp %663 : vector<1x1xf32>
    %cst_303 = arith.constant 1.000000e+00 : f32
    %665 = vector.broadcast %cst_303 : f32 to vector<1x1xf32>
    %666 = arith.addf %665, %664 : vector<1x1xf32>
    %667 = arith.divf %665, %666 : vector<1x1xf32>
    %668 = vector.extract_strided_slice %589 {offsets = [3, 0], sizes = [1, 1], strides = [1, 1]} : vector<9x1xf32> to vector<1x1xf32>
    %c3_304 = arith.constant 3 : index
    %c0_305 = arith.constant 0 : index
    %c0_306 = arith.constant 0 : index
    %669 = vector.load %arg20[%c3_304, %c0_305, %c0_306] : memref<9x16x32xf32, #tpu.memory_space<vmem>>, vector<1x16x32xf32>
    %670 = vector.shape_cast %669 : vector<1x16x32xf32> to vector<16x32xf32>
    %671 = vector.broadcast %667 : vector<1x1xf32> to vector<16x32xf32>
    %672 = arith.mulf %671, %670 : vector<16x32xf32>
    %cst_307 = arith.constant 0.000000e+00 : f32
    %673 = vector.broadcast %cst_307 : f32 to vector<16x32xf32>
    %674 = arith.maximumf %672, %673 : vector<16x32xf32>
    %675 = vector.broadcast %668 : vector<1x1xf32> to vector<16x32xf32>
    %676 = arith.mulf %675, %674 : vector<16x32xf32>
    %677 = arith.addf %656, %676 : vector<16x32xf32>
    %678 = vector.extract_strided_slice %587 {offsets = [4, 0], sizes = [1, 45], strides = [1, 1]} : vector<9x45xf32> to vector<1x45xf32>
    %679 = arith.mulf %586, %678 : vector<1x45xf32>
    %cst_308 = arith.constant dense<0.000000e+00> : vector<1xf32>
    %680 = vector.multi_reduction <add>, %679, %cst_308 [1] : vector<1x45xf32> to vector<1xf32>
    %681 = vector.shape_cast %680 : vector<1xf32> to vector<1x1xf32>
    %682 = vector.extract_strided_slice %588 {offsets = [4, 0], sizes = [1, 1], strides = [1, 1]} : vector<9x1xf32> to vector<1x1xf32>
    %683 = arith.addf %681, %682 : vector<1x1xf32>
    %684 = arith.negf %683 : vector<1x1xf32>
    %685 = math.exp %684 : vector<1x1xf32>
    %cst_309 = arith.constant 1.000000e+00 : f32
    %686 = vector.broadcast %cst_309 : f32 to vector<1x1xf32>
    %687 = arith.addf %686, %685 : vector<1x1xf32>
    %688 = arith.divf %686, %687 : vector<1x1xf32>
    %689 = vector.extract_strided_slice %589 {offsets = [4, 0], sizes = [1, 1], strides = [1, 1]} : vector<9x1xf32> to vector<1x1xf32>
    %c4_310 = arith.constant 4 : index
    %c0_311 = arith.constant 0 : index
    %c0_312 = arith.constant 0 : index
    %690 = vector.load %arg20[%c4_310, %c0_311, %c0_312] : memref<9x16x32xf32, #tpu.memory_space<vmem>>, vector<1x16x32xf32>
    %691 = vector.shape_cast %690 : vector<1x16x32xf32> to vector<16x32xf32>
    %692 = vector.broadcast %688 : vector<1x1xf32> to vector<16x32xf32>
    %693 = arith.mulf %692, %691 : vector<16x32xf32>
    %cst_313 = arith.constant 0.000000e+00 : f32
    %694 = vector.broadcast %cst_313 : f32 to vector<16x32xf32>
    %695 = arith.maximumf %693, %694 : vector<16x32xf32>
    %696 = vector.broadcast %689 : vector<1x1xf32> to vector<16x32xf32>
    %697 = arith.mulf %696, %695 : vector<16x32xf32>
    %698 = arith.addf %677, %697 : vector<16x32xf32>
    %699 = vector.extract_strided_slice %587 {offsets = [5, 0], sizes = [1, 45], strides = [1, 1]} : vector<9x45xf32> to vector<1x45xf32>
    %700 = arith.mulf %586, %699 : vector<1x45xf32>
    %cst_314 = arith.constant dense<0.000000e+00> : vector<1xf32>
    %701 = vector.multi_reduction <add>, %700, %cst_314 [1] : vector<1x45xf32> to vector<1xf32>
    %702 = vector.shape_cast %701 : vector<1xf32> to vector<1x1xf32>
    %703 = vector.extract_strided_slice %588 {offsets = [5, 0], sizes = [1, 1], strides = [1, 1]} : vector<9x1xf32> to vector<1x1xf32>
    %704 = arith.addf %702, %703 : vector<1x1xf32>
    %705 = arith.negf %704 : vector<1x1xf32>
    %706 = math.exp %705 : vector<1x1xf32>
    %cst_315 = arith.constant 1.000000e+00 : f32
    %707 = vector.broadcast %cst_315 : f32 to vector<1x1xf32>
    %708 = arith.addf %707, %706 : vector<1x1xf32>
    %709 = arith.divf %707, %708 : vector<1x1xf32>
    %710 = vector.extract_strided_slice %589 {offsets = [5, 0], sizes = [1, 1], strides = [1, 1]} : vector<9x1xf32> to vector<1x1xf32>
    %c5_316 = arith.constant 5 : index
    %c0_317 = arith.constant 0 : index
    %c0_318 = arith.constant 0 : index
    %711 = vector.load %arg20[%c5_316, %c0_317, %c0_318] : memref<9x16x32xf32, #tpu.memory_space<vmem>>, vector<1x16x32xf32>
    %712 = vector.shape_cast %711 : vector<1x16x32xf32> to vector<16x32xf32>
    %713 = vector.broadcast %709 : vector<1x1xf32> to vector<16x32xf32>
    %714 = arith.mulf %713, %712 : vector<16x32xf32>
    %cst_319 = arith.constant 0.000000e+00 : f32
    %715 = vector.broadcast %cst_319 : f32 to vector<16x32xf32>
    %716 = arith.maximumf %714, %715 : vector<16x32xf32>
    %717 = vector.broadcast %710 : vector<1x1xf32> to vector<16x32xf32>
    %718 = arith.mulf %717, %716 : vector<16x32xf32>
    %719 = arith.addf %698, %718 : vector<16x32xf32>
    %720 = vector.extract_strided_slice %587 {offsets = [6, 0], sizes = [1, 45], strides = [1, 1]} : vector<9x45xf32> to vector<1x45xf32>
    %721 = arith.mulf %586, %720 : vector<1x45xf32>
    %cst_320 = arith.constant dense<0.000000e+00> : vector<1xf32>
    %722 = vector.multi_reduction <add>, %721, %cst_320 [1] : vector<1x45xf32> to vector<1xf32>
    %723 = vector.shape_cast %722 : vector<1xf32> to vector<1x1xf32>
    %724 = vector.extract_strided_slice %588 {offsets = [6, 0], sizes = [1, 1], strides = [1, 1]} : vector<9x1xf32> to vector<1x1xf32>
    %725 = arith.addf %723, %724 : vector<1x1xf32>
    %726 = arith.negf %725 : vector<1x1xf32>
    %727 = math.exp %726 : vector<1x1xf32>
    %cst_321 = arith.constant 1.000000e+00 : f32
    %728 = vector.broadcast %cst_321 : f32 to vector<1x1xf32>
    %729 = arith.addf %728, %727 : vector<1x1xf32>
    %730 = arith.divf %728, %729 : vector<1x1xf32>
    %731 = vector.extract_strided_slice %589 {offsets = [6, 0], sizes = [1, 1], strides = [1, 1]} : vector<9x1xf32> to vector<1x1xf32>
    %c6_322 = arith.constant 6 : index
    %c0_323 = arith.constant 0 : index
    %c0_324 = arith.constant 0 : index
    %732 = vector.load %arg20[%c6_322, %c0_323, %c0_324] : memref<9x16x32xf32, #tpu.memory_space<vmem>>, vector<1x16x32xf32>
    %733 = vector.shape_cast %732 : vector<1x16x32xf32> to vector<16x32xf32>
    %734 = vector.broadcast %730 : vector<1x1xf32> to vector<16x32xf32>
    %735 = arith.mulf %734, %733 : vector<16x32xf32>
    %cst_325 = arith.constant 0.000000e+00 : f32
    %736 = vector.broadcast %cst_325 : f32 to vector<16x32xf32>
    %737 = arith.maximumf %735, %736 : vector<16x32xf32>
    %738 = vector.broadcast %731 : vector<1x1xf32> to vector<16x32xf32>
    %739 = arith.mulf %738, %737 : vector<16x32xf32>
    %740 = arith.addf %719, %739 : vector<16x32xf32>
    %741 = vector.extract_strided_slice %587 {offsets = [7, 0], sizes = [1, 45], strides = [1, 1]} : vector<9x45xf32> to vector<1x45xf32>
    %742 = arith.mulf %586, %741 : vector<1x45xf32>
    %cst_326 = arith.constant dense<0.000000e+00> : vector<1xf32>
    %743 = vector.multi_reduction <add>, %742, %cst_326 [1] : vector<1x45xf32> to vector<1xf32>
    %744 = vector.shape_cast %743 : vector<1xf32> to vector<1x1xf32>
    %745 = vector.extract_strided_slice %588 {offsets = [7, 0], sizes = [1, 1], strides = [1, 1]} : vector<9x1xf32> to vector<1x1xf32>
    %746 = arith.addf %744, %745 : vector<1x1xf32>
    %747 = arith.negf %746 : vector<1x1xf32>
    %748 = math.exp %747 : vector<1x1xf32>
    %cst_327 = arith.constant 1.000000e+00 : f32
    %749 = vector.broadcast %cst_327 : f32 to vector<1x1xf32>
    %750 = arith.addf %749, %748 : vector<1x1xf32>
    %751 = arith.divf %749, %750 : vector<1x1xf32>
    %752 = vector.extract_strided_slice %589 {offsets = [7, 0], sizes = [1, 1], strides = [1, 1]} : vector<9x1xf32> to vector<1x1xf32>
    %c7_328 = arith.constant 7 : index
    %c0_329 = arith.constant 0 : index
    %c0_330 = arith.constant 0 : index
    %753 = vector.load %arg20[%c7_328, %c0_329, %c0_330] : memref<9x16x32xf32, #tpu.memory_space<vmem>>, vector<1x16x32xf32>
    %754 = vector.shape_cast %753 : vector<1x16x32xf32> to vector<16x32xf32>
    %755 = vector.broadcast %751 : vector<1x1xf32> to vector<16x32xf32>
    %756 = arith.mulf %755, %754 : vector<16x32xf32>
    %cst_331 = arith.constant 0.000000e+00 : f32
    %757 = vector.broadcast %cst_331 : f32 to vector<16x32xf32>
    %758 = arith.maximumf %756, %757 : vector<16x32xf32>
    %759 = vector.broadcast %752 : vector<1x1xf32> to vector<16x32xf32>
    %760 = arith.mulf %759, %758 : vector<16x32xf32>
    %761 = arith.addf %740, %760 : vector<16x32xf32>
    %762 = vector.extract_strided_slice %587 {offsets = [8, 0], sizes = [1, 45], strides = [1, 1]} : vector<9x45xf32> to vector<1x45xf32>
    %763 = arith.mulf %586, %762 : vector<1x45xf32>
    %cst_332 = arith.constant dense<0.000000e+00> : vector<1xf32>
    %764 = vector.multi_reduction <add>, %763, %cst_332 [1] : vector<1x45xf32> to vector<1xf32>
    %765 = vector.shape_cast %764 : vector<1xf32> to vector<1x1xf32>
    %766 = vector.extract_strided_slice %588 {offsets = [8, 0], sizes = [1, 1], strides = [1, 1]} : vector<9x1xf32> to vector<1x1xf32>
    %767 = arith.addf %765, %766 : vector<1x1xf32>
    %768 = arith.negf %767 : vector<1x1xf32>
    %769 = math.exp %768 : vector<1x1xf32>
    %cst_333 = arith.constant 1.000000e+00 : f32
    %770 = vector.broadcast %cst_333 : f32 to vector<1x1xf32>
    %771 = arith.addf %770, %769 : vector<1x1xf32>
    %772 = arith.divf %770, %771 : vector<1x1xf32>
    %773 = vector.extract_strided_slice %589 {offsets = [8, 0], sizes = [1, 1], strides = [1, 1]} : vector<9x1xf32> to vector<1x1xf32>
    %c8_334 = arith.constant 8 : index
    %c0_335 = arith.constant 0 : index
    %c0_336 = arith.constant 0 : index
    %774 = vector.load %arg20[%c8_334, %c0_335, %c0_336] : memref<9x16x32xf32, #tpu.memory_space<vmem>>, vector<1x16x32xf32>
    %775 = vector.shape_cast %774 : vector<1x16x32xf32> to vector<16x32xf32>
    %776 = vector.broadcast %772 : vector<1x1xf32> to vector<16x32xf32>
    %777 = arith.mulf %776, %775 : vector<16x32xf32>
    %cst_337 = arith.constant 0.000000e+00 : f32
    %778 = vector.broadcast %cst_337 : f32 to vector<16x32xf32>
    %779 = arith.maximumf %777, %778 : vector<16x32xf32>
    %780 = vector.broadcast %773 : vector<1x1xf32> to vector<16x32xf32>
    %781 = arith.mulf %780, %779 : vector<16x32xf32>
    %782 = arith.addf %761, %781 : vector<16x32xf32>
    %c0_338 = arith.constant 0 : index
    %c0_339 = arith.constant 0 : index
    %783 = vector.load %arg19[%c0_338, %c0_339] : memref<16x32xf32, #tpu.memory_space<vmem>>, vector<16x32xf32>
    tpu.vector_store %arg19[%c0_338, %c0_339], %782 {strides = array<i32>} : memref<16x32xf32, #tpu.memory_space<vmem>>, vector<16x32xf32>,
    return
  }
}

</mosaic_0001>

<bundles_post_ra>
// kernel: tpu_custom_call.1
= control target key start
LH: loop header
LB: loop body
LE: loop exit
PB: predicated region body
PF: predicated region fallthrough
CT: control target
= control target key end

     0   :  { %s5596_s0 = inlined_call_operand.vmem [shape: f32[16,32], index: 0, kind: input, shape index: {}]   ;;  %s5597_s1 = inlined_call_operand.hbm [shape: f32[3,16,16], index: 1, kind: input, shape index: {}]   ;;  %s5598_s2 = inlined_call_operand.hbm [shape: f32[3,16,16], index: 2, kind: input, shape index: {}]   ;;  %s5599_s3 = inlined_call_operand.hbm [shape: f32[3,32,32], index: 3, kind: input, shape index: {}]   ;;  %s5600_s4 = inlined_call_operand.hbm [shape: f32[3,1,32], index: 4, kind: input, shape index: {}]   ;;  %s5601_s5 = inlined_call_operand.hbm [shape: f32[3,32,32], index: 5, kind: input, shape index: {}]   ;;  %s5602_s6 = inlined_call_operand.hbm [shape: f32[3,1,32], index: 6, kind: input, shape index: {}]   ;;  %s5603_s7 = inlined_call_operand.hbm [shape: f32[3,32,64], index: 7, kind: input, shape index: {}]   ;;  %s5604_s8 = inlined_call_operand.vmem [shape: f32[3,2,32], index: 8, kind: input, shape index: {}]   ;;  %s5605_s9 = inlined_call_operand.vmem [shape: f32[3,2,32], index: 9, kind: input, shape index: {}]   ;;  %s5606_s10 = inlined_call_operand.vmem [shape: f32[3,2,32], index: 10, kind: input, shape index: {}]   ;;  %s5607_s11 = inlined_call_operand.vmem [shape: f32[3,2,32], index: 11, kind: input, shape index: {}]   ;;  %s5608_s12 = inlined_call_operand.vmem [shape: f32[3,1,32], index: 12, kind: input, shape index: {}]   ;;  %s5609_s13 = inlined_call_operand.vmem [shape: f32[9,45], index: 13, kind: input, shape index: {}]   ;;  %s5610_s14 = inlined_call_operand.vmem [shape: f32[1,45], index: 14, kind: input, shape index: {}]   ;;  %s5611_s15 = inlined_call_operand.vmem [shape: f32[9,45], index: 15, kind: input, shape index: {}]   ;;  %s5612_s16 = inlined_call_operand.vmem [shape: f32[9,1], index: 16, kind: input, shape index: {}]   ;;  %s5613_s17 = inlined_call_operand.vmem [shape: f32[9,1], index: 17, kind: input, shape index: {}]   ;;  %s5614_s18 = inlined_call_operand.<no memory space> [shape: f32[1,1], index: 18, kind: input, shape index: {}]   ;;  %s5615_s19 = inlined_call_operand.hbm [shape: f32[16,32], index: 19, kind: output, shape index: {}]  }
   0x1   :  { %5624 = sst [smem:[#allocation22_spill]] %s5596_s0  ;;  %v24_v0 = vstv %s5614_s18 }
   0x2   :  { %5625 = sst [smem:[#allocation23_spill]] %s5597_s1  ;;  %25 = vst [vmem:[#allocation3] sm:$0x1] %v24_v0 }
   0x3   :  { %5626 = sst [smem:[#allocation24_spill]] %s5598_s2 }
   0x4   :  { %5627 = sst [smem:[#allocation25_spill]] %s5599_s3 }
   0x5   :  { %26 = vsyncpa [#allocation5], 0 }
   0x6   :  { %27 = vsyncpa [#allocation8], 0 }
   0x7   :  { %28 = vsyncpa [#allocation11], 0 }
   0x8   :  { %29 = vsyncpa [#allocation14], 0 }
   0x9   :  { %30 = vsyncpa [#allocation6], 0  ;;  %s4697_s20 = smov [#allocation7]   ;;  %s4698_s1 = smov [#allocation10]  }
   0xa   :  { %s50_s21 = sshll.u32 %s4697_s20, 4  ;;  %s74_s22 = sshll.u32 %s4698_s1, 4  ;;  %s51_s21 = int_to_ptr.vmem [resolvable:$true] %s50_s21  ;;  %s4819_s22 = int_to_ptr.vmem [resolvable:$true] %s74_s22 }
   0xb   :  { %s5628_s24 = sld [smem:[#allocation24_spill]] }
  0x11   :  { %s4511_s25 = scalar_lea.hbm %s5628_s24, 768 }
  0x12   :  { %p4512_p0 = scmp.ne.s32.totalorder %s5628_s24, %s4511_s25  ;;  %p4515_p1 = scmp.lt.u32.totalorder %s4511_s25, %s5628_s24 }
  0x14   :  { %p4517_p2 = pnand %p4515_p1, %p4512_p0 }
  0x16   :  { %4520 = shalt.err (!%p4517_p2)
}
  0x17   :  { %s4521_s28 = scalar_lea.vmem %s51_s21, 768  ;;  %p4526_p4 = scmp.lt.s32.totalorder %s51_s21, %s51_s21 }
  0x18   :  { %p4522_p3 = scmp.ne.s32.totalorder %s51_s21, %s4521_s28  ;;  %p4527_p5 = scmp.lt.s32.totalorder %s4521_s28, %s4521_s28 }
  0x1a   :  { %p4528_p6 = por %p4527_p5, %p4526_p4 }
  0x1c   :  { %p4529_p7 = pnand %p4528_p6, %p4522_p3 }
  0x1e   :  { %4532 = shalt.err (!%p4529_p7)
}
  0x1f   :  { %s5620_s29 = smov 128   ;;  %s5622_s0 = smov 8  }
  0x20   :  { %56 = dma.hbm_to_vmem [thread:$0]  %s5628_s24, 768, %s51_s21, [#allocation8], %s5620_s29, %s5620_s29, %s5622_s0  }
  0x21   :  { %s4533_s23 = scalar_lea.hbm %s5600_s4, 48 }
  0x22   :  { %p4534_p8 = scmp.ne.s32.totalorder %s5600_s4, %s4533_s23  ;;  %p4537_p9 = scmp.lt.u32.totalorder %s4533_s23, %s5600_s4 }
  0x24   :  { %p4539_p10 = pnand %p4537_p9, %p4534_p8 }
  0x26   :  { %4542 = shalt.err (!%p4539_p10)
}
  0x27   :  { %s4543_s27 = scalar_lea.vmem %s4819_s22, 48  ;;  %s4547_s21 = scalar_lea.vmem %s4819_s22, 64 }
  0x28   :  { %p4544_p11 = scmp.ne.s32.totalorder %s4819_s22, %s4543_s27  ;;  %p4548_p12 = scmp.lt.s32.totalorder %s4819_s22, %s4819_s22 }
  0x29   :  { %p4549_p13 = scmp.lt.s32.totalorder %s4547_s21, %s4543_s27 }
  0x2b   :  { %p4550_p0 = por %p4549_p13, %p4548_p12 }
  0x2d   :  { %p4551_p1 = pnand %p4550_p0, %p4544_p11 }
  0x2f   :  { %4554 = shalt.err (!%p4551_p1)
}
  0x30   :  { %s4701_s24 = smov 16   ;;  %s4702_s28 = smov 1  }
  0x31   :  { %80 = dma.hbm_to_vmem [thread:$0]  %s5600_s4, 48, %s4819_s22, [#allocation11], %s4701_s24, %s4701_s24, %s4702_s28  }
  0x32   :  { %s4703_s1 = smov [#allocation13]   ;;  %s4704_s23 = smov [#allocation4]  }
  0x33   :  { %s98_s2 = sshll.u32 %s4703_s1, 4  ;;  %s38_s25 = sshll.u32 %s4704_s23, 4  ;;  %s99_s2 = int_to_ptr.vmem [resolvable:$true] %s98_s2  ;;  %s4854_s25 = int_to_ptr.vmem [resolvable:$true] %s38_s25 }
  0x34   :  { %s4555_s18 = scalar_lea.hbm %s5602_s6, 48 }
  0x35   :  { %p4556_p2 = scmp.ne.s32.totalorder %s5602_s6, %s4555_s18  ;;  %p4559_p3 = scmp.lt.u32.totalorder %s4555_s18, %s5602_s6 }
  0x37   :  { %p4561_p4 = pnand %p4559_p3, %p4556_p2 }
  0x39   :  { %4564 = shalt.err (!%p4561_p4)
}
  0x3a   :  { %s4565_s4 = scalar_lea.vmem %s99_s2, 48  ;;  %s4569_s22 = scalar_lea.vmem %s99_s2, 64 }
  0x3b   :  { %p4566_p5 = scmp.ne.s32.totalorder %s99_s2, %s4565_s4  ;;  %p4570_p6 = scmp.lt.s32.totalorder %s99_s2, %s99_s2 }
  0x3c   :  { %p4571_p7 = scmp.lt.s32.totalorder %s4569_s22, %s4565_s4 }
  0x3e   :  { %p4572_p8 = por %p4571_p7, %p4570_p6 }
  0x40   :  { %p4573_p9 = pnand %p4572_p8, %p4566_p5 }
  0x42   :  { %4576 = shalt.err (!%p4573_p9)
}
  0x43   :  { %104 = dma.hbm_to_vmem [thread:$0]  %s5602_s6, 48, %s99_s2, [#allocation14], %s4701_s24, %s4701_s24, %s4702_s28  }
  0x44   :  { %s5629_s3 = sld [smem:[#allocation23_spill]] }
  0x4a   :  { %s4577_s26 = scalar_lea.hbm %s5629_s3, 768 }
  0x4b   :  { %p4578_p10 = scmp.ne.s32.totalorder %s5629_s3, %s4577_s26  ;;  %p4581_p11 = scmp.lt.u32.totalorder %s4577_s26, %s5629_s3 }
  0x4d   :  { %p4583_p12 = pnand %p4581_p11, %p4578_p10 }
  0x4f   :  { %4586 = shalt.err (!%p4583_p12)
}
  0x50   :  { %s4587_s21 = scalar_lea.vmem %s4854_s25, 768  ;;  %p4592_p0 = scmp.lt.s32.totalorder %s4854_s25, %s4854_s25 }
  0x51   :  { %p4588_p13 = scmp.ne.s32.totalorder %s4854_s25, %s4587_s21  ;;  %p4593_p1 = scmp.lt.s32.totalorder %s4587_s21, %s4587_s21 }
  0x53   :  { %p4594_p2 = por %p4593_p1, %p4592_p0 }
  0x55   :  { %p4595_p3 = pnand %p4594_p2, %p4588_p13 }
  0x57   :  { %4598 = shalt.err (!%p4595_p3)
}
  0x58   :  { %s5630_s6 = smov 8   ;;  %s5631_s24 = smov 128  }
  0x59   :  { %44 = dma.hbm_to_vmem [thread:$0]  %s5629_s3, 768, %s4854_s25, [#allocation5], %s5631_s24, %s5631_s24, %s5630_s6  }
  0x5a   :  { %s4705_s4 = smov [#allocation9]   ;;  %s4706_s30 = smov [#allocation12]  }
  0x5b   :  { %s62_s22 = sshll.u32 %s4705_s4, 4  ;;  %s86_s20 = sshll.u32 %s4706_s30, 4  ;;  %s63_s22 = int_to_ptr.vmem [resolvable:$true] %s62_s22  ;;  %s4888_s20 = int_to_ptr.vmem [resolvable:$true] %s86_s20 }
  0x5c   :  { %s5632_s26 = sld [smem:[#allocation25_spill]] }
  0x62   :  { %s4599_s29 = scalar_lea.hbm %s5632_s26, 1536 }
  0x63   :  { %p4600_p4 = scmp.ne.s32.totalorder %s5632_s26, %s4599_s29  ;;  %p4603_p5 = scmp.lt.u32.totalorder %s4599_s29, %s5632_s26 }
  0x65   :  { %p4605_p6 = pnand %p4603_p5, %p4600_p4 }
  0x67   :  { %4608 = shalt.err (!%p4605_p6)
}
  0x68   :  { %s4609_s25 = scalar_lea.vmem %s63_s22, 1536  ;;  %p4614_p8 = scmp.lt.s32.totalorder %s63_s22, %s63_s22 }
  0x69   :  { %p4610_p7 = scmp.ne.s32.totalorder %s63_s22, %s4609_s25  ;;  %p4615_p9 = scmp.lt.s32.totalorder %s4609_s25, %s4609_s25 }
  0x6b   :  { %p4616_p10 = por %p4615_p9, %p4614_p8 }
  0x6d   :  { %p4617_p11 = pnand %p4616_p10, %p4610_p7 }
  0x6f   :  { %4620 = shalt.err (!%p4617_p11)
}
  0x70   :  { %68 = dma.hbm_to_vmem [thread:$0]  %s5632_s26, 1536, %s63_s22, [#allocation8], %s5631_s24, %s5631_s24, %s5630_s6  }
  0x71   :  { %s4621_s30 = scalar_lea.hbm %s5601_s5, 1536 }
  0x72   :  { %p4622_p12 = scmp.ne.s32.totalorder %s5601_s5, %s4621_s30  ;;  %p4625_p13 = scmp.lt.u32.totalorder %s4621_s30, %s5601_s5 }
  0x74   :  { %p4627_p0 = pnand %p4625_p13, %p4622_p12 }
  0x76   :  { %4630 = shalt.err (!%p4627_p0)
}
  0x77   :  { %s4631_s18 = scalar_lea.vmem %s4888_s20, 1536  ;;  %p4636_p2 = scmp.lt.s32.totalorder %s4888_s20, %s4888_s20 }
  0x78   :  { %p4632_p1 = scmp.ne.s32.totalorder %s4888_s20, %s4631_s18  ;;  %p4637_p3 = scmp.lt.s32.totalorder %s4631_s18, %s4631_s18 }
  0x7a   :  { %p4638_p4 = por %p4637_p3, %p4636_p2 }
  0x7c   :  { %p4639_p5 = pnand %p4638_p4, %p4632_p1 }
  0x7e   :  { %4642 = shalt.err (!%p4639_p5)
}
  0x7f   :  { %92 = dma.hbm_to_vmem [thread:$0]  %s5601_s5, 1536, %s4888_s20, [#allocation11], %s5631_s24, %s5631_s24, %s5630_s6  }
  0x80   :  { %s4707_s27 = smov [#allocation15]   ;;  %s4643_s28 = scalar_lea.hbm %s5603_s7, 1536 }
  0x81   :  { %s110_s21 = sshll.u32 %s4707_s27, 4  ;;  %p4644_p6 = scmp.ne.s32.totalorder %s5603_s7, %s4643_s28  ;;  %s111_s21 = int_to_ptr.vmem [resolvable:$true] %s110_s21 }
  0x82   :  { %p4647_p7 = scmp.lt.u32.totalorder %s4643_s28, %s5603_s7 }
  0x84   :  { %p4649_p8 = pnand %p4647_p7, %p4644_p6 }
  0x86   :  { %4652 = shalt.err (!%p4649_p8)
}
  0x87   :  { %s4653_s23 = scalar_lea.vmem %s111_s21, 1536  ;;  %p4658_p10 = scmp.lt.s32.totalorder %s111_s21, %s111_s21 }
  0x88   :  { %p4654_p9 = scmp.ne.s32.totalorder %s111_s21, %s4653_s23  ;;  %p4659_p11 = scmp.lt.s32.totalorder %s4653_s23, %s4653_s23 }
  0x8a   :  { %p4660_p12 = por %p4659_p11, %p4658_p10 }
  0x8c   :  { %p4661_p13 = pnand %p4660_p12, %p4654_p9 }
  0x8e   :  { %4664 = shalt.err (!%p4661_p13)
}
  0x8f   :  { %116 = dma.hbm_to_vmem [thread:$0]  %s5603_s7, 1536, %s111_s21, [#allocation14], %s5631_s24, %s5631_s24, %s5630_s6  }
  0x90   :  { %4687 = dma.done.wait [#allocation5], 768  }
  0x91   :  { %4688 = vsyncadd [#allocation5], 4294966528 }
  0x92   :  { %4689 = dma.done.wait [#allocation8], 2304  }
  0x93   :  { %4690 = vsyncadd [#allocation8], 4294964992 }
  0x94   :  { %4691 = dma.done.wait [#allocation11], 1584  }
  0x95   :  { %4692 = vsyncadd [#allocation11], 4294965712 }
  0x96   :  { %4693 = dma.done.wait [#allocation14], 1584  }
  0x97   :  { %4694 = vsyncadd [#allocation14], 4294965712  ;;  %v162_v1 = vlaneseq  ;;  %vm202_vm1 = vcmask 261120   ;;  %v198_v5 = vld [vmem:[#allocation9] sm:$0xff]  ;;  %v199_v6 = vld [vmem:[#allocation9 + $0x8] sm:$0xff]  ;;  %v4708_v8 = vmov 0.0  }
  0x98   :  { %v200_v7 = vld [vmem:[#allocation9 + $0x10] sm:$0xff]  ;;  %v4178_v11 = vpack.c.bf16 %v199_v6, %v198_v5  ;;  %v201_v12 = vld [vmem:[#allocation9 + $0x18] sm:$0xff]  ;;  %s5633_s0 = sld [smem:[#allocation22_spill]]  ;;  %v4957_v15 = vld [vmem:[#allocation4] sm:$0xff]  ;;  %vm177_vm3 = vcmask 130048   ;;  %v4709_v54 = vmov 0.0|0.0  }
  0x99   :  { %v4940_v2 = vshrl.u32 %v162_v1, 7  ;;  %v166_v3 = vand.u32 127, %v162_v1  ;;  %v4182_v14 = vpack.c.bf16 %v201_v12, %v200_v7  ;;  %v4959_v16 = vld [vmem:[#allocation4 + $0x8] sm:$0xff]  ;;  %v375_v37 = vld [vmem:[#allocation15 + $0x8] sm:$0xff]  ;;  %v376_v44 = vld [vmem:[#allocation15 + $0x10] sm:$0xff]  ;;  %vm4710_vm4 = vmmov 0  }
  0x9a   :  { %4179 = vmatprep.subr.bf16.mxu0 %v4178_v11  ;;  %v374_v36 = vld [vmem:[#allocation15] sm:$0xff]  ;;  %v377_v45 = vld [vmem:[#allocation15 + $0x18] sm:$0xff]  ;;  %vm5012_vm5 = vmpackc.low %vm202_vm1, %vm202_vm1  ;;  %s4711_s21 = smov 96   ;;  %s4712_s25 = smov 32   ;;  %vm747_vm6 = vcmask 254977   ;;  %vm592_vm7 = vcmask 253952  }
  0x9b   :  { %vm167_vm0 = vcmp.eq.s32.totalorder %v4940_v2, %v166_v3  ;;  %v164_v4 = vadd.s32 8, %v4940_v2  ;;  %4181 = vmatpush3.bf16.msra.mxu0 %v4178_v11  ;;  %v4190_v42 = vpack.c.bf16 %v375_v37, %v374_v36  ;;  %v4194_v46 = vpack.c.bf16 %v377_v45, %v376_v44  ;;  %v3746_v47 = vld [vmem:[#allocation10] ss:$0 sm:$0xff]  ;;  %v497_v56 = vld [vmem:[%s5605_s9] sm:$0x3]  ;;  %v974_v5 = vld [vmem:[#allocation12] sm:$0xff] }
  0x9c   :  { %v4945_v9 = vsel %vm167_vm0, 1.0, %v4708_v8  ;;  %4183 = vmatprep.subr.bf16.mxu0 %v4182_v14  ;;  %v4997_v55 = vsub.s32 0, %v4940_v2  ;;  %v5008_v59 = vsub.s32 1, %v4940_v2  ;;  %v975_v6 = vld [vmem:[#allocation12 + $0x8] sm:$0xff] }
  0x9d   :  { %vm168_vm2 = vcmp.eq.s32.totalorder %v164_v4, %v166_v3  ;;  %v175_v17 = vadd.f32 %v4957_v15, %v4945_v9  ;;  %v496_v4 = vld [vmem:[%s5604_s8] sm:$0x3] }
  0x9e   :  { %v4948_v10 = vsel %vm168_vm2, 1.0, %v4708_v8  ;;  %v4953_v13 = vld [vmem:[%s5633_s0] sm:$0xff]  ;;  %v4970_v22 = vld [vmem:[%s5633_s0 + $0x8] sm:$0xff]  ;;  %v582_v57 = vrot.slane %v497_v56, %v4997_v55  ;;  %v726_v3 = vrot.slane %v497_v56, %v5008_v59 }
  0x9f   :  { %3961 = vmatprep.mubr.msk.f32.mxu0 %vm202_vm1, %v4953_v13  ;;  %v176_v18 = vadd.f32 %v4959_v16, %v4948_v10  ;;  %v178_v19 = vsel %vm177_vm3, %v175_v17, 0.0  ;;  %4185 = vmatpush3.bf16.msra.mxu0 %v4182_v14  ;;  %v4214_v14 = vpack.c.bf16 %v975_v6, %v974_v5 }
  0xa0   :  { %179 = vadd.xlane.f32.xlu0 %v178_v19  ;;  %4198 = vmatprep.subr.bf16.mxu0 %v4709_v54 }
  0xa1   :  { %v181_v20 = vsel %vm177_vm3, %v176_v18, 0.0 }
  0xa2   :  { %v186_v21 = vadd.f32 %v181_v20, %v178_v19  ;;  %3962 = vmatmul.mubr.msk.f32.vlgmr.msra.gmra.mrb[0].mxu0 %vm202_vm1, %v4970_v22 }
  0xa3   :  { %3986 = vmatprep.mubr.msk.f32.mxu0 %vm4710_vm4, %v4708_v8 }
  0xa4   :  { %182 = vadd.xlane.f32.xlu0 %v181_v20  ;;  %v187_v23 = vrot.slane %v186_v21, 4 }
  0xa6   :  { %v188_v24 = vadd.f32 %v187_v23, %v186_v21  ;;  %v976_v21 = vld [vmem:[#allocation12 + $0x10] sm:$0xff]  ;;  %v977_v23 = vld [vmem:[#allocation12 + $0x18] sm:$0xff] }
  0xa8   :  { %v189_v25 = vrot.slane %v188_v24, 2 }
  0xaa   :  { %v190_v26 = vadd.f32 %v189_v25, %v188_v24  ;;  %v642_v24 = vrot.slane %v496_v4, 1  ;;  %v4218_v25 = vpack.c.bf16 %v977_v23, %v976_v21 }
  0xac   :  { %v191_v27 = vrot.slane %v190_v26, 1 }
  0xae   :  { %v192_v28 = vadd.f32 %v191_v27, %v190_v26  ;;  %v5040_v26 = vld [vmem:[#allocation7 + $0x8] sm:$0xff] }
  0xaf   :  { %v475_v27 = vsel %vm177_vm3, %v5040_v26, 0.0 }
  0xb0   :  { %4401 = vrsqrt.f32 %v192_v28  ;;  %v5044_v28 = vld [vmem:[#allocation7] sm:$0xff] }
  0xba   :  { %v4402_v30 = vpop.eup %4401 }
 0x12d   :  { %v180_v29 = vpop.xlane.xlu0 %179 }
 0x12e   :  { %4403 = vrsqrt.f32 %v180_v29  ;;  %v472_v29 = vsel %vm177_vm3, %v5044_v28, 0.0 }
 0x131   :  { %v183_v34 = vpop.xlane.xlu0 %182 }
 0x132   :  { %4405 = vrsqrt.f32 %v183_v34  ;;  %v462_v34 = vsel %vm177_vm3, %v4959_v16, 0.0 }
 0x138   :  { %v4404_v31 = vpop.eup %4403 }
 0x139   :  { %v194_v32 = vmul.f32 %v4404_v31, %v175_v17  ;;  %v498_v31 = vld [vmem:[%s5606_s10] sm:$0x3] }
 0x13b   :  { %v4974_v33 = vmul.f32 %v4402_v30, %v194_v32  ;;  %v499_v32 = vld [vmem:[%s5607_s11] sm:$0x3] }
 0x13c   :  { %v4406_v35 = vpop.eup %4405 }
 0x13d   :  { %3968 = vmatprep.mubr.msk.f32.mxu1 %vm177_vm3, %v4974_v33  ;;  %v195_v39 = vmul.f32 %v4406_v35, %v176_v18  ;;  %v591_v35 = vmul.f32 %v499_v32, %v498_v31 }
 0x13f   :  { %v4978_v43 = vmul.f32 %v4402_v30, %v195_v39  ;;  %v459_v30 = vsel %vm177_vm3, %v4957_v15, 0.0  ;;  %v748_v36 = vsel %vm747_vm6, %v591_v35, 0.0 }
 0x175   :  { %v3963_v38 = vpop.f32.mrb[0].mxu0 }
 0x176   :  { %v275_v40 = vpop.f32.mrb[1].mxu0 }
 0x177   :  { %v4186_v41 = vpack.c.bf16 %v3963_v38, %v275_v40 }
 0x179   :  { %4187 = vmatprep.subr.bf16.mxu1 %v4186_v41 }
 0x17a   :  { %4189 = vmatpush3.bf16.msra.mxu1 %v4186_v41  ;;  %v593_v41 = vsel %vm592_vm7, %v591_v35, 0.0 }
 0x17b   :  { %4191 = vmatprep.subr.bf16.mxu1 %v4190_v42 }
 0x17d   :  { %3969 = vmatmul.mubr.msk.f32.vlgmr.msra.gmra.mrb[0].mxu1 %vm177_vm3, %v4978_v43 }
 0x17e   :  { %4193 = vmatpush3.bf16.msra.mxu1 %v4190_v42 }
 0x17f   :  { %4195 = vmatprep.subr.bf16.mxu1 %v4194_v46 }
 0x182   :  { %4197 = vmatpush3.bf16.msra.mxu1 %v4194_v46 }
 0x183   :  { %4202 = vmatprep.subr.bf16.mxu1 %v4709_v54 }
 0x250   :  { %v3970_v48 = vpop.f32.mrb[0].mxu1 }
 0x251   :  { %v369_v49 = vadd.f32 %v3970_v48, %v3746_v47  ;;  %v363_v50 = vpop.f32.mrb[1].mxu1 }
 0x252   :  { %v364_v51 = vadd.f32 %v3746_v47, %v363_v50 }
 0x253   :  { %v4982_v52 = vmax.f32 %v369_v49, 0.0 }
 0x254   :  { %v4984_v53 = vmax.f32 %v364_v51, 0.0 }
 0x255   :  { %1172 = vst.msk [vmem:[#allocation2 + $0x28] sm:$0xff] %vm202_vm1, %v4982_v52 }
 0x256   :  { %1171 = vst.msk [vmem:[#allocation2 + $0x20] sm:$0xff] %vm202_vm1, %v4984_v53  ;;  %3979 = vmatprep.mubr.msk.f32.mxu1 %vm202_vm1, %v4984_v53 }
 0x257   :  { %3980 = vmatmul.mubr.msk.f32.vlgmr.msra.gmra.mrb[2].mxu1 %vm202_vm1, %v4982_v52 }
 0x258   :  { %3993 = vmatprep.mubr.msk.f32.mxu1 %vm4710_vm4, %v4708_v8 }
 0x32a   :  { %v3981_v58 = vpop.f32.mrb[2].mxu1 }
 0x32b   :  { %v450_v60 = vpop.f32.mrb[3].mxu1  ;;  %v5016_v62 = vmul.f32 %v3981_v58, %v582_v57 }
 0x32c   :  { %v5018_v63 = vpack.c.bf16 %v3981_v58, %v450_v60  ;;  %v4383_v0 = vpack.i.bf16 %v3981_v58, %v450_v60  ;;  %v583_v1 = vmul.f32 %v582_v57, %v450_v60 }
 0x32d   :  { %v588_v44 = vsel %vm202_vm1, %v5016_v62, 0.0 }
 0x32e   :  { %4384 = vrot.lane.b32.xlu1 %v4383_v0, %s4711_s21  ;;  %4201 = vmatpush3.bf16.xpose.msk.msra.mxu0 %vm5012_vm5, %v5018_v63  ;;  %v585_v42 = vsel %vm202_vm1, %v583_v1, 0.0 }
 0x332   :  { %728 = vrot.lane.b32.xlu1 %v726_v3, %s4712_s25 }
 0x335   :  { %3987 = vmatmul.mubr.msk.f32.vlgmr.msra.gmra.mrb[2].mxu0 %vm202_vm1, %v496_v4 }
 0x3a0   :  { %v4385_v7 = vpop.permute.xlu1 %4384 }
 0x3a1   :  { %v4387_v11 = vunpack.i.h.bf16 %v4385_v7  ;;  %v4386_v12 = vunpack.i.l.bf16 %v4385_v7 }
 0x3a3   :  { %v4203_v17 = vpack.c.bf16 %v4387_v11, %v4386_v12 }
 0x3a4   :  { %v729_v18 = vpop.permute.xlu1 %728 }
 0x3a5   :  { %v731_v19 = vmul.f32 %v729_v18, %v450_v60  ;;  %v732_v20 = vmul.f32 %v3981_v58, %v729_v18  ;;  %4205 = vmatpush3.bf16.xpose.msk.msra.mxu1 %vm5012_vm5, %v4203_v17  ;;  %4207 = vmatprep.subr.bf16.mxu0 %v4203_v17 }
 0x3a6   :  { %4209 = vmatpush3.bf16.msra.mxu0 %v4203_v17  ;;  %4215 = vmatprep.subr.bf16.mxu1 %v4214_v14 }
 0x3a7   :  { %737 = vrot.lane.b32.xlu1 %v732_v20, %s4711_s21  ;;  %735 = vrot.lane.b32.xlu0 %v731_v19, %s4711_s21 }
 0x3a8   :  { %4211 = vmatprep.subr.bf16.mxu0 %v5018_v63 }
 0x3ac   :  { %3994 = vmatmul.mubr.msk.f32.vlgmr.msra.gmra.mrb[4].mxu1 %vm202_vm1, %v642_v24 }
 0x3ad   :  { %4217 = vmatpush3.bf16.msra.mxu1 %v4214_v14  ;;  %4018 = vmatprep.mubr.msk.f32.mxu1 %vm202_vm1, %v4984_v53 }
 0x3ae   :  { %4219 = vmatprep.subr.bf16.mxu1 %v4218_v25 }
 0x3b1   :  { %4221 = vmatpush3.bf16.msra.mxu1 %v4218_v25 }
 0x3b4   :  { %4019 = vmatmul.mubr.msk.f32.vlgmr.msra.gmra.mrb[6].mxu1 %vm202_vm1, %v4982_v52 }
 0x3c6   :  { %476 = vadd.xlane.f32.xlu0 %v475_v27 }
 0x3cb   :  { %473 = vadd.xlane.f32.xlu1 %v472_v29 }
 0x3cf   :  { %460 = vadd.xlane.f32.xlu1 %v459_v30 }
 0x3d3   :  { %463 = vadd.xlane.f32.xlu1 %v462_v34  ;;  %v5075_v34 = vadd.f32 %v5040_v26, %v4948_v10 }
 0x3d5   :  { %vm495_vm8 = vcmp.gt.f32.partialorder %v5075_v34, 0.0 }
 0x3d7   :  { %749 = vadd.xlane.f32.xlu1 %v748_v36 }
 0x408   :  { %v575_v45 = vpop.f32.mrb[2].mxu0 }
 0x409   :  { %v3988_v46 = vpop.f32.mrb[3].mxu0 }
 0x419   :  { %v738_v37 = vpop.permute.xlu1 %737  ;;  %v736_v38 = vpop.permute.xlu0 %735 }
 0x41a   :  { %v744_v39 = vsel %vm202_vm1, %v738_v37, 0.0  ;;  %v741_v40 = vsel %vm202_vm1, %v736_v38, 0.0 }
 0x41b   :  { %745 = vadd.xlane.f32.xlu0 %v744_v39  ;;  %742 = vadd.xlane.f32.xlu1 %v741_v40 }
 0x41f   :  { %594 = vadd.xlane.f32.xlu1 %v593_v41  ;;  %586 = vadd.xlane.f32.xlu0 %v585_v42  ;;  %v5079_v41 = vadd.f32 %v5044_v28, %v4945_v9 }
 0x421   :  { %vm494_vm10 = vcmp.gt.f32.partialorder %v5079_v41, 0.0 }
 0x423   :  { %589 = vadd.xlane.f32.xlu1 %v588_v44 }
 0x453   :  { %v477_v48 = vpop.xlane.xlu0 %476 }
 0x458   :  { %v474_v47 = vpop.xlane.xlu1 %473 }
 0x459   :  { %v478_v49 = vadd.f32 %v477_v48, %v474_v47 }
 0x45b   :  { %v479_v50 = vrot.slane %v478_v49, 4 }
 0x45c   :  { %v461_v56 = vpop.xlane.xlu1 %460 }
 0x45d   :  { %v480_v51 = vadd.f32 %v479_v50, %v478_v49 }
 0x45f   :  { %v481_v57 = vrot.slane %v480_v51, 2 }
 0x460   :  { %v464_v58 = vpop.xlane.xlu1 %463 }
 0x461   :  { %v482_v0 = vadd.f32 %v481_v57, %v480_v51  ;;  %v465_v1 = vadd.f32 %v464_v58, %v461_v56 }
 0x463   :  { %v483_v4 = vrot.slane %v482_v0, 1  ;;  %v466_v5 = vrot.slane %v465_v1, 4 }
 0x464   :  { %v750_v27 = vpop.xlane.xlu1 %749 }
 0x465   :  { %v484_v7 = vadd.f32 %v483_v4, %v482_v0  ;;  %v467_v12 = vadd.f32 %v466_v5, %v465_v1  ;;  %v760_v32 = vrot.slane %v750_v27, %v5008_v59 }
 0x467   :  { %v485_v14 = vmax.f32 %v484_v7, 1.0  ;;  %v468_v17 = vrot.slane %v467_v12, 2 }
 0x469   :  { %4407 = vrcp.f32 %v485_v14  ;;  %v469_v18 = vadd.f32 %v468_v17, %v467_v12 }
 0x46b   :  { %v470_v19 = vrot.slane %v469_v18, 1 }
 0x46d   :  { %v471_v20 = vadd.f32 %v470_v19, %v469_v18 }
 0x473   :  { %v4408_v21 = vpop.eup %4407 }
 0x474   :  { %v487_v23 = vmul.f32 %v4408_v21, %v471_v20 }
 0x476   :  { %v488_v24 = vmul.f32 %v487_v23, %v4945_v9  ;;  %v489_v25 = vmul.f32 %v487_v23, %v4948_v10 }
 0x478   :  { %v490_v30 = vadd.f32 %v488_v24, %v4957_v15  ;;  %v491_v31 = vadd.f32 %v489_v25, %v4959_v16  ;;  %v599_v16 = vrot.slane %v575_v45, %v4997_v55 }
 0x47a   :  { %v761_v37 = vmul.f32 %v760_v32, %v490_v30  ;;  %v762_v38 = vmul.f32 %v760_v32, %v491_v31 }
 0x47f   :  { %v719_v60 = vpop.f32.mrb[4].mxu1 }
 0x480   :  { %v3995_v3 = vpop.f32.mrb[5].mxu1  ;;  %v754_v29 = vrot.slane %v719_v60, %v4997_v55 }
 0x487   :  { %v4020_v6 = vpop.f32.mrb[6].mxu1 }
 0x488   :  { %v1044_v62 = vpop.f32.mrb[7].mxu1 }
 0x489   :  { %v5065_v11 = vpack.c.bf16 %v4020_v6, %v1044_v62 }
 0x4a8   :  { %v743_v35 = vpop.xlane.xlu1 %742  ;;  %v746_v36 = vpop.xlane.xlu0 %745 }
 0x4a9   :  { %v755_v39 = vadd.f32 %v754_v29, %v743_v35  ;;  %v756_v40 = vadd.f32 %v754_v29, %v746_v36 }
 0x4ab   :  { %v763_v42 = vadd.f32 %v761_v37, %v755_v39  ;;  %v764_v15 = vadd.f32 %v762_v38, %v756_v40 }
 0x4ac   :  { %v595_v44 = vpop.xlane.xlu1 %594  ;;  %v587_v46 = vpop.xlane.xlu0 %586 }
 0x4ad   :  { %v605_v26 = vrot.slane %v595_v44, %v4997_v55  ;;  %vm766_vm9 = vcmp.gt.f32.partialorder %v764_v15, 0.0  ;;  %v768_v47 = vmul.f32 0.2, %v764_v15  ;;  %vm765_vm11 = vcmp.gt.f32.partialorder %v763_v42, 0.0 }
 0x4ae   :  { %v767_v48 = vmul.f32 0.2, %v763_v42  ;;  %v600_v50 = vadd.f32 %v599_v16, %v587_v46 }
 0x4af   :  { %v606_v49 = vmul.f32 %v605_v26, %v490_v30  ;;  %v770_v28 = vsel %vm766_vm9, %v764_v15, %v768_v47  ;;  %v607_v51 = vmul.f32 %v605_v26, %v491_v31 }
 0x4b0   :  { %v590_v56 = vpop.xlane.xlu1 %589  ;;  %v772_v45 = vsel %vm495_vm8, %v770_v28, -1e+30  ;;  %v769_v57 = vsel %vm765_vm11, %v763_v42, %v767_v48  ;;  %v5109_v48 = vld [vmem:[#allocation4 + $0x10] sm:$0xff] }
 0x4b1   :  { %v608_v58 = vadd.f32 %v606_v49, %v600_v50  ;;  %v601_v60 = vadd.f32 %v599_v16, %v590_v56  ;;  %v776_v0 = vsel %vm177_vm3, %v772_v45, -inf  ;;  %v771_v3 = vsel %vm494_vm10, %v769_v57, -1e+30  ;;  %v5111_v49 = vld [vmem:[#allocation4 + $0x18] sm:$0xff] }
 0x4b2   :  { %777 = vmax.xlane.f32.xlu1 %v776_v0  ;;  %v773_v1 = vsel %vm177_vm3, %v771_v3, -inf  ;;  %v1193_v50 = vadd.f32 %v5109_v48, %v4945_v9  ;;  %v5117_v41 = vadd.f32 %v5111_v49, %v4948_v10 }
 0x4b3   :  { %v609_v4 = vadd.f32 %v607_v51, %v601_v60  ;;  %774 = vmax.xlane.f32.xlu0 %v773_v1  ;;  %vm610_vm12 = vcmp.gt.f32.partialorder %v608_v58, 0.0  ;;  %v612_v5 = vmul.f32 0.2, %v608_v58 }
 0x4b4   :  { %v1195_v28 = vsel %vm177_vm3, %v1193_v50, 0.0  ;;  %v1198_v34 = vsel %vm177_vm3, %v5117_v41, 0.0 }
 0x4b5   :  { %v614_v6 = vsel %vm610_vm12, %v608_v58, %v612_v5  ;;  %vm611_vm13 = vcmp.gt.f32.partialorder %v609_v4, 0.0  ;;  %v613_v7 = vmul.f32 0.2, %v609_v4  ;;  %v1203_v51 = vadd.f32 %v1198_v34, %v1195_v28 }
 0x4b6   :  { %v616_v62 = vsel %vm494_vm10, %v614_v6, -1e+30 }
 0x4b7   :  { %v618_v12 = vsel %vm177_vm3, %v616_v62, -inf  ;;  %v615_v14 = vsel %vm611_vm13, %v609_v4, %v613_v7  ;;  %v1216_v7 = vld [vmem:[#allocation9 + $0x20] sm:$0xff] }
 0x4b8   :  { %619 = vmax.xlane.f32.xlu0 %v618_v12  ;;  %v617_v17 = vsel %vm495_vm8, %v615_v14, -1e+30 }
 0x4b9   :  { %v621_v18 = vsel %vm177_vm3, %v617_v17, -inf }
 0x4ba   :  { %622 = vmax.xlane.f32.xlu1 %v621_v18  ;;  %v1219_v18 = vld [vmem:[#allocation9 + $0x38] sm:$0xff] }
 0x53f   :  { %v778_v19 = vpop.xlane.xlu1 %777 }
 0x540   :  { %v780_v20 = vsub.f32 %v772_v45, %v778_v19  ;;  %v775_v21 = vpop.xlane.xlu0 %774 }
 0x541   :  { %v779_v23 = vsub.f32 %v771_v3, %v775_v21 }
 0x542   :  { %v783_v24 = vmul.f32 1.442695, %v780_v20 }
 0x543   :  { %v781_v25 = vmul.f32 1.442695, %v779_v23 }
 0x544   :  { %4409 = vpow2.f32 %v783_v24 }
 0x545   :  { %4411 = vpow2.f32 %v781_v25  ;;  %v620_v27 = vpop.xlane.xlu0 %619 }
 0x546   :  { %v624_v29 = vsub.f32 %v616_v62, %v620_v27  ;;  %v1217_v62 = vld [vmem:[#allocation9 + $0x28] sm:$0xff] }
 0x547   :  { %v623_v30 = vpop.xlane.xlu1 %622  ;;  %v4226_v14 = vpack.c.bf16 %v1217_v62, %v1216_v7 }
 0x548   :  { %v626_v31 = vmul.f32 1.442695, %v624_v29  ;;  %v625_v32 = vsub.f32 %v617_v17, %v623_v30  ;;  %v1218_v17 = vld [vmem:[#allocation9 + $0x30] sm:$0xff]  ;;  %v3761_v30 = vld [vmem:[%s5608_s12] ss:$0 sm:$0xff] }
 0x54a   :  { %4413 = vpow2.f32 %v626_v31  ;;  %v628_v35 = vmul.f32 1.442695, %v625_v32 }
 0x54c   :  { %4415 = vpow2.f32 %v628_v35 }
 0x54e   :  { %v4410_v36 = vpop.eup %4409 }
 0x54f   :  { %v4412_v37 = vpop.eup %4411  ;;  %v786_v38 = vsel %vm495_vm8, %v4410_v36, 0.0  ;;  %v3764_v36 = vld [vmem:[#allocation13] ss:$0 sm:$0xff] }
 0x550   :  { %v790_v39 = vsel %vm177_vm3, %v786_v38, 0.0  ;;  %v785_v40 = vsel %vm494_vm10, %v4412_v37, 0.0 }
 0x551   :  { %791 = vadd.xlane.f32.xlu1 %v790_v39  ;;  %v787_v42 = vsel %vm177_vm3, %v785_v40, 0.0 }
 0x552   :  { %788 = vadd.xlane.f32.xlu0 %v787_v42 }
 0x554   :  { %v4414_v15 = vpop.eup %4413 }
 0x555   :  { %v630_v16 = vsel %vm494_vm10, %v4414_v15, 0.0 }
 0x556   :  { %v4416_v44 = vpop.eup %4415  ;;  %v632_v46 = vsel %vm177_vm3, %v630_v16, 0.0 }
 0x557   :  { %633 = vadd.xlane.f32.xlu0 %v632_v46  ;;  %v631_v26 = vsel %vm495_vm8, %v4416_v44, 0.0 }
 0x558   :  { %v635_v47 = vsel %vm177_vm3, %v631_v26, 0.0 }
 0x559   :  { %636 = vadd.xlane.f32.xlu1 %v635_v47 }
 0x55b   :  { %1196 = vadd.xlane.f32.xlu0 %v1195_v28  ;;  %v1388_v28 = vld [vmem:[#allocation15 + $0x28] sm:$0xff] }
 0x55d   :  { %1199 = vadd.xlane.f32.xlu1 %v1198_v34 }
 0x5de   :  { %v792_v56 = vpop.xlane.xlu1 %791 }
 0x5df   :  { %4417 = vrcp.f32 %v792_v56  ;;  %v789_v45 = vpop.xlane.xlu0 %788 }
 0x5e0   :  { %4419 = vrcp.f32 %v789_v45 }
 0x5e4   :  { %v634_v57 = vpop.xlane.xlu0 %633 }
 0x5e5   :  { %4421 = vrcp.f32 %v634_v57 }
 0x5e6   :  { %v637_v58 = vpop.xlane.xlu1 %636 }
 0x5e7   :  { %4423 = vrcp.f32 %v637_v58 }
 0x5e8   :  { %v1197_v23 = vpop.xlane.xlu0 %1196 }
 0x5e9   :  { %v4418_v60 = vpop.eup %4417 }
 0x5ea   :  { %v4420_v0 = vpop.eup %4419  ;;  %v796_v3 = vmul.f32 %v4418_v60, %v786_v38  ;;  %v1389_v60 = vld [vmem:[#allocation15 + $0x30] sm:$0xff] }
 0x5eb   :  { %v795_v1 = vmul.f32 %v4420_v0, %v785_v40  ;;  %v1390_v0 = vld [vmem:[#allocation15 + $0x38] sm:$0xff] }
 0x5ed   :  { %4000 = vmatprep.mubr.msk.f32.mxu0 %vm177_vm3, %v795_v1 }
 0x5ee   :  { %4001 = vmatmul.mubr.msk.f32.vlgmr.msra.gmra.mrb[4].mxu0 %vm177_vm3, %v796_v3  ;;  %v4242_v3 = vpack.c.bf16 %v1390_v0, %v1389_v60 }
 0x5ef   :  { %v4422_v4 = vpop.eup %4421  ;;  %4213 = vmatpush3.bf16.msra.mxu0 %v5018_v63  ;;  %v4230_v63 = vpack.c.bf16 %v1219_v18, %v1218_v17 }
 0x5f0   :  { %4223 = vmatprep.subr.bf16.mxu0 %v5065_v11  ;;  %v640_v5 = vmul.f32 %v4422_v4, %v630_v16  ;;  %v3769_v4 = vld [vmem:[#allocation10 + $0x1] ss:$0 sm:$0xff] }
 0x5f1   :  { %v4424_v6 = vpop.eup %4423 }
 0x5f2   :  { %v641_v12 = vmul.f32 %v4424_v6, %v631_v26  ;;  %4007 = vmatprep.mubr.msk.f32.mxu0 %vm177_vm3, %v640_v5 }
 0x5f6   :  { %4008 = vmatmul.mubr.msk.f32.vlgmr.msra.gmra.mrb[4].mxu0 %vm177_vm3, %v641_v12 }
 0x5f7   :  { %4225 = vmatpush3.bf16.msra.mxu0 %v5065_v11  ;;  %4025 = vmatprep.mubr.msk.f32.mxu0 %vm177_vm3, %v4974_v33  ;;  %v1204_v33 = vrot.slane %v1203_v51, 4 }
 0x5f8   :  { %4227 = vmatprep.subr.bf16.mxu0 %v4226_v14 }
 0x5f9   :  { %v1205_v11 = vadd.f32 %v1204_v33, %v1203_v51 }
 0x5fa   :  { %4026 = vmatmul.mubr.msk.f32.vlgmr.msra.gmra.mrb[6].mxu0 %vm177_vm3, %v4978_v43 }
 0x5fb   :  { %4229 = vmatpush3.bf16.msra.mxu0 %v4226_v14  ;;  %4036 = vmatprep.mubr.msk.f32.mxu0 %vm202_vm1, %v4953_v13  ;;  %v1206_v19 = vrot.slane %v1205_v11, 2 }
 0x5fc   :  { %4231 = vmatprep.subr.bf16.mxu0 %v4230_v63 }
 0x5fd   :  { %v1207_v20 = vadd.f32 %v1206_v19, %v1205_v11 }
 0x5ff   :  { %4233 = vmatpush3.bf16.msra.mxu0 %v4230_v63  ;;  %v1208_v21 = vrot.slane %v1207_v20, 1 }
 0x600   :  { %4246 = vmatprep.subr.bf16.mxu0 %v4709_v54 }
 0x601   :  { %v1209_v43 = vadd.f32 %v1208_v21, %v1207_v20  ;;  %v3774_v21 = vld [vmem:[%s5604_s8 + $0x2] sm:$0x3] }
 0x602   :  { %4037 = vmatmul.mubr.msk.f32.vlgmr.msra.gmra.mrb[8].mxu0 %vm202_vm1, %v4970_v22  ;;  %v1200_v22 = vpop.xlane.xlu1 %1199 }
 0x603   :  { %4061 = vmatprep.mubr.msk.f32.mxu0 %vm4710_vm4, %v4708_v8  ;;  %4425 = vrsqrt.f32 %v1209_v43  ;;  %v5208_v43 = vld [vmem:[#allocation7 + $0x18] sm:$0xff] }
 0x604   :  { %4427 = vrsqrt.f32 %v1197_v23  ;;  %v5210_v23 = vld [vmem:[#allocation7 + $0x10] sm:$0xff] }
 0x605   :  { %4429 = vrsqrt.f32 %v1200_v22  ;;  %v3777_v22 = vld [vmem:[%s5607_s11 + $0x2] sm:$0x3] }
 0x60d   :  { %v4426_v13 = vpop.eup %4425 }
 0x60e   :  { %v4428_v24 = vpop.eup %4427 }
 0x60f   :  { %v1211_v25 = vmul.f32 %v4428_v24, %v1193_v50  ;;  %v4430_v47 = vpop.eup %4429  ;;  %v1387_v50 = vld [vmem:[#allocation15 + $0x20] sm:$0xff]  ;;  %v1485_v24 = vsel %vm177_vm3, %v5210_v23, 0.0 }
 0x610   :  { %v1212_v34 = vmul.f32 %v4430_v47, %v5117_v41  ;;  %v4238_v57 = vpack.c.bf16 %v1388_v28, %v1387_v50  ;;  %v3775_v41 = vld [vmem:[%s5605_s9 + $0x2] sm:$0x3] }
 0x611   :  { %v5140_v27 = vmul.f32 %v4426_v13, %v1211_v25  ;;  %v1742_v1 = vrot.slane %v3775_v41, %v5008_v59  ;;  %v3776_v25 = vld [vmem:[%s5606_s10 + $0x2] sm:$0x3] }
 0x612   :  { %v5172_v58 = vmul.f32 %v4426_v13, %v1212_v34  ;;  %v1488_v13 = vsel %vm177_vm3, %v5208_v43, 0.0  ;;  %v1599_v34 = vrot.slane %v3775_v41, %v4997_v55  ;;  %v1994_v41 = vld [vmem:[#allocation12 + $0x38] sm:$0xff] }
 0x613   :  { %4043 = vmatprep.mubr.msk.f32.mxu1 %vm177_vm3, %v5140_v27  ;;  %1744 = vrot.lane.b32.xlu1 %v1742_v1, %s4712_s25  ;;  %v1993_v1 = vld [vmem:[#allocation12 + $0x30] sm:$0xff] }
 0x685   :  { %v1745_v17 = vpop.permute.xlu1 %1744 }
 0x6c9   :  { %v4009_v29 = vpop.f32.mrb[4].mxu0 }
 0x6ca   :  { %v962_v31 = vmul.f32 0.5, %v4009_v29  ;;  %v952_v32 = vpop.f32.mrb[5].mxu0  ;;  %v1472_v29 = vsel %vm177_vm3, %v5109_v48, 0.0 }
 0x6cb   :  { %v961_v35 = vmul.f32 0.5, %v952_v32 }
 0x6cc   :  { %v5147_v37 = vadd.f32 %v3761_v30, %v962_v31  ;;  %v1475_v31 = vsel %vm177_vm3, %v5111_v49, 0.0 }
 0x6cd   :  { %v5149_v38 = vadd.f32 %v3761_v30, %v961_v35  ;;  %v4027_v39 = vpop.f32.mrb[6].mxu0  ;;  %v1608_v30 = vmul.f32 %v3777_v22, %v3776_v25 }
 0x6ce   :  { %v5151_v40 = vadd.f32 %v4027_v39, %v3764_v36  ;;  %v1126_v42 = vpop.f32.mrb[7].mxu0  ;;  %v973_v15 = vmax.f32 %v5147_v37, 0.0  ;;  %v1991_v39 = vld [vmem:[#allocation12 + $0x20] sm:$0xff] }
 0x6cf   :  { %v5154_v16 = vadd.f32 %v3764_v36, %v1126_v42  ;;  %v972_v44 = vmax.f32 %v5149_v38, 0.0  ;;  %v1763_v32 = vsel %vm747_vm6, %v1608_v30, 0.0  ;;  %v1992_v42 = vld [vmem:[#allocation12 + $0x28] sm:$0xff] }
 0x6d0   :  { %v1136_v46 = vmax.f32 %v5151_v40, 0.0  ;;  %1155 = vst.msk [vmem:[#allocation2 + $0x18] sm:$0xff] %vm202_vm1, %v973_v15 }
 0x6d1   :  { %v1135_v26 = vmax.f32 %v5154_v16, 0.0  ;;  %1154 = vst.msk [vmem:[#allocation2 + $0x10] sm:$0xff] %vm202_vm1, %v972_v44 }
 0x6d2   :  { %1138 = vst.msk [vmem:[#allocation2 + $0x8] sm:$0xff] %vm202_vm1, %v1136_v46 }
 0x6d3   :  { %1137 = vst.msk [vmem:[#allocation2] sm:$0xff] %vm202_vm1, %v1135_v26 }
 0x6d5   :  { %v4038_v51 = vpop.f32.mrb[8].mxu0 }
 0x6d6   :  { %v1286_v56 = vpop.f32.mrb[9].mxu0 }
 0x6d7   :  { %v4234_v45 = vpack.c.bf16 %v4038_v51, %v1286_v56  ;;  %v1609_v56 = vsel %vm592_vm7, %v1608_v30, 0.0 }
 0x6d9   :  { %4235 = vmatprep.subr.bf16.mxu1 %v4234_v45 }
 0x6da   :  { %4237 = vmatpush3.bf16.msra.mxu1 %v4234_v45  ;;  %v4262_v45 = vpack.c.bf16 %v1992_v42, %v1991_v39 }
 0x6db   :  { %4239 = vmatprep.subr.bf16.mxu1 %v4238_v57 }
 0x6dd   :  { %4044 = vmatmul.mubr.msk.f32.vlgmr.msra.gmra.mrb[8].mxu1 %vm177_vm3, %v5172_v58 }
 0x6de   :  { %4241 = vmatpush3.bf16.msra.mxu1 %v4238_v57 }
 0x6df   :  { %4243 = vmatprep.subr.bf16.mxu1 %v4242_v3 }
 0x6e2   :  { %4245 = vmatpush3.bf16.msra.mxu1 %v4242_v3 }
 0x6e3   :  { %4250 = vmatprep.subr.bf16.mxu1 %v4709_v54 }
 0x7b0   :  { %v4045_v5 = vpop.f32.mrb[8].mxu1 }
 0x7b1   :  { %v1381_v6 = vadd.f32 %v4045_v5, %v3769_v4  ;;  %v1375_v7 = vpop.f32.mrb[9].mxu1 }
 0x7b2   :  { %v1376_v62 = vadd.f32 %v3769_v4, %v1375_v7  ;;  %v1658_v4 = vrot.slane %v3774_v21, 1  ;;  %v4266_v7 = vpack.c.bf16 %v1994_v41, %v1993_v1 }
 0x7b3   :  { %v5182_v12 = vmax.f32 %v1381_v6, 0.0 }
 0x7b4   :  { %v5184_v14 = vmax.f32 %v1376_v62, 0.0 }
 0x7b5   :  { %2191 = vst.msk [vmem:[#allocation2 + $0x58] sm:$0xff] %vm202_vm1, %v5182_v12  ;;  %v2195_v40 = vsel %vm202_vm1, %v5182_v12, 0.0 }
 0x7b6   :  { %2190 = vst.msk [vmem:[#allocation2 + $0x50] sm:$0xff] %vm202_vm1, %v5184_v14  ;;  %4054 = vmatprep.mubr.msk.f32.mxu1 %vm202_vm1, %v5184_v14  ;;  %v2192_v16 = vsel %vm202_vm1, %v5184_v14, 0.0 }
 0x7b7   :  { %4055 = vmatmul.mubr.msk.f32.vlgmr.msra.gmra.mrb[10].mxu1 %vm202_vm1, %v5182_v12 }
 0x7b8   :  { %4068 = vmatprep.mubr.msk.f32.mxu1 %vm4710_vm4, %v4708_v8 }
 0x88a   :  { %v4056_v18 = vpop.f32.mrb[10].mxu1 }
 0x88b   :  { %v1463_v63 = vpop.f32.mrb[11].mxu1  ;;  %v1748_v20 = vmul.f32 %v4056_v18, %v1745_v17  ;;  %v1601_v0 = vmul.f32 %v4056_v18, %v1599_v34 }
 0x88c   :  { %v5196_v33 = vpack.c.bf16 %v4056_v18, %v1463_v63  ;;  %v4388_v11 = vpack.i.bf16 %v4056_v18, %v1463_v63  ;;  %v1747_v19 = vmul.f32 %v1745_v17, %v1463_v63  ;;  %v1600_v3 = vmul.f32 %v1599_v34, %v1463_v63 }
 0x88d   :  { %v1605_v5 = vsel %vm202_vm1, %v1601_v0, 0.0 }
 0x88e   :  { %4389 = vrot.lane.b32.xlu0 %v4388_v11, %s4711_s21  ;;  %1751 = vrot.lane.b32.xlu1 %v1747_v19, %s4711_s21  ;;  %v1602_v6 = vsel %vm202_vm1, %v1600_v3, 0.0 }
 0x88f   :  { %4249 = vmatpush3.bf16.xpose.msk.msra.mxu0 %vm5012_vm5, %v5196_v33 }
 0x892   :  { %1753 = vrot.lane.b32.xlu0 %v1748_v20, %s4711_s21 }
 0x896   :  { %4062 = vmatmul.mubr.msk.f32.vlgmr.msra.gmra.mrb[10].mxu0 %vm202_vm1, %v3774_v21 }
 0x8b1   :  { %1489 = vadd.xlane.f32.xlu0 %v1488_v13 }
 0x8b2   :  { %1486 = vadd.xlane.f32.xlu1 %v1485_v24 }
 0x8b5   :  { %1473 = vadd.xlane.f32.xlu0 %v1472_v29 }
 0x8b6   :  { %1476 = vadd.xlane.f32.xlu1 %v1475_v31 }
 0x8b9   :  { %1764 = vadd.xlane.f32.xlu0 %v1763_v32 }
 0x900   :  { %v4390_v35 = vpop.permute.xlu0 %4389  ;;  %v1752_v36 = vpop.permute.xlu1 %1751 }
 0x901   :  { %v4392_v47 = vunpack.i.h.bf16 %v4390_v35  ;;  %v4391_v50 = vunpack.i.l.bf16 %v4390_v35  ;;  %v1757_v28 = vsel %vm202_vm1, %v1752_v36, 0.0 }
 0x902   :  { %1758 = vadd.xlane.f32.xlu1 %v1757_v28 }
 0x903   :  { %v4251_v51 = vpack.c.bf16 %v4392_v47, %v4391_v50 }
 0x904   :  { %v1754_v57 = vpop.permute.xlu0 %1753 }
 0x905   :  { %4253 = vmatpush3.bf16.xpose.msk.msra.mxu1 %vm5012_vm5, %v4251_v51  ;;  %4255 = vmatprep.subr.bf16.mxu0 %v4251_v51  ;;  %v1760_v60 = vsel %vm202_vm1, %v1754_v57, 0.0 }
 0x906   :  { %1761 = vadd.xlane.f32.xlu0 %v1760_v60  ;;  %1610 = vadd.xlane.f32.xlu1 %v1609_v56 }
 0x907   :  { %4257 = vmatpush3.bf16.msra.mxu0 %v4251_v51  ;;  %4263 = vmatprep.subr.bf16.mxu1 %v4262_v45 }
 0x908   :  { %4259 = vmatprep.subr.bf16.mxu0 %v5196_v33 }
 0x90a   :  { %1606 = vadd.xlane.f32.xlu1 %v1605_v5  ;;  %1603 = vadd.xlane.f32.xlu0 %v1602_v6 }
 0x90c   :  { %4069 = vmatmul.mubr.msk.f32.vlgmr.msra.gmra.mrb[12].mxu1 %vm202_vm1, %v1658_v4 }
 0x90d   :  { %4265 = vmatpush3.bf16.msra.mxu1 %v4262_v45  ;;  %4093 = vmatprep.mubr.msk.f32.mxu1 %vm202_vm1, %v5184_v14 }
 0x90e   :  { %4267 = vmatprep.subr.bf16.mxu1 %v4266_v7 }
 0x911   :  { %4269 = vmatpush3.bf16.msra.mxu1 %v4266_v7 }
 0x914   :  { %4094 = vmatmul.mubr.msk.f32.vlgmr.msra.gmra.mrb[14].mxu1 %vm202_vm1, %v5182_v12 }
 0x93e   :  { %v1490_v18 = vpop.xlane.xlu0 %1489 }
 0x93f   :  { %v1487_v63 = vpop.xlane.xlu1 %1486 }
 0x940   :  { %v1491_v11 = vadd.f32 %v1490_v18, %v1487_v63 }
 0x942   :  { %v1492_v19 = vrot.slane %v1491_v11, 4  ;;  %v1474_v13 = vpop.xlane.xlu0 %1473 }
 0x943   :  { %v1477_v24 = vpop.xlane.xlu1 %1476 }
 0x944   :  { %v1493_v20 = vadd.f32 %v1492_v19, %v1491_v11  ;;  %v1478_v22 = vadd.f32 %v1477_v24, %v1474_v13 }
 0x946   :  { %v1494_v21 = vrot.slane %v1493_v20, 2  ;;  %v1479_v30 = vrot.slane %v1478_v22, 4  ;;  %v1765_v28 = vpop.xlane.xlu0 %1764 }
 0x947   :  { %v1775_v63 = vrot.slane %v1765_v28, %v5008_v59 }
 0x948   :  { %v1495_v25 = vadd.f32 %v1494_v21, %v1493_v20  ;;  %v1480_v32 = vadd.f32 %v1479_v30, %v1478_v22  ;;  %v1505_v22 = vadd.f32 %v5210_v23, %v4945_v9 }
 0x94a   :  { %v1496_v29 = vrot.slane %v1495_v25, 1  ;;  %v1481_v36 = vrot.slane %v1480_v32, 2  ;;  %vm1507_vm9 = vcmp.gt.f32.partialorder %v1505_v22, 0.0 }
 0x94c   :  { %v1497_v31 = vadd.f32 %v1496_v29, %v1495_v25  ;;  %v1482_v39 = vadd.f32 %v1481_v36, %v1480_v32 }
 0x94e   :  { %v1498_v35 = vmax.f32 %v1497_v31, 1.0  ;;  %v1483_v42 = vrot.slane %v1482_v39, 1 }
 0x950   :  { %4431 = vrcp.f32 %v1498_v35  ;;  %v1484_v47 = vadd.f32 %v1483_v42, %v1482_v39 }
 0x95a   :  { %v4432_v50 = vpop.eup %4431 }
 0x95b   :  { %v1500_v51 = vmul.f32 %v4432_v50, %v1484_v47 }
 0x95d   :  { %v1501_v57 = vmul.f32 %v1500_v51, %v4945_v9  ;;  %v1502_v60 = vmul.f32 %v1500_v51, %v4948_v10 }
 0x95f   :  { %v1503_v0 = vadd.f32 %v1501_v57, %v5109_v48  ;;  %v1504_v3 = vadd.f32 %v1502_v60, %v5111_v49 }
 0x961   :  { %v1776_v13 = vmul.f32 %v1775_v63, %v1503_v0  ;;  %v1777_v49 = vmul.f32 %v1775_v63, %v1504_v3 }
 0x969   :  { %v1592_v62 = vpop.f32.mrb[10].mxu0 }
 0x96a   :  { %v4063_v17 = vpop.f32.mrb[11].mxu0  ;;  %v1615_v41 = vrot.slane %v1592_v62, %v4997_v55  ;;  %v1506_v62 = vadd.f32 %v5208_v43, %v4948_v10 }
 0x96c   :  { %vm1508_vm8 = vcmp.gt.f32.partialorder %v1506_v62, 0.0 }
 0x98f   :  { %v1759_v34 = vpop.xlane.xlu1 %1758 }
 0x993   :  { %v1762_v56 = vpop.xlane.xlu0 %1761  ;;  %v1611_v45 = vpop.xlane.xlu1 %1610 }
 0x994   :  { %v1621_v1 = vrot.slane %v1611_v45, %v4997_v55 }
 0x996   :  { %v1622_v6 = vmul.f32 %v1621_v1, %v1503_v0  ;;  %v1623_v7 = vmul.f32 %v1621_v1, %v1504_v3 }
 0x997   :  { %v1607_v4 = vpop.xlane.xlu1 %1606  ;;  %v1604_v5 = vpop.xlane.xlu0 %1603 }
 0x998   :  { %v1617_v17 = vadd.f32 %v1615_v41, %v1607_v4  ;;  %v1616_v18 = vadd.f32 %v1615_v41, %v1604_v5 }
 0x99a   :  { %v1625_v19 = vadd.f32 %v1623_v7, %v1617_v17  ;;  %v1624_v20 = vadd.f32 %v1622_v6, %v1616_v18 }
 0x99c   :  { %v1629_v31 = vmul.f32 0.2, %v1625_v19  ;;  %v1628_v32 = vmul.f32 0.2, %v1624_v20  ;;  %vm1627_vm14 = vcmp.gt.f32.partialorder %v1625_v19, 0.0  ;;  %vm1626_vm15 = vcmp.gt.f32.partialorder %v1624_v20, 0.0 }
 0x99e   :  { %v1631_v43 = vsel %vm1627_vm14, %v1625_v19, %v1629_v31  ;;  %v1630_v28 = vsel %vm1626_vm15, %v1624_v20, %v1628_v32 }
 0x99f   :  { %v1633_v57 = vsel %vm1508_vm8, %v1631_v43, -1e+30  ;;  %v1632_v60 = vsel %vm1507_vm9, %v1630_v28, -1e+30 }
 0x9a0   :  { %v1637_v0 = vsel %vm177_vm3, %v1633_v57, -inf  ;;  %v1634_v3 = vsel %vm177_vm3, %v1632_v60, -inf }
 0x9df   :  { %v1735_v11 = vpop.f32.mrb[12].mxu1 }
 0x9e0   :  { %v1769_v21 = vrot.slane %v1735_v11, %v4997_v55  ;;  %v4070_v48 = vpop.f32.mrb[13].mxu1 }
 0x9e2   :  { %v1770_v24 = vadd.f32 %v1769_v21, %v1759_v34  ;;  %v1771_v25 = vadd.f32 %v1769_v21, %v1762_v56 }
 0x9e4   :  { %v1778_v29 = vadd.f32 %v1776_v13, %v1770_v24  ;;  %v1779_v30 = vadd.f32 %v1777_v49, %v1771_v25 }
 0x9e6   :  { %vm1781_vm0 = vcmp.gt.f32.partialorder %v1779_v30, 0.0  ;;  %v1783_v35 = vmul.f32 0.2, %v1779_v30  ;;  %vm1780_vm2 = vcmp.gt.f32.partialorder %v1778_v29, 0.0  ;;  %v1782_v36 = vmul.f32 0.2, %v1778_v29 }
 0x9e7   :  { %v4095_v39 = vpop.f32.mrb[14].mxu1 }
 0x9e8   :  { %v2061_v42 = vpop.f32.mrb[15].mxu1  ;;  %v1785_v47 = vsel %vm1781_vm0, %v1779_v30, %v1783_v35  ;;  %v1784_v50 = vsel %vm1780_vm2, %v1778_v29, %v1782_v36 }
 0x9e9   :  { %v5253_v34 = vpack.c.bf16 %v4095_v39, %v2061_v42  ;;  %v1787_v23 = vsel %vm1508_vm8, %v1785_v47, -1e+30  ;;  %v1786_v51 = vsel %vm1507_vm9, %v1784_v50, -1e+30  ;;  %v5271_v39 = vld [vmem:[#allocation4 + $0x20] sm:$0xff]  ;;  %v5273_v42 = vld [vmem:[#allocation4 + $0x28] sm:$0xff] }
 0x9ea   :  { %v1791_v56 = vsel %vm177_vm3, %v1787_v23, -inf  ;;  %v1788_v45 = vsel %vm177_vm3, %v1786_v51, -inf  ;;  %v2212_v47 = vadd.f32 %v5271_v39, %v4945_v9  ;;  %v5279_v50 = vadd.f32 %v5273_v42, %v4948_v10 }
 0x9eb   :  { %1792 = vmax.xlane.f32.xlu1 %v1791_v56  ;;  %1789 = vmax.xlane.f32.xlu0 %v1788_v45 }
 0x9ec   :  { %v2214_v62 = vsel %vm177_vm3, %v2212_v47, 0.0  ;;  %v2217_v22 = vsel %vm177_vm3, %v5279_v50, 0.0 }
 0x9ed   :  { %v2222_v43 = vadd.f32 %v2217_v22, %v2214_v62 }
 0x9ef   :  { %1638 = vmax.xlane.f32.xlu1 %v1637_v0  ;;  %1635 = vmax.xlane.f32.xlu0 %v1634_v3 }
 0xa78   :  { %v1793_v1 = vpop.xlane.xlu1 %1792  ;;  %v1790_v41 = vpop.xlane.xlu0 %1789 }
 0xa79   :  { %v1795_v4 = vsub.f32 %v1787_v23, %v1793_v1  ;;  %v1794_v5 = vsub.f32 %v1786_v51, %v1790_v41 }
 0xa7b   :  { %v1798_v6 = vmul.f32 1.442695, %v1795_v4  ;;  %v1796_v7 = vmul.f32 1.442695, %v1794_v5  ;;  %v2235_v4 = vld [vmem:[#allocation9 + $0x40] sm:$0xff]  ;;  %v2236_v5 = vld [vmem:[#allocation9 + $0x48] sm:$0xff] }
 0xa7c   :  { %v1639_v17 = vpop.xlane.xlu1 %1638  ;;  %v1636_v18 = vpop.xlane.xlu0 %1635 }
 0xa7d   :  { %4433 = vpow2.f32 %v1798_v6  ;;  %v1641_v63 = vsub.f32 %v1633_v57, %v1639_v17  ;;  %v1640_v11 = vsub.f32 %v1632_v60, %v1636_v18  ;;  %v2237_v17 = vld [vmem:[#allocation9 + $0x50] sm:$0xff]  ;;  %v2238_v18 = vld [vmem:[#allocation9 + $0x58] sm:$0xff] }
 0xa7e   :  { %4435 = vpow2.f32 %v1796_v7  ;;  %v4274_v7 = vpack.c.bf16 %v2236_v5, %v2235_v4 }
 0xa7f   :  { %v1644_v19 = vmul.f32 1.442695, %v1641_v63  ;;  %v1642_v20 = vmul.f32 1.442695, %v1640_v11  ;;  %v4509_v63 = vld [vmem:[%s5633_s0] sm:$0xff] }
 0xa81   :  { %4437 = vpow2.f32 %v1644_v19 }
 0xa82   :  { %4439 = vpow2.f32 %v1642_v20 }
 0xa87   :  { %v4434_v21 = vpop.eup %4433 }
 0xa88   :  { %v4436_v48 = vpop.eup %4435  ;;  %v1801_v13 = vsel %vm1508_vm8, %v4434_v21, 0.0 }
 0xa89   :  { %v1805_v49 = vsel %vm177_vm3, %v1801_v13, 0.0  ;;  %v1800_v24 = vsel %vm1507_vm9, %v4436_v48, 0.0 }
 0xa8a   :  { %1806 = vadd.xlane.f32.xlu1 %v1805_v49  ;;  %v1802_v25 = vsel %vm177_vm3, %v1800_v24, 0.0 }
 0xa8b   :  { %v4438_v29 = vpop.eup %4437  ;;  %1803 = vadd.xlane.f32.xlu0 %v1802_v25 }
 0xa8c   :  { %v4440_v30 = vpop.eup %4439  ;;  %v1647_v31 = vsel %vm1508_vm8, %v4438_v29, 0.0 }
 0xa8d   :  { %v1651_v32 = vsel %vm177_vm3, %v1647_v31, 0.0  ;;  %v1646_v35 = vsel %vm1507_vm9, %v4440_v30, 0.0 }
 0xa8e   :  { %1652 = vadd.xlane.f32.xlu1 %v1651_v32  ;;  %v1648_v36 = vsel %vm177_vm3, %v1646_v35, 0.0 }
 0xa8f   :  { %1649 = vadd.xlane.f32.xlu0 %v1648_v36 }
 0xa92   :  { %2218 = vadd.xlane.f32.xlu1 %v2217_v22 }
 0xa93   :  { %2215 = vadd.xlane.f32.xlu0 %v2214_v62  ;;  %v3792_v62 = vld [vmem:[#allocation13 + $0x1] ss:$0 sm:$0xff] }
 0xb17   :  { %v1807_v28 = vpop.xlane.xlu1 %1806 }
 0xb18   :  { %4441 = vrcp.f32 %v1807_v28  ;;  %v1804_v23 = vpop.xlane.xlu0 %1803 }
 0xb19   :  { %4443 = vrcp.f32 %v1804_v23 }
 0xb1b   :  { %v1653_v56 = vpop.xlane.xlu1 %1652 }
 0xb1c   :  { %v1650_v51 = vpop.xlane.xlu0 %1649 }
 0xb1d   :  { %4445 = vrcp.f32 %v1650_v51 }
 0xb1e   :  { %4447 = vrcp.f32 %v1653_v56 }
 0xb1f   :  { %v2219_v29 = vpop.xlane.xlu1 %2218 }
 0xb20   :  { %v2216_v48 = vpop.xlane.xlu0 %2215 }
 0xb22   :  { %v4442_v45 = vpop.eup %4441 }
 0xb23   :  { %v4444_v57 = vpop.eup %4443  ;;  %v1811_v60 = vmul.f32 %v4442_v45, %v1801_v13 }
 0xb24   :  { %v1810_v0 = vmul.f32 %v4444_v57, %v1800_v24 }
 0xb26   :  { %4075 = vmatprep.mubr.msk.f32.mxu0 %vm177_vm3, %v1810_v0 }
 0xb27   :  { %v4446_v3 = vpop.eup %4445  ;;  %4076 = vmatmul.mubr.msk.f32.vlgmr.msra.gmra.mrb[12].mxu0 %vm177_vm3, %v1811_v60 }
 0xb28   :  { %4261 = vmatpush3.bf16.msra.mxu0 %v5196_v33  ;;  %v1656_v1 = vmul.f32 %v4446_v3, %v1646_v35  ;;  %v4448_v41 = vpop.eup %4447  ;;  %v4278_v33 = vpack.c.bf16 %v2238_v18, %v2237_v17  ;;  %v2406_v3 = vld [vmem:[#allocation15 + $0x40] sm:$0xff]  ;;  %v2408_v18 = vld [vmem:[#allocation15 + $0x50] sm:$0xff] }
 0xb29   :  { %4271 = vmatprep.subr.bf16.mxu0 %v5253_v34  ;;  %v1657_v6 = vmul.f32 %v4448_v41, %v1647_v31  ;;  %v3789_v31 = vld [vmem:[%s5608_s12 + $0x1] ss:$0 sm:$0xff] }
 0xb2a   :  { %4082 = vmatprep.mubr.msk.f32.mxu0 %vm177_vm3, %v1656_v1  ;;  %v2407_v1 = vld [vmem:[#allocation15 + $0x48] sm:$0xff] }
 0xb2f   :  { %4083 = vmatmul.mubr.msk.f32.vlgmr.msra.gmra.mrb[12].mxu0 %vm177_vm3, %v1657_v6 }
 0xb30   :  { %4273 = vmatpush3.bf16.msra.mxu0 %v5253_v34  ;;  %4100 = vmatprep.mubr.msk.f32.mxu0 %vm177_vm3, %v5140_v27  ;;  %v4510_v27 = vld [vmem:[%s5633_s0 + $0x8] sm:$0xff] }
 0xb31   :  { %4275 = vmatprep.subr.bf16.mxu0 %v4274_v7 }
 0xb33   :  { %4101 = vmatmul.mubr.msk.f32.vlgmr.msra.gmra.mrb[14].mxu0 %vm177_vm3, %v5172_v58  ;;  %v2223_v58 = vrot.slane %v2222_v43, 4 }
 0xb34   :  { %4277 = vmatpush3.bf16.msra.mxu0 %v4274_v7  ;;  %4111 = vmatprep.mubr.msk.f32.mxu0 %vm202_vm1, %v4509_v63  ;;  %v4286_v7 = vpack.c.bf16 %v2407_v1, %v2406_v3  ;;  %v2494_v1 = vsel %vm177_vm3, %v5273_v42, 0.0 }
 0xb35   :  { %4279 = vmatprep.subr.bf16.mxu0 %v4278_v33  ;;  %v2224_v34 = vadd.f32 %v2223_v58, %v2222_v43  ;;  %v3797_v58 = vld [vmem:[#allocation10 + $0x2] ss:$0 sm:$0xff] }
 0xb37   :  { %v2225_v11 = vrot.slane %v2224_v34, 2 }
 0xb38   :  { %4281 = vmatpush3.bf16.msra.mxu0 %v4278_v33  ;;  %v2409_v33 = vld [vmem:[#allocation15 + $0x58] sm:$0xff] }
 0xb39   :  { %4294 = vmatprep.subr.bf16.mxu0 %v4709_v54  ;;  %v2226_v19 = vadd.f32 %v2225_v11, %v2224_v34  ;;  %v4290_v63 = vpack.c.bf16 %v2409_v33, %v2408_v18 }
 0xb3b   :  { %4112 = vmatmul.mubr.msk.f32.vlgmr.msra.gmra.mrb[16].mxu0 %vm202_vm1, %v4510_v27  ;;  %v2227_v20 = vrot.slane %v2226_v19, 1 }
 0xb3c   :  { %4136 = vmatprep.mubr.msk.f32.mxu0 %vm4710_vm4, %v4708_v8 }
 0xb3d   :  { %v2228_v21 = vadd.f32 %v2227_v20, %v2226_v19 }
 0xb3f   :  { %4449 = vrsqrt.f32 %v2228_v21 }
 0xb40   :  { %4451 = vrsqrt.f32 %v2216_v48 }
 0xb41   :  { %4453 = vrsqrt.f32 %v2219_v29 }
 0xb49   :  { %v4450_v13 = vpop.eup %4449 }
 0xb4a   :  { %v4452_v49 = vpop.eup %4451 }
 0xb4b   :  { %v2230_v24 = vmul.f32 %v4452_v49, %v2212_v47  ;;  %v4454_v0 = vpop.eup %4453 }
 0xb4c   :  { %v2231_v41 = vmul.f32 %v4454_v0, %v5279_v50  ;;  %v3803_v50 = vld [vmem:[%s5605_s9 + $0x4] sm:$0x3]  ;;  %v2491_v0 = vsel %vm177_vm3, %v5271_v39, 0.0 }
 0xb4d   :  { %v5306_v25 = vmul.f32 %v4450_v13, %v2230_v24  ;;  %v2761_v27 = vrot.slane %v3803_v50, %v5008_v59 }
 0xb4e   :  { %v5338_v17 = vmul.f32 %v4450_v13, %v2231_v41 }
 0xb4f   :  { %4118 = vmatprep.mubr.msk.f32.mxu1 %vm177_vm3, %v5306_v25  ;;  %2763 = vrot.lane.b32.xlu1 %v2761_v27, %s4712_s25  ;;  %v2618_v27 = vrot.slane %v3803_v50, %v4997_v55  ;;  %v3013_v50 = vld [vmem:[#allocation12 + $0x58] sm:$0xff] }
 0xc02   :  { %v4084_v30 = vpop.f32.mrb[12].mxu0 }
 0xc03   :  { %v1977_v32 = vmul.f32 0.5, %v4084_v30  ;;  %v1967_v35 = vpop.f32.mrb[13].mxu0 }
 0xc04   :  { %v1976_v36 = vmul.f32 0.5, %v1967_v35  ;;  %v5376_v35 = vld [vmem:[#allocation7 + $0x20] sm:$0xff] }
 0xc05   :  { %v5313_v22 = vadd.f32 %v3789_v31, %v1977_v32  ;;  %v5374_v32 = vld [vmem:[#allocation7 + $0x28] sm:$0xff] }
 0xc06   :  { %v5315_v43 = vadd.f32 %v3789_v31, %v1976_v36  ;;  %v4102_v47 = vpop.f32.mrb[14].mxu0  ;;  %v2507_v36 = vsel %vm177_vm3, %v5374_v32, 0.0 }
 0xc07   :  { %v5317_v28 = vadd.f32 %v4102_v47, %v3792_v62  ;;  %v2144_v23 = vpop.f32.mrb[15].mxu0  ;;  %v1989_v51 = vmax.f32 %v5313_v22, 0.0  ;;  %v3804_v47 = vld [vmem:[%s5606_s10 + $0x4] sm:$0x3] }
 0xc08   :  { %v5320_v56 = vadd.f32 %v3792_v62, %v2144_v23  ;;  %v1988_v45 = vmax.f32 %v5315_v43, 0.0  ;;  %v2504_v62 = vsel %vm177_vm3, %v5376_v35, 0.0  ;;  %v3805_v23 = vld [vmem:[%s5607_s11 + $0x4] sm:$0x3] }
 0xc09   :  { %v2154_v57 = vmax.f32 %v5317_v28, 0.0  ;;  %2174 = vst.msk [vmem:[#allocation2 + $0x48] sm:$0xff] %vm202_vm1, %v1989_v51  ;;  %v2627_v3 = vmul.f32 %v3805_v23, %v3804_v47 }
 0xc0a   :  { %v2153_v60 = vmax.f32 %v5320_v56, 0.0  ;;  %2173 = vst.msk [vmem:[#allocation2 + $0x40] sm:$0xff] %vm202_vm1, %v1988_v45 }
 0xc0b   :  { %2157 = vst.msk [vmem:[#allocation2 + $0x38] sm:$0xff] %vm202_vm1, %v2154_v57  ;;  %v2782_v41 = vsel %vm747_vm6, %v2627_v3, 0.0  ;;  %v2161_v37 = vsel %vm202_vm1, %v2154_v57, 0.0 }
 0xc0c   :  { %2156 = vst.msk [vmem:[#allocation2 + $0x30] sm:$0xff] %vm202_vm1, %v2153_v60  ;;  %v2158_v38 = vsel %vm202_vm1, %v2153_v60, 0.0 }
 0xc0e   :  { %v4113_v4 = vpop.f32.mrb[16].mxu0 }
 0xc0f   :  { %v2305_v5 = vpop.f32.mrb[17].mxu0 }
 0xc10   :  { %v4282_v6 = vpack.c.bf16 %v4113_v4, %v2305_v5 }
 0xc12   :  { %4283 = vmatprep.subr.bf16.mxu1 %v4282_v6 }
 0xc13   :  { %4285 = vmatpush3.bf16.msra.mxu1 %v4282_v6  ;;  %v3010_v6 = vld [vmem:[#allocation12 + $0x40] sm:$0xff] }
 0xc14   :  { %4287 = vmatprep.subr.bf16.mxu1 %v4286_v7 }
 0xc16   :  { %4119 = vmatmul.mubr.msk.f32.vlgmr.msra.gmra.mrb[16].mxu1 %vm177_vm3, %v5338_v17 }
 0xc17   :  { %4289 = vmatpush3.bf16.msra.mxu1 %v4286_v7  ;;  %v3011_v7 = vld [vmem:[#allocation12 + $0x48] sm:$0xff] }
 0xc18   :  { %4291 = vmatprep.subr.bf16.mxu1 %v4290_v63 }
 0xc1b   :  { %4293 = vmatpush3.bf16.msra.mxu1 %v4290_v63 }
 0xc1c   :  { %4298 = vmatprep.subr.bf16.mxu1 %v4709_v54  ;;  %v2764_v54 = vpop.permute.xlu1 %2763 }
 0xce9   :  { %v4120_v34 = vpop.f32.mrb[16].mxu1 }
 0xcea   :  { %v2400_v11 = vadd.f32 %v4120_v34, %v3797_v58  ;;  %v2394_v19 = vpop.f32.mrb[17].mxu1  ;;  %v2628_v34 = vsel %vm592_vm7, %v2627_v3, 0.0 }
 0xceb   :  { %v2395_v20 = vadd.f32 %v3797_v58, %v2394_v19 }
 0xcec   :  { %v5348_v21 = vmax.f32 %v2400_v11, 0.0  ;;  %v4310_v11 = vpack.c.bf16 %v3011_v7, %v3010_v6 }
 0xced   :  { %v5350_v48 = vmax.f32 %v2395_v20, 0.0 }
 0xcee   :  { %3210 = vst.msk [vmem:[#allocation2 + $0x88] sm:$0xff] %vm202_vm1, %v5348_v21 }
 0xcef   :  { %3209 = vst.msk [vmem:[#allocation2 + $0x80] sm:$0xff] %vm202_vm1, %v5350_v48  ;;  %4129 = vmatprep.mubr.msk.f32.mxu1 %vm202_vm1, %v5350_v48 }
 0xcf0   :  { %4130 = vmatmul.mubr.msk.f32.vlgmr.msra.gmra.mrb[18].mxu1 %vm202_vm1, %v5348_v21 }
 0xcf1   :  { %4143 = vmatprep.mubr.msk.f32.mxu1 %vm4710_vm4, %v4708_v8  ;;  %v3802_v8 = vld [vmem:[%s5604_s8 + $0x4] sm:$0x3] }
 0xdc3   :  { %v4131_v13 = vpop.f32.mrb[18].mxu1 }
 0xdc4   :  { %v2482_v49 = vpop.f32.mrb[19].mxu1  ;;  %v2767_v31 = vmul.f32 %v4131_v13, %v2764_v54 }
 0xdc5   :  { %v5362_v24 = vpack.c.bf16 %v4131_v13, %v2482_v49  ;;  %v4393_v29 = vpack.i.bf16 %v4131_v13, %v2482_v49  ;;  %v2766_v30 = vmul.f32 %v2764_v54, %v2482_v49  ;;  %v2620_v54 = vmul.f32 %v4131_v13, %v2618_v27 }
 0xdc7   :  { %4394 = vrot.lane.b32.xlu0 %v4393_v29, %s4711_s21  ;;  %2770 = vrot.lane.b32.xlu1 %v2766_v30, %s4711_s21  ;;  %v2619_v29 = vmul.f32 %v2618_v27, %v2482_v49  ;;  %v3012_v30 = vld [vmem:[#allocation12 + $0x50] sm:$0xff] }
 0xdc8   :  { %4297 = vmatpush3.bf16.xpose.msk.msra.mxu0 %vm5012_vm5, %v5362_v24  ;;  %v4314_v61 = vpack.c.bf16 %v3013_v50, %v3012_v30 }
 0xdcb   :  { %2772 = vrot.lane.b32.xlu0 %v2767_v31, %s4711_s21  ;;  %v2677_v31 = vrot.slane %v3802_v8, 1 }
 0xdcf   :  { %4137 = vmatmul.mubr.msk.f32.vlgmr.msra.gmra.mrb[18].mxu0 %vm202_vm1, %v3802_v8 }
 0xdea   :  { %2508 = vadd.xlane.f32.xlu0 %v2507_v36  ;;  %v2624_v36 = vsel %vm202_vm1, %v2620_v54, 0.0 }
 0xdeb   :  { %2505 = vadd.xlane.f32.xlu1 %v2504_v62  ;;  %v2621_v62 = vsel %vm202_vm1, %v2619_v29, 0.0 }
 0xdee   :  { %2492 = vadd.xlane.f32.xlu0 %v2491_v0 }
 0xdef   :  { %2495 = vadd.xlane.f32.xlu1 %v2494_v1 }
 0xdf2   :  { %2783 = vadd.xlane.f32.xlu0 %v2782_v41 }
 0xe39   :  { %v4395_v4 = vpop.permute.xlu0 %4394  ;;  %v2771_v5 = vpop.permute.xlu1 %2770 }
 0xe3a   :  { %v4397_v18 = vunpack.i.h.bf16 %v4395_v4  ;;  %v4396_v33 = vunpack.i.l.bf16 %v4395_v4  ;;  %v2776_v63 = vsel %vm202_vm1, %v2771_v5, 0.0 }
 0xe3b   :  { %2777 = vadd.xlane.f32.xlu1 %v2776_v63 }
 0xe3c   :  { %v4299_v58 = vpack.c.bf16 %v4397_v18, %v4396_v33 }
 0xe3d   :  { %v2773_v19 = vpop.permute.xlu0 %2772 }
 0xe3e   :  { %4301 = vmatpush3.bf16.xpose.msk.msra.mxu1 %vm5012_vm5, %v4299_v58  ;;  %4303 = vmatprep.subr.bf16.mxu0 %v4299_v58  ;;  %v2779_v20 = vsel %vm202_vm1, %v2773_v19, 0.0 }
 0xe3f   :  { %2780 = vadd.xlane.f32.xlu0 %v2779_v20  ;;  %2629 = vadd.xlane.f32.xlu1 %v2628_v34 }
 0xe40   :  { %4305 = vmatpush3.bf16.msra.mxu0 %v4299_v58  ;;  %4311 = vmatprep.subr.bf16.mxu1 %v4310_v11 }
 0xe41   :  { %4307 = vmatprep.subr.bf16.mxu0 %v5362_v24 }
 0xe43   :  { %2625 = vadd.xlane.f32.xlu1 %v2624_v36  ;;  %2622 = vadd.xlane.f32.xlu0 %v2621_v62 }
 0xe45   :  { %4144 = vmatmul.mubr.msk.f32.vlgmr.msra.gmra.mrb[20].mxu1 %vm202_vm1, %v2677_v31 }
 0xe46   :  { %4313 = vmatpush3.bf16.msra.mxu1 %v4310_v11  ;;  %4168 = vmatprep.mubr.msk.f32.mxu1 %vm202_vm1, %v5350_v48 }
 0xe47   :  { %4315 = vmatprep.subr.bf16.mxu1 %v4314_v61 }
 0xe4a   :  { %4317 = vmatpush3.bf16.msra.mxu1 %v4314_v61 }
 0xe4d   :  { %4169 = vmatmul.mubr.msk.f32.vlgmr.msra.gmra.mrb[22].mxu1 %vm202_vm1, %v5348_v21 }
 0xe77   :  { %v2509_v8 = vpop.xlane.xlu0 %2508 }
 0xe78   :  { %v2506_v47 = vpop.xlane.xlu1 %2505 }
 0xe79   :  { %v2510_v23 = vadd.f32 %v2509_v8, %v2506_v47 }
 0xe7b   :  { %v2511_v0 = vrot.slane %v2510_v23, 4  ;;  %v2493_v41 = vpop.xlane.xlu0 %2492 }
 0xe7c   :  { %v2496_v4 = vpop.xlane.xlu1 %2495 }
 0xe7d   :  { %v2512_v3 = vadd.f32 %v2511_v0, %v2510_v23  ;;  %v2497_v6 = vadd.f32 %v2496_v4, %v2493_v41 }
 0xe7f   :  { %v2513_v1 = vrot.slane %v2512_v3, 2  ;;  %v2498_v18 = vrot.slane %v2497_v6, 4  ;;  %v2784_v54 = vpop.xlane.xlu0 %2783 }
 0xe81   :  { %v2514_v5 = vadd.f32 %v2513_v1, %v2512_v3  ;;  %v2499_v63 = vadd.f32 %v2498_v18, %v2497_v6 }
 0xe83   :  { %v2515_v7 = vrot.slane %v2514_v5, 1  ;;  %v2500_v58 = vrot.slane %v2499_v63, 2 }
 0xe85   :  { %v2516_v33 = vadd.f32 %v2515_v7, %v2514_v5  ;;  %v2501_v34 = vadd.f32 %v2500_v58, %v2499_v63  ;;  %v2794_v5 = vrot.slane %v2784_v54, %v5008_v59 }
 0xe87   :  { %v2517_v27 = vmax.f32 %v2516_v33, 1.0  ;;  %v2502_v11 = vrot.slane %v2501_v34, 1 }
 0xe89   :  { %4455 = vrcp.f32 %v2517_v27  ;;  %v2503_v19 = vadd.f32 %v2502_v11, %v2501_v34  ;;  %v2524_v34 = vadd.f32 %v5376_v35, %v4945_v9 }
 0xe8b   :  { %vm2526_vm11 = vcmp.gt.f32.partialorder %v2524_v34, 0.0  ;;  %v1173_v34 = vsel %vm202_vm1, %v4984_v53, 0.0  ;;  %v2178_v53 = vsel %vm202_vm1, %v1989_v51, 0.0 }
 0xe93   :  { %v4456_v20 = vpop.eup %4455 }
 0xe94   :  { %v2519_v30 = vmul.f32 %v4456_v20, %v2503_v19 }
 0xe96   :  { %v2520_v36 = vmul.f32 %v2519_v30, %v4945_v9  ;;  %v2521_v62 = vmul.f32 %v2519_v30, %v4948_v10 }
 0xe98   :  { %v2522_v61 = vadd.f32 %v2520_v36, %v5271_v39 }
 0xe9a   :  { %v2795_v63 = vmul.f32 %v2794_v5, %v2522_v61 }
 0xea2   :  { %v2611_v13 = vpop.f32.mrb[18].mxu0 }
 0xea3   :  { %v4138_v49 = vpop.f32.mrb[19].mxu0  ;;  %v2634_v47 = vrot.slane %v2611_v13, %v4997_v55  ;;  %v2525_v13 = vadd.f32 %v5374_v32, %v4948_v10 }
 0xea4   :  { %v2523_v49 = vadd.f32 %v2521_v62, %v5273_v42 }
 0xea5   :  { %vm2527_vm10 = vcmp.gt.f32.partialorder %v2525_v13, 0.0  ;;  %v1176_v13 = vsel %vm202_vm1, %v4982_v52, 0.0  ;;  %v1139_v52 = vsel %vm202_vm1, %v1135_v26, 0.0 }
 0xea6   :  { %v2796_v42 = vmul.f32 %v2794_v5, %v2523_v49 }
 0xec8   :  { %v2778_v29 = vpop.xlane.xlu1 %2777 }
 0xecc   :  { %v2781_v50 = vpop.xlane.xlu0 %2780  ;;  %v2630_v31 = vpop.xlane.xlu1 %2629 }
 0xecd   :  { %v2640_v8 = vrot.slane %v2630_v31, %v4997_v55 }
 0xecf   :  { %v2641_v3 = vmul.f32 %v2640_v8, %v2522_v61  ;;  %v2642_v1 = vmul.f32 %v2640_v8, %v2523_v49 }
 0xed0   :  { %v2626_v23 = vpop.xlane.xlu1 %2625  ;;  %v2623_v0 = vpop.xlane.xlu0 %2622 }
 0xed1   :  { %v2636_v41 = vadd.f32 %v2634_v47, %v2626_v23  ;;  %v2635_v4 = vadd.f32 %v2634_v47, %v2623_v0 }
 0xed3   :  { %v2644_v7 = vadd.f32 %v2642_v1, %v2636_v41  ;;  %v2643_v18 = vadd.f32 %v2641_v3, %v2635_v4 }
 0xed5   :  { %v2648_v20 = vmul.f32 0.2, %v2644_v7  ;;  %v2647_v59 = vmul.f32 0.2, %v2643_v18  ;;  %vm2646_vm4 = vcmp.gt.f32.partialorder %v2644_v7, 0.0  ;;  %vm2645_vm5 = vcmp.gt.f32.partialorder %v2643_v18, 0.0 }
 0xed7   :  { %v2650_v10 = vsel %vm2646_vm4, %v2644_v7, %v2648_v20  ;;  %v2649_v32 = vsel %vm2645_vm5, %v2643_v18, %v2647_v59 }
 0xed8   :  { %v2652_v49 = vsel %vm2527_vm10, %v2650_v10, -1e+30  ;;  %v2651_v8 = vsel %vm2526_vm11, %v2649_v32, -1e+30  ;;  %v1156_v10 = vsel %vm202_vm1, %v972_v44, 0.0  ;;  %v2175_v44 = vsel %vm202_vm1, %v1988_v45, 0.0 }
 0xed9   :  { %v2656_v47 = vsel %vm177_vm3, %v2652_v49, -inf  ;;  %v2653_v23 = vsel %vm177_vm3, %v2651_v8, -inf }
 0xf18   :  { %v2754_v6 = vpop.f32.mrb[20].mxu1 }
 0xf19   :  { %v2788_v33 = vrot.slane %v2754_v6, %v4997_v55  ;;  %v4145_v39 = vpop.f32.mrb[21].mxu1 }
 0xf1b   :  { %v2789_v27 = vadd.f32 %v2788_v33, %v2778_v29  ;;  %v2790_v58 = vadd.f32 %v2788_v33, %v2781_v50 }
 0xf1d   :  { %v2797_v11 = vadd.f32 %v2795_v63, %v2789_v27  ;;  %v2798_v19 = vadd.f32 %v2796_v42, %v2790_v58 }
 0xf1f   :  { %vm2800_vm6 = vcmp.gt.f32.partialorder %v2798_v19, 0.0  ;;  %v2802_v54 = vmul.f32 0.2, %v2798_v19  ;;  %vm2799_vm7 = vcmp.gt.f32.partialorder %v2797_v11, 0.0  ;;  %v2801_v55 = vmul.f32 0.2, %v2797_v11 }
 0xf20   :  { %v4170_v29 = vpop.f32.mrb[22].mxu1 }
 0xf21   :  { %v3080_v30 = vpop.f32.mrb[23].mxu1  ;;  %v2804_v50 = vsel %vm2800_vm6, %v2798_v19, %v2802_v54  ;;  %v2803_v31 = vsel %vm2799_vm7, %v2797_v11, %v2801_v55 }
 0xf22   :  { %v5419_v36 = vpack.c.bf16 %v4170_v29, %v3080_v30  ;;  %v2806_v9 = vsel %vm2527_vm10, %v2804_v50, -1e+30  ;;  %v2805_v35 = vsel %vm2526_vm11, %v2803_v31, -1e+30  ;;  %v1159_v31 = vsel %vm202_vm1, %v973_v15, 0.0 }
 0xf23   :  { %v2810_v62 = vsel %vm177_vm3, %v2806_v9, -inf  ;;  %v2807_v61 = vsel %vm177_vm3, %v2805_v35, -inf  ;;  %v1142_v15 = vsel %vm202_vm1, %v1136_v46, 0.0 }
 0xf24   :  { %2811 = vmax.xlane.f32.xlu1 %v2810_v62  ;;  %2808 = vmax.xlane.f32.xlu0 %v2807_v61  ;;  %v3820_v61 = vld [vmem:[#allocation13 + $0x2] ss:$0 sm:$0xff] }
 0xf28   :  { %2657 = vmax.xlane.f32.xlu1 %v2656_v47  ;;  %2654 = vmax.xlane.f32.xlu0 %v2653_v23 }
 0xfb1   :  { %v2812_v0 = vpop.xlane.xlu1 %2811  ;;  %v2809_v3 = vpop.xlane.xlu0 %2808 }
 0xfb2   :  { %v2814_v1 = vsub.f32 %v2806_v9, %v2812_v0  ;;  %v2813_v41 = vsub.f32 %v2805_v35, %v2809_v3 }
 0xfb4   :  { %v2817_v4 = vmul.f32 1.442695, %v2814_v1  ;;  %v2815_v5 = vmul.f32 1.442695, %v2813_v41 }
 0xfb5   :  { %v2658_v6 = vpop.xlane.xlu1 %2657  ;;  %v2655_v7 = vpop.xlane.xlu0 %2654 }
 0xfb6   :  { %4457 = vpow2.f32 %v2817_v4  ;;  %v2660_v18 = vsub.f32 %v2652_v49, %v2658_v6  ;;  %v2659_v33 = vsub.f32 %v2651_v8, %v2655_v7  ;;  %v3214_v7 = vsel %vm202_vm1, %v5348_v21, 0.0 }
 0xfb7   :  { %4459 = vpow2.f32 %v2815_v5 }
 0xfb8   :  { %v2663_v39 = vmul.f32 1.442695, %v2660_v18  ;;  %v2661_v63 = vmul.f32 1.442695, %v2659_v33  ;;  %v3211_v18 = vsel %vm202_vm1, %v5350_v48, 0.0  ;;  %v4713_v33 = vmov 0  }
 0xfb9   :  { %4398 = vset.pattern.permute.xlu1 %v4713_v33  ;;  %4399 = vset.pattern.permute.xlu0 %v4713_v33 }
 0xfba   :  { %4461 = vpow2.f32 %v2663_v39 }
 0xfbb   :  { %4463 = vpow2.f32 %v2661_v63 }
 0xfc0   :  { %v4458_v42 = vpop.eup %4457 }
 0xfc1   :  { %v4460_v27 = vpop.eup %4459  ;;  %v2820_v58 = vsel %vm2527_vm10, %v4458_v42, 0.0 }
 0xfc2   :  { %v2824_v11 = vsel %vm177_vm3, %v2820_v58, 0.0  ;;  %v2819_v19 = vsel %vm2526_vm11, %v4460_v27, 0.0 }
 0xfc3   :  { %2825 = vadd.xlane.f32.xlu1 %v2824_v11  ;;  %v2821_v20 = vsel %vm177_vm3, %v2819_v19, 0.0 }
 0xfc4   :  { %v4462_v59 = vpop.eup %4461  ;;  %2822 = vadd.xlane.f32.xlu0 %v2821_v20 }
 0xfc5   :  { %v4464_v54 = vpop.eup %4463  ;;  %v2666_v55 = vsel %vm2527_vm10, %v4462_v59, 0.0 }
 0xfc6   :  { %v2670_v29 = vsel %vm177_vm3, %v2666_v55, 0.0  ;;  %v2665_v30 = vsel %vm2526_vm11, %v4464_v54, 0.0 }
 0xfc7   :  { %2671 = vadd.xlane.f32.xlu1 %v2670_v29  ;;  %v2667_v50 = vsel %vm177_vm3, %v2665_v30, 0.0 }
 0xfc8   :  { %2668 = vadd.xlane.f32.xlu0 %v2667_v50 }
 0xfcb   :  { %1160 = vadd.xlane.f32.xlu1 %v1159_v31 }
 0xfcc   :  { %1157 = vadd.xlane.f32.xlu0 %v1156_v10 }
 0xfcf   :  { %1177 = vadd.xlane.f32.xlu1 %v1176_v13 }
 0xfd0   :  { %1174 = vadd.xlane.f32.xlu0 %v1173_v34 }
 0xfd3   :  { %2162 = vadd.xlane.f32.xlu1 %v2161_v37 }
 0xfd4   :  { %2159 = vadd.xlane.f32.xlu0 %v2158_v38 }
 0xfd7   :  { %1143 = vadd.xlane.f32.xlu1 %v1142_v15 }
 0xfd8   :  { %1140 = vadd.xlane.f32.xlu0 %v1139_v52 }
 0xfdb   :  { %2179 = vadd.xlane.f32.xlu1 %v2178_v53 }
 0xfdc   :  { %2176 = vadd.xlane.f32.xlu0 %v2175_v44 }
 0xfdf   :  { %2196 = vadd.xlane.f32.xlu1 %v2195_v40 }
 0xfe0   :  { %2193 = vadd.xlane.f32.xlu0 %v2192_v16 }
0x1050   :  { %v2826_v46 = vpop.xlane.xlu1 %2825 }
0x1051   :  { %4465 = vrcp.f32 %v2826_v46  ;;  %v2823_v26 = vpop.xlane.xlu0 %2822 }
0x1052   :  { %4467 = vrcp.f32 %v2823_v26 }
0x1054   :  { %v2672_v28 = vpop.xlane.xlu1 %2671 }
0x1055   :  { %v2669_v22 = vpop.xlane.xlu0 %2668 }
0x1056   :  { %4469 = vrcp.f32 %v2669_v22 }
0x1057   :  { %4471 = vrcp.f32 %v2672_v28 }
0x1058   :  { %v1161_v39 = vpop.xlane.xlu1 %1160 }
0x1059   :  { %v1158_v63 = vpop.xlane.xlu0 %1157 }
0x105b   :  { %v4466_v43 = vpop.eup %4465 }
0x105c   :  { %v4468_v51 = vpop.eup %4467  ;;  %v2830_v56 = vmul.f32 %v4466_v43, %v2820_v58  ;;  %v1178_v42 = vpop.xlane.xlu1 %1177 }
0x105d   :  { %v2829_v45 = vmul.f32 %v4468_v51, %v2819_v19  ;;  %v1175_v27 = vpop.xlane.xlu0 %1174 }
0x105e   :  { %v1179_v29 = vadd.f32 %v1178_v42, %v1175_v27 }
0x105f   :  { %4150 = vmatprep.mubr.msk.f32.mxu0 %vm177_vm3, %v2829_v45 }
0x1060   :  { %v4470_v12 = vpop.eup %4469  ;;  %4151 = vmatmul.mubr.msk.f32.vlgmr.msra.gmra.mrb[20].mxu0 %vm177_vm3, %v2830_v56  ;;  %v2163_v58 = vpop.xlane.xlu1 %2162  ;;  %v1180_v34 = vrot.slane %v1179_v29, 4 }
0x1061   :  { %4309 = vmatpush3.bf16.msra.mxu0 %v5362_v24  ;;  %v2675_v14 = vmul.f32 %v4470_v12, %v2665_v30  ;;  %v4472_v57 = vpop.eup %4471  ;;  %v3817_v24 = vld [vmem:[%s5608_s12 + $0x2] ss:$0 sm:$0xff]  ;;  %v2160_v11 = vpop.xlane.xlu0 %2159 }
0x1062   :  { %4319 = vmatprep.subr.bf16.mxu0 %v5419_v36  ;;  %v2676_v60 = vmul.f32 %v4472_v57, %v2666_v55  ;;  %v1162_v55 = vadd.f32 %v1161_v39, %v1158_v63  ;;  %v2164_v30 = vadd.f32 %v2163_v58, %v2160_v11  ;;  %v1181_v44 = vadd.f32 %v1180_v34, %v1179_v29 }
0x1063   :  { %4157 = vmatprep.mubr.msk.f32.mxu0 %vm177_vm3, %v2675_v14 }
0x1064   :  { %v1144_v19 = vpop.xlane.xlu1 %1143  ;;  %v1163_v21 = vrot.slane %v1162_v55, 4  ;;  %v2165_v37 = vrot.slane %v2164_v30, 4  ;;  %v1182_v28 = vrot.slane %v1181_v44, 2 }
0x1065   :  { %v1141_v20 = vpop.xlane.xlu0 %1140 }
0x1066   :  { %v1145_v31 = vadd.f32 %v1144_v19, %v1141_v20  ;;  %v1164_v13 = vadd.f32 %v1163_v21, %v1162_v55  ;;  %v2166_v40 = vadd.f32 %v2165_v37, %v2164_v30  ;;  %v1183_v14 = vadd.f32 %v1182_v28, %v1181_v44 }
0x1068   :  { %4158 = vmatmul.mubr.msk.f32.vlgmr.msra.gmra.mrb[20].mxu0 %vm177_vm3, %v2676_v60  ;;  %v2180_v59 = vpop.xlane.xlu1 %2179  ;;  %v1146_v15 = vrot.slane %v1145_v31, 4  ;;  %v1165_v53 = vrot.slane %v1164_v13, 2  ;;  %v2167_v43 = vrot.slane %v2166_v40, 2 }
0x1069   :  { %4321 = vmatpush3.bf16.msra.mxu0 %v5419_v36  ;;  %4175 = vmatprep.mubr.msk.f32.mxu0 %vm177_vm3, %v5306_v25  ;;  %v2177_v54 = vpop.xlane.xlu0 %2176 }
0x106a   :  { %v2181_v38 = vadd.f32 %v2180_v59, %v2177_v54  ;;  %v1147_v46 = vadd.f32 %v1146_v15, %v1145_v31  ;;  %v1166_v22 = vadd.f32 %v1165_v53, %v1164_v13  ;;  %v2168_v57 = vadd.f32 %v2167_v43, %v2166_v40  ;;  %v3225_v13 = vld [vmem:[%s5610_s14] sm:$0x1] }
0x106c   :  { %4176 = vmatmul.mubr.msk.f32.vlgmr.msra.gmra.mrb[22].mxu0 %vm177_vm3, %v5338_v17  ;;  %v2197_v50 = vpop.xlane.xlu1 %2196  ;;  %v2182_v16 = vrot.slane %v2181_v38, 4  ;;  %v1148_v56 = vrot.slane %v1147_v46, 2  ;;  %v1167_v12 = vrot.slane %v1166_v22, 1  ;;  %vm3389_vm3 = vcmask 360448  }
0x106d   :  { %v2194_v48 = vpop.xlane.xlu0 %2193 }
0x106e   :  { %v2198_v10 = vadd.f32 %v2197_v50, %v2194_v48  ;;  %v2183_v51 = vadd.f32 %v2182_v16, %v2181_v38 }
0x1070   :  { %v2199_v52 = vrot.slane %v2198_v10, 4  ;;  %v2184_v60 = vrot.slane %v2183_v51, 2 }
0x1072   :  { %v2200_v26 = vadd.f32 %v2199_v52, %v2198_v10 }
0x1074   :  { %v2201_v45 = vrot.slane %v2200_v26, 2 }
0x113b   :  { %v4159_v32 = vpop.f32.mrb[20].mxu0 }
0x113c   :  { %v2996_v9 = vmul.f32 0.5, %v4159_v32  ;;  %v2986_v35 = vpop.f32.mrb[21].mxu0  ;;  %v1149_v32 = vadd.f32 %v1148_v56, %v1147_v46 }
0x113d   :  { %v2995_v62 = vmul.f32 0.5, %v2986_v35 }
0x113e   :  { %v3006_v49 = vadd.f32 %v3817_v24, %v2996_v9  ;;  %v4714_v9 = vmov 1966171168  }
0x113f   :  { %v3005_v8 = vadd.f32 %v3817_v24, %v2995_v62  ;;  %v4177_v47 = vpop.f32.mrb[22].mxu0  ;;  %v2202_v24 = vadd.f32 %v2201_v45, %v2200_v26  ;;  %v3233_v35 = vunpack.c.l.s4 %v4714_v9  ;;  %v1168_v62 = vadd.f32 %v1167_v12, %v1166_v22 }
0x1140   :  { %v3169_v23 = vadd.f32 %v4177_v47, %v3820_v61  ;;  %v3163_v36 = vpop.f32.mrb[23].mxu0  ;;  %v3008_v0 = vmax.f32 %v3006_v49, 0.0  ;;  %v2169_v49 = vrot.slane %v2168_v57, 1  ;;  %v1150_v47 = vrot.slane %v1149_v32, 1 }
0x1141   :  { %v3164_v3 = vadd.f32 %v3820_v61, %v3163_v36  ;;  %v3007_v25 = vmax.f32 %v3005_v8, 0.0  ;;  %v1184_v61 = vrot.slane %v1183_v14, 1  ;;  %v2185_v8 = vadd.f32 %v2184_v60, %v2183_v51 }
0x1142   :  { %v3173_v1 = vmax.f32 %v3169_v23, 0.0  ;;  %3193 = vst.msk [vmem:[#allocation2 + $0x78] sm:$0xff] %vm202_vm1, %v3008_v0  ;;  %v3197_v5 = vsel %vm202_vm1, %v3008_v0, 0.0  ;;  %v2203_v23 = vrot.slane %v2202_v24, 1  ;;  %v3234_v36 = vunpack.c.0.s8 %v3233_v35 }
0x1143   :  { %v3172_v17 = vmax.f32 %v3164_v3, 0.0  ;;  %3192 = vst.msk [vmem:[#allocation2 + $0x70] sm:$0xff] %vm202_vm1, %v3007_v25  ;;  %v3194_v6 = vsel %vm202_vm1, %v3007_v25, 0.0  ;;  %v1169_v0 = vmul.f32 0.001953125, %v1168_v62  ;;  %v1185_v3 = vadd.f32 %v1184_v61, %v1183_v14 }
0x1144   :  { %3176 = vst.msk [vmem:[#allocation2 + $0x68] sm:$0xff] %vm202_vm1, %v3173_v1  ;;  %v3180_v41 = vsel %vm202_vm1, %v3173_v1, 0.0  ;;  %v2170_v25 = vadd.f32 %v2169_v49, %v2168_v57  ;;  %v5498_v1 = vld [vmem:[%s5609_s13] sm:$0xff] }
0x1145   :  { %3175 = vst.msk [vmem:[#allocation2 + $0x60] sm:$0xff] %vm202_vm1, %v3172_v17  ;;  %3181 = vadd.xlane.f32.xlu1 %v3180_v41  ;;  %v3177_v4 = vsel %vm202_vm1, %v3172_v17, 0.0  ;;  %v2186_v17 = vrot.slane %v2185_v8, 1  ;;  %v3230_v33 = vmul.f32 %v5498_v1, %v1169_v0  ;;  %v1186_v39 = vmul.f32 0.001953125, %v1185_v3 }
0x1146   :  { %3178 = vadd.xlane.f32.xlu0 %v3177_v4  ;;  %v1151_v4 = vadd.f32 %v1150_v47, %v1149_v32  ;;  %v2171_v63 = vmul.f32 0.001953125, %v2170_v25 }
0x1147   :  { %v2187_v42 = vadd.f32 %v2186_v17, %v2185_v8  ;;  %v3249_v21 = vmul.f32 %v5498_v1, %v1186_v39 }
0x1148   :  { %v1152_v11 = vmul.f32 0.001953125, %v1151_v4  ;;  %v3268_v29 = vmul.f32 %v5498_v1, %v2171_v63  ;;  %v3371_v63 = vld [vmem:[%s5611_s15] sm:$0xff] }
0x1149   :  { %3198 = vadd.xlane.f32.xlu1 %v3197_v5 }
0x114a   :  { %3195 = vadd.xlane.f32.xlu0 %v3194_v6  ;;  %v2204_v6 = vadd.f32 %v2203_v23, %v2202_v24  ;;  %v3228_v31 = vmul.f32 %v5498_v1, %v1152_v11 }
0x114c   :  { %v2205_v20 = vmul.f32 0.001953125, %v2204_v6  ;;  %v3229_v22 = vadd.f32 %v3228_v31, %v3225_v13 }
0x114d   :  { %3215 = vadd.xlane.f32.xlu1 %v3214_v7 }
0x114e   :  { %3212 = vadd.xlane.f32.xlu0 %v3211_v18  ;;  %v5501_v18 = vsub.s32 %v3234_v36, %v4940_v2  ;;  %v2188_v2 = vmul.f32 0.001953125, %v2187_v42  ;;  %v3307_v34 = vmul.f32 %v5498_v1, %v2205_v20 }
0x1150   :  { %v3238_v55 = vrot.slane %v3230_v33, %v5501_v18  ;;  %v3257_v53 = vrot.slane %v3249_v21, %v5501_v18  ;;  %v3276_v44 = vrot.slane %v3268_v29, %v5501_v18  ;;  %v3288_v40 = vmul.f32 %v5498_v1, %v2188_v2  ;;  %v3227_v2 = vld [vmem:[%s5609_s13 + $0x8] sm:$0x1]  ;;  %s4715_s13 = smov [#allocation16]  }
0x1151   :  { %v3309_v28 = vcombine.high %v3307_v34, %v3307_v34  ;;  %v3425_v11 = vrot.slane %v3371_v63, %v5501_v18  ;;  %s3729_s28 = sshll.u32 %s4715_s13, 4  ;;  %s3730_s28 = int_to_ptr.vmem [resolvable:$true] %s3729_s28 }
0x1152   :  { %v3239_v52 = vcombine.high %v3238_v55, %v3238_v55  ;;  %v3264_v12 = vrot.slane %v3257_v53, %v5501_v18  ;;  %v3277_v14 = vcombine.high %v3276_v44, %v3276_v44  ;;  %v3290_v57 = vcombine.high %v3288_v40, %v3288_v40  ;;  %s4665_s2 = scalar_lea.vmem %s3730_s28, 256  ;;  %p4670_p1 = scmp.lt.s32.totalorder %s3730_s28, %s3730_s28 }
0x1153   :  { %v3316_v35 = vrot.slane %v3309_v28, %v5501_v18  ;;  %v3426_v29 = vcombine.high %v3425_v11, %v3425_v11  ;;  %v3433_v34 = vrot.slane %v3425_v11, %v5501_v18  ;;  %p4666_p0 = scmp.ne.s32.totalorder %s3730_s28, %s4665_s2  ;;  %p4671_p2 = scmp.lt.s32.totalorder %s4665_s2, %s4665_s2 }
0x1154   :  { %v3246_v45 = vrot.slane %v3239_v52, %v5501_v18  ;;  %v3265_v8 = vcombine.high %v3264_v12, %v3264_v12  ;;  %v3284_v47 = vrot.slane %v3277_v14, %v5501_v18  ;;  %v3297_v23 = vrot.slane %v3290_v57, %v5501_v18 }
0x1155   :  { %v3317_v25 = vcombine.high %v3316_v35, %v3316_v35  ;;  %v3440_v13 = vrot.slane %v3426_v29, %v5501_v18  ;;  %v3474_v53 = vcombine.high %v3433_v34, %v3433_v34  ;;  %p4672_p3 = por %p4671_p2, %p4670_p1 }
0x1156   :  { %v3248_v9 = vadd.f32 %v3246_v45, %v3229_v22  ;;  %v3304_v6 = vrot.slane %v3297_v23, %v5501_v18 }
0x1157   :  { %v3324_v42 = vrot.slane %v3317_v25, %v5501_v18  ;;  %v3507_v52 = vcombine.high %v3440_v13, %v3440_v13  ;;  %p4673_p4 = pnand %p4672_p3, %p4666_p0 }
0x1158   :  { %v3267_v3 = vadd.f32 %v3265_v8, %v3248_v9  ;;  %v3372_v9 = vld [vmem:[%s5611_s15 + $0x8] sm:$0x1]  ;;  %v3823_v8 = vld [vmem:[#allocation3] ss:$0 sm:$0xff] }
0x11d2   :  { %v3182_v41 = vpop.xlane.xlu1 %3181 }
0x11d3   :  { %v3179_v5 = vpop.xlane.xlu0 %3178 }
0x11d4   :  { %v3183_v7 = vadd.f32 %v3182_v41, %v3179_v5  ;;  %v3285_v5 = vcombine.high %v3284_v47, %v3284_v47  ;;  %v3373_v47 = vld [vmem:[%s5612_s16] sm:$0xff] }
0x11d5   :  { %v3447_v23 = vrot.slane %v3373_v47, 1 }
0x11d6   :  { %v3184_v27 = vrot.slane %v3183_v7, 4  ;;  %v3199_v58 = vpop.xlane.xlu1 %3198  ;;  %v3287_v39 = vadd.f32 %v3285_v5, %v3267_v3 }
0x11d7   :  { %v3196_v19 = vpop.xlane.xlu0 %3195 }
0x11d8   :  { %v3185_v59 = vadd.f32 %v3184_v27, %v3183_v7  ;;  %v3200_v54 = vadd.f32 %v3199_v58, %v3196_v19 }
0x11da   :  { %v3186_v30 = vrot.slane %v3185_v59, 2  ;;  %v3201_v50 = vrot.slane %v3200_v54, 4  ;;  %v3216_v48 = vpop.xlane.xlu1 %3215 }
0x11db   :  { %v3213_v10 = vpop.xlane.xlu0 %3212 }
0x11dc   :  { %v3187_v37 = vadd.f32 %v3186_v30, %v3185_v59  ;;  %v3202_v38 = vadd.f32 %v3201_v50, %v3200_v54  ;;  %v3217_v15 = vadd.f32 %v3216_v48, %v3213_v10  ;;  %v3540_v59 = vcombine.high %v3371_v63, %v3371_v63 }
0x11de   :  { %v3188_v16 = vrot.slane %v3187_v37, 1  ;;  %v3203_v46 = vrot.slane %v3202_v38, 2  ;;  %v3218_v26 = vrot.slane %v3217_v15, 4  ;;  %v3547_v48 = vrot.slane %v3540_v59, %v5501_v18 }
0x11e0   :  { %v3189_v43 = vadd.f32 %v3188_v16, %v3187_v37  ;;  %v3204_v51 = vadd.f32 %v3203_v46, %v3202_v38  ;;  %v3219_v56 = vadd.f32 %v3218_v26, %v3217_v15  ;;  %v3587_v38 = vcombine.high %v3547_v48, %v3547_v48 }
0x11e1   :  { %v3554_v46 = vrot.slane %v3547_v48, %v5501_v18  ;;  %v3374_v48 = vld [vmem:[%s5612_s16 + $0x8] sm:$0x1] }
0x11e2   :  { %v3190_v60 = vmul.f32 0.001953125, %v3189_v43  ;;  %v3205_v32 = vrot.slane %v3204_v51, 1  ;;  %v3220_v24 = vrot.slane %v3219_v56, 2  ;;  %v3594_v16 = vrot.slane %v3587_v38, %v5501_v18 }
0x11e4   :  { %v3327_v62 = vmul.f32 %v5498_v1, %v3190_v60  ;;  %v3206_v61 = vadd.f32 %v3205_v32, %v3204_v51  ;;  %v3221_v49 = vadd.f32 %v3220_v24, %v3219_v56  ;;  %v3660_v51 = vcombine.high %v3594_v16, %v3594_v16 }
0x11e5   :  { %v3627_v56 = vcombine.high %v3554_v46, %v3554_v46 }
0x11e6   :  { %v3329_v36 = vcombine.high %v3327_v62, %v3327_v62  ;;  %v3207_v0 = vmul.f32 0.001953125, %v3206_v61  ;;  %v3222_v4 = vrot.slane %v3221_v49, 1 }
0x11e8   :  { %v3336_v17 = vrot.slane %v3329_v36, %v5501_v18  ;;  %v3347_v41 = vmul.f32 %v5498_v1, %v3207_v0  ;;  %v3223_v58 = vadd.f32 %v3222_v4, %v3221_v49  ;;  %v3306_v1 = vadd.f32 %v3304_v6, %v3287_v39 }
0x11ea   :  { %v3343_v7 = vrot.slane %v3336_v17, %v5501_v18  ;;  %v3349_v33 = vcombine.high %v3347_v41, %v3347_v41  ;;  %v3326_v54 = vadd.f32 %v3324_v42, %v3306_v1  ;;  %v3224_v21 = vmul.f32 0.001953125, %v3223_v58 }
0x11eb   :  { %v3513_v17 = vrot.slane %v3373_v47, 3  ;;  %v3480_v41 = vrot.slane %v3373_v47, 2  ;;  %v3560_v42 = vrot.slane %v3373_v47, 4 }
0x11ec   :  { %v3356_v27 = vrot.slane %v3349_v33, %v5501_v18  ;;  %v3344_v19 = vcombine.high %v3343_v7, %v3343_v7  ;;  %v3368_v10 = vmul.f32 %v3227_v2, %v3224_v21  ;;  %v3600_v33 = vrot.slane %v3373_v47, 5 }
0x11ee   :  { %v3357_v20 = vcombine.high %v3356_v27, %v3356_v27  ;;  %v3346_v50 = vadd.f32 %v3344_v19, %v3326_v54  ;;  %v3666_v19 = vrot.slane %v3373_v47, 7  ;;  %v3633_v54 = vrot.slane %v3373_v47, 6 }
0x11f0   :  { %v3364_v55 = vrot.slane %v3357_v20, %v5501_v18 }
0x11f2   :  { %v3365_v30 = vcombine.high %v3364_v55, %v3364_v55 }
0x11f4   :  { %v3367_v31 = vadd.f32 %v3365_v30, %v3346_v50 }
0x11f6   :  { %v3369_v37 = vadd.f32 %v3368_v10, %v3367_v31 }
0x11f8   :  { %v3370_v15 = vmax.f32 %v3369_v37, 0.0 }
0x11fa   :  { %v3442_v44 = vmul.f32 %v3440_v13, %v3370_v15  ;;  %v3388_v40 = vmul.f32 %v3371_v63, %v3370_v15  ;;  %v3509_v28 = vmul.f32 %v3507_v52, %v3370_v15  ;;  %v3476_v43 = vmul.f32 %v3474_v53, %v3370_v15 }
0x11fb   :  { %v3596_v14 = vmul.f32 %v3594_v16, %v3370_v15  ;;  %v3556_v57 = vmul.f32 %v3554_v46, %v3370_v15  ;;  %v3662_v32 = vmul.f32 %v3660_v51, %v3370_v15  ;;  %v3629_v24 = vmul.f32 %v3627_v56, %v3370_v15 }
0x11fc   :  { %v3443_v26 = vsel %vm3389_vm3, %v3442_v44, 0.0  ;;  %v3390_v22 = vsel %vm3389_vm3, %v3388_v40, 0.0  ;;  %v3510_v45 = vsel %vm3389_vm3, %v3509_v28, 0.0  ;;  %v3477_v12 = vsel %vm3389_vm3, %v3476_v43, 0.0 }
0x11fd   :  { %3444 = vadd.xlane.f32.xlu1 %v3443_v26  ;;  %3391 = vadd.xlane.f32.xlu0 %v3390_v22  ;;  %v3597_v18 = vsel %vm3389_vm3, %v3596_v14, 0.0  ;;  %v3557_v60 = vsel %vm3389_vm3, %v3556_v57, 0.0  ;;  %v3663_v35 = vsel %vm3389_vm3, %v3662_v32, 0.0  ;;  %v3630_v62 = vsel %vm3389_vm3, %v3629_v24, 0.0  ;;  %v3375_v14 = vld [vmem:[%s5613_s17] sm:$0xff] }
0x11fe   :  { %v3693_v61 = vmul.f32 %v3372_v9, %v3370_v15  ;;  %v3499_v9 = vrot.slane %v3375_v14, 2 }
0x1200   :  { %v3694_v49 = vsel %vm3389_vm3, %v3693_v61, 0.0  ;;  %v3532_v61 = vrot.slane %v3375_v14, 3 }
0x1201   :  { %3511 = vadd.xlane.f32.xlu1 %v3510_v45  ;;  %3478 = vadd.xlane.f32.xlu0 %v3477_v12 }
0x1205   :  { %3598 = vadd.xlane.f32.xlu1 %v3597_v18  ;;  %3558 = vadd.xlane.f32.xlu0 %v3557_v60  ;;  %v3466_v60 = vrot.slane %v3375_v14, 1 }
0x1209   :  { %3664 = vadd.xlane.f32.xlu1 %v3663_v35  ;;  %3631 = vadd.xlane.f32.xlu0 %v3630_v62 }
0x120d   :  { %3695 = vadd.xlane.f32.xlu0 %v3694_v49  ;;  %v3579_v49 = vrot.slane %v3375_v14, 4 }
0x121a   :  { %3384 = vperm.xlu1 %4398, %v3823_v8  }
0x128a   :  { %v3445_v36 = vpop.xlane.xlu1 %3444  ;;  %v3392_v0 = vpop.xlane.xlu0 %3391 }
0x128b   :  { %v3449_v3 = vadd.f32 %v3447_v23, %v3445_v36  ;;  %v3393_v25 = vadd.f32 %v3392_v0, %v3373_v47  ;;  %v3619_v23 = vrot.slane %v3375_v14, 5  ;;  %v3652_v36 = vrot.slane %v3375_v14, 6 }
0x128d   :  { %v3825_v4 = vmul.f32 -1.442695, %v3449_v3  ;;  %v3824_v5 = vmul.f32 -1.442695, %v3393_v25  ;;  %v3685_v25 = vrot.slane %v3375_v14, 7 }
0x128e   :  { %v3512_v6 = vpop.xlane.xlu1 %3511  ;;  %v3479_v7 = vpop.xlane.xlu0 %3478 }
0x128f   :  { %4473 = vpow2.f32 %v3825_v4  ;;  %v3515_v39 = vadd.f32 %v3513_v17, %v3512_v6  ;;  %v3482_v63 = vadd.f32 %v3480_v41, %v3479_v7  ;;  %v3376_v41 = vld [vmem:[%s5613_s17 + $0x8] sm:$0x1]  ;;  %v3400_v4 = vld [vmem:[#allocation2] sm:$0xff] }
0x1290   :  { %4475 = vpow2.f32 %v3824_v5  ;;  %v3401_v5 = vld [vmem:[#allocation2 + $0x8] sm:$0xff] }
0x1291   :  { %v3827_v27 = vmul.f32 -1.442695, %v3515_v39  ;;  %v3826_v58 = vmul.f32 -1.442695, %v3482_v63  ;;  %v3456_v39 = vld [vmem:[#allocation2 + $0x10] sm:$0xff]  ;;  %v3457_v63 = vld [vmem:[#allocation2 + $0x18] sm:$0xff] }
0x1292   :  { %v3599_v11 = vpop.xlane.xlu1 %3598  ;;  %v3559_v1 = vpop.xlane.xlu0 %3558 }
0x1293   :  { %4477 = vpow2.f32 %v3827_v27  ;;  %v3602_v20 = vadd.f32 %v3600_v33, %v3599_v11  ;;  %v3562_v59 = vadd.f32 %v3560_v42, %v3559_v1 }
0x1294   :  { %4479 = vpow2.f32 %v3826_v58 }
0x1295   :  { %v3829_v55 = vmul.f32 -1.442695, %v3602_v20  ;;  %v3828_v21 = vmul.f32 -1.442695, %v3562_v59 }
0x1296   :  { %v3665_v29 = vpop.xlane.xlu1 %3664  ;;  %v3632_v2 = vpop.xlane.xlu0 %3631 }
0x1297   :  { %4481 = vpow2.f32 %v3829_v55  ;;  %v3668_v30 = vadd.f32 %v3666_v19, %v3665_v29  ;;  %v3635_v50 = vadd.f32 %v3633_v54, %v3632_v2  ;;  %v3489_v2 = vld [vmem:[#allocation2 + $0x20] sm:$0xff] }
0x1298   :  { %4483 = vpow2.f32 %v3828_v21 }
0x1299   :  { %v4474_v31 = vpop.eup %4473  ;;  %v3831_v10 = vmul.f32 -1.442695, %v3668_v30  ;;  %v3830_v13 = vmul.f32 -1.442695, %v3635_v50  ;;  %v3490_v30 = vld [vmem:[#allocation2 + $0x28] sm:$0xff] }
0x129a   :  { %v4476_v34 = vpop.eup %4475  ;;  %v3453_v37 = vadd.f32 1.0, %v4474_v31  ;;  %v3696_v38 = vpop.xlane.xlu0 %3695 }
0x129b   :  { %4485 = vpow2.f32 %v3831_v10  ;;  %v3697_v15 = vadd.f32 %v3696_v38, %v3374_v48  ;;  %v3397_v52 = vadd.f32 1.0, %v4476_v34  ;;  %v3385_v50 = vpop.permute.xlu1 %3384  ;;  %v3523_v34 = vld [vmem:[#allocation2 + $0x38] sm:$0xff] }
0x129c   :  { %4487 = vrcp.f32 %v3453_v37 }
0x129d   :  { %v4478_v53 = vpop.eup %4477  ;;  %4489 = vpow2.f32 %v3830_v13  ;;  %v3832_v44 = vmul.f32 -1.442695, %v3697_v15  ;;  %v3522_v13 = vld [vmem:[#allocation2 + $0x30] sm:$0xff] }
0x129e   :  { %v4480_v40 = vpop.eup %4479  ;;  %v3519_v16 = vadd.f32 1.0, %v4478_v53  ;;  %4491 = vrcp.f32 %v3397_v52 }
0x129f   :  { %v3486_v46 = vadd.f32 1.0, %v4480_v40  ;;  %4493 = vpow2.f32 %v3832_v44 }
0x12a1   :  { %v4482_v26 = vpop.eup %4481  ;;  %4495 = vrcp.f32 %v3486_v46 }
0x12a2   :  { %v4484_v22 = vpop.eup %4483  ;;  %4497 = vrcp.f32 %v3519_v16  ;;  %v3606_v28 = vadd.f32 1.0, %v4482_v26 }
0x12a3   :  { %v3566_v43 = vadd.f32 1.0, %v4484_v22 }
0x12a5   :  { %v4486_v51 = vpop.eup %4485  ;;  %4499 = vrcp.f32 %v3566_v43 }
0x12a6   :  { %v4488_v56 = vpop.eup %4487  ;;  %4501 = vrcp.f32 %v3606_v28  ;;  %v3672_v45 = vadd.f32 1.0, %v4486_v51 }
0x12a7   :  { %v4490_v12 = vpop.eup %4489 }
0x12a8   :  { %v4492_v57 = vpop.eup %4491  ;;  %v3639_v18 = vadd.f32 1.0, %v4490_v12  ;;  %4503 = vrcp.f32 %v3672_v45 }
0x12a9   :  { %v4494_v32 = vpop.eup %4493  ;;  %4328 = vpush %v4492_v57  ;;  %v3570_v57 = vld [vmem:[#allocation2 + $0x48] sm:$0xff] }
0x12aa   :  { %4505 = vrcp.f32 %v3639_v18  ;;  %v3701_v24 = vadd.f32 1.0, %v4494_v32  ;;  %4330 = vpush %v3375_v14  ;;  %v3569_v14 = vld [vmem:[#allocation2 + $0x40] sm:$0xff] }
0x12ab   :  { %v4496_v35 = vpop.eup %4495  ;;  %4332 = vpush %v4488_v56 }
0x12ac   :  { %v4498_v62 = vpop.eup %4497  ;;  %4507 = vrcp.f32 %v3701_v24  ;;  %4334 = vpush %v3466_v60 }
0x12ad   :  { %4336 = vpush %v4496_v35 }
0x12ae   :  { %4338 = vpush %v3499_v9 }
0x12af   :  { %v4500_v8 = vpop.eup %4499  ;;  %4340 = vpush %v4498_v62 }
0x12b0   :  { %v4502_v47 = vpop.eup %4501  ;;  %4342 = vpush %v3532_v61  ;;  %v3609_v61 = vld [vmem:[#allocation2 + $0x50] sm:$0xff] }
0x12b1   :  { %4344 = vpush %v4500_v8 }
0x12b2   :  { %4346 = vpush %v3579_v49  ;;  %v4504_v0 = vpop.eup %4503  ;;  %v3610_v49 = vld [vmem:[#allocation2 + $0x58] sm:$0xff] }
0x12b3   :  { %4348 = vpush %v4502_v47 }
0x12b4   :  { %v4506_v3 = vpop.eup %4505  ;;  %4350 = vpush %v3619_v23 }
0x12b5   :  { %4352 = vpush %v4506_v3 }
0x12b6   :  { %v4508_v17 = vpop.eup %4507  ;;  %4354 = vpush %v3652_v36 }
0x12b7   :  { %4356 = vpush %v4504_v0 }
0x12b8   :  { %4358 = vpush %v3685_v25 }
0x12b9   :  { %4360 = vpush %v4508_v17 }
0x12ba   :  { %4362 = vpush %v3376_v41 }
0x12da   :  { %s4329_s5 = spop %4328 }
0x12db   :  { %v3404_v6 = vstv %s4329_s5  ;;  %s4331_s9 = spop %4330 }
0x12dc   :  { %v3406_v7 = vmul.f32 %v3404_v6, %v3400_v4  ;;  %v3407_v33 = vmul.f32 %v3404_v6, %v3401_v5  ;;  %s4333_s25 = spop %4332  ;;  %v3412_v19 = vstv %s4331_s9 }
0x12dd   :  { %v3460_v42 = vstv %s4333_s25  ;;  %s4335_s20 = spop %4334 }
0x12de   :  { %v3408_v27 = vmax.f32 %v3406_v7, 0.0  ;;  %v3409_v58 = vmax.f32 %v3407_v33, 0.0  ;;  %v3462_v11 = vmul.f32 %v3460_v42, %v3456_v39  ;;  %v3463_v1 = vmul.f32 %v3460_v42, %v3457_v63  ;;  %s4337_s17 = spop %4336  ;;  %v3642_v33 = vld [vmem:[#allocation2 + $0x60] sm:$0xff]  ;;  %v3643_v39 = vld [vmem:[#allocation2 + $0x68] sm:$0xff] }
0x12df   :  { %v3468_v20 = vstv %s4335_s20  ;;  %v3493_v59 = vstv %s4337_s17  ;;  %s5564_s7 = spop %4338 }
0x12e0   :  { %v3414_v54 = vmul.f32 %v3412_v19, %v3408_v27  ;;  %v3415_v55 = vmul.f32 %v3412_v19, %v3409_v58  ;;  %v3464_v21 = vmax.f32 %v3462_v11, 0.0  ;;  %v3465_v29 = vmax.f32 %v3463_v1, 0.0  ;;  %s4341_s21 = spop %4340 }
0x12e1   :  { %v3495_v48 = vmul.f32 %v3493_v59, %v3489_v2  ;;  %v3496_v31 = vmul.f32 %v3493_v59, %v3490_v30  ;;  %v3501_v10 = vstv %s5564_s7  ;;  %v3526_v37 = vstv %s4341_s21  ;;  %s4343_s29 = spop %4342  ;;  %v3675_v59 = vld [vmem:[#allocation2 + $0x70] sm:$0xff] }
0x12e2   :  { %v3470_v38 = vmul.f32 %v3468_v20, %v3464_v21  ;;  %v3471_v15 = vmul.f32 %v3468_v20, %v3465_v29  ;;  %v3528_v52 = vmul.f32 %v3526_v37, %v3522_v13  ;;  %v3529_v53 = vmul.f32 %v3526_v37, %v3523_v34  ;;  %s4345_s8 = spop %4344 }
0x12e3   :  { %v3497_v44 = vmax.f32 %v3495_v48, 0.0  ;;  %v3498_v40 = vmax.f32 %v3496_v31, 0.0  ;;  %v3416_v16 = vadd.f32 %v3414_v54, %v3385_v50  ;;  %v3417_v46 = vadd.f32 %v3415_v55, %v3385_v50  ;;  %s5567_s10 = spop %4346  ;;  %v3676_v54 = vld [vmem:[#allocation2 + $0x78] sm:$0xff] }
0x12e4   :  { %v3530_v26 = vmax.f32 %v3528_v52, 0.0  ;;  %v3531_v22 = vmax.f32 %v3529_v53, 0.0  ;;  %v3534_v28 = vstv %s4343_s29  ;;  %v3573_v43 = vstv %s4345_s8  ;;  %s4349_s11 = spop %4348 }
0x12e5   :  { %v3503_v51 = vmul.f32 %v3501_v10, %v3497_v44  ;;  %v3504_v56 = vmul.f32 %v3501_v10, %v3498_v40  ;;  %v3472_v45 = vadd.f32 %v3470_v38, %v3416_v16  ;;  %v3473_v12 = vadd.f32 %v3471_v15, %v3417_v46  ;;  %s5569_s12 = spop %4350  ;;  %v3704_v38 = vld [vmem:[#allocation2 + $0x80] sm:$0xff]  ;;  %v3705_v15 = vld [vmem:[#allocation2 + $0x88] sm:$0xff] }
0x12e6   :  { %v3536_v18 = vmul.f32 %v3534_v28, %v3530_v26  ;;  %v3537_v60 = vmul.f32 %v3534_v28, %v3531_v22  ;;  %v3575_v32 = vmul.f32 %v3573_v43, %v3569_v14  ;;  %v3576_v24 = vmul.f32 %v3573_v43, %v3570_v57  ;;  %s4353_s18 = spop %4352 }
0x12e7   :  { %v3505_v9 = vadd.f32 %v3503_v51, %v3472_v45  ;;  %v3506_v35 = vadd.f32 %v3504_v56, %v3473_v12  ;;  %v3581_v62 = vstv %s5567_s10  ;;  %v3613_v8 = vstv %s4349_s11  ;;  %s5572_s22 = spop %4354 }
0x12e8   :  { %v3577_v47 = vmax.f32 %v3575_v32, 0.0  ;;  %v3578_v23 = vmax.f32 %v3576_v24, 0.0  ;;  %v3615_v36 = vmul.f32 %v3613_v8, %v3609_v61  ;;  %v3616_v0 = vmul.f32 %v3613_v8, %v3610_v49  ;;  %s4357_s14 = spop %4356 }
0x12e9   :  { %v3538_v3 = vadd.f32 %v3536_v18, %v3505_v9  ;;  %v3539_v25 = vadd.f32 %v3537_v60, %v3506_v35  ;;  %v3621_v17 = vstv %s5569_s12  ;;  %v3646_v41 = vstv %s4353_s18  ;;  %s5575_s26 = spop %4358 }
0x12ea   :  { %v3583_v4 = vmul.f32 %v3581_v62, %v3577_v47  ;;  %v3584_v5 = vmul.f32 %v3581_v62, %v3578_v23  ;;  %v3617_v6 = vmax.f32 %v3615_v36, 0.0  ;;  %v3618_v7 = vmax.f32 %v3616_v0, 0.0  ;;  %s4361_s27 = spop %4360 }
0x12eb   :  { %v3648_v63 = vmul.f32 %v3646_v41, %v3642_v33  ;;  %v3649_v42 = vmul.f32 %v3646_v41, %v3643_v39  ;;  %v3654_v27 = vstv %s5572_s22  ;;  %v3679_v58 = vstv %s4357_s14  ;;  %s4363_s3 = spop %4362 }
0x12ec   :  { %v3585_v11 = vadd.f32 %v3583_v4, %v3538_v3  ;;  %v3586_v1 = vadd.f32 %v3584_v5, %v3539_v25  ;;  %v3623_v19 = vmul.f32 %v3621_v17, %v3617_v6  ;;  %v3624_v20 = vmul.f32 %v3621_v17, %v3618_v7 }
0x12ed   :  { %v3650_v55 = vmax.f32 %v3648_v63, 0.0  ;;  %v3651_v21 = vmax.f32 %v3649_v42, 0.0  ;;  %v3681_v29 = vmul.f32 %v3679_v58, %v3675_v59  ;;  %v3682_v2 = vmul.f32 %v3679_v58, %v3676_v54 }
0x12ee   :  { %v3625_v30 = vadd.f32 %v3623_v19, %v3585_v11  ;;  %v3626_v50 = vadd.f32 %v3624_v20, %v3586_v1  ;;  %v3687_v48 = vstv %s5575_s26  ;;  %v3708_v31 = vstv %s4361_s27 }
0x12ef   :  { %v3656_v10 = vmul.f32 %v3654_v27, %v3650_v55  ;;  %v3657_v13 = vmul.f32 %v3654_v27, %v3651_v21  ;;  %v3683_v34 = vmax.f32 %v3681_v29, 0.0  ;;  %v3684_v37 = vmax.f32 %v3682_v2, 0.0 }
0x12f0   :  { %v3710_v52 = vmul.f32 %v3708_v31, %v3704_v38  ;;  %v3711_v53 = vmul.f32 %v3708_v31, %v3705_v15  ;;  %v3716_v44 = vstv %s4363_s3 }
0x12f1   :  { %v3658_v40 = vadd.f32 %v3656_v10, %v3625_v30  ;;  %v3659_v16 = vadd.f32 %v3657_v13, %v3626_v50  ;;  %v3689_v46 = vmul.f32 %v3687_v48, %v3683_v34  ;;  %v3690_v26 = vmul.f32 %v3687_v48, %v3684_v37 }
0x12f2   :  { %v3712_v22 = vmax.f32 %v3710_v52, 0.0  ;;  %v3713_v28 = vmax.f32 %v3711_v53, 0.0 }
0x12f3   :  { %v3691_v43 = vadd.f32 %v3689_v46, %v3658_v40  ;;  %v3692_v51 = vadd.f32 %v3690_v26, %v3659_v16 }
0x12f4   :  { %v3718_v56 = vmul.f32 %v3716_v44, %v3712_v22  ;;  %v3719_v45 = vmul.f32 %v3716_v44, %v3713_v28 }
0x12f6   :  { %v3720_v12 = vadd.f32 %v3718_v56, %v3691_v43  ;;  %v3721_v14 = vadd.f32 %v3719_v45, %v3692_v51 }
0x12f8   :  { %3722 = vst.msk [vmem:[#allocation16] sm:$0xff] %vm202_vm1, %v3720_v12  ;;  %3723 = vst.msk [vmem:[#allocation16 + $0x8] sm:$0xff] %vm202_vm1, %v3721_v14 }
0x12f9   :  { %4676 = shalt.err (!%p4673_p4)
}
0x12fa   :  { %s4677_s30 = scalar_lea.hbm %s5615_s19, 256 }
0x12fb   :  { %p4678_p5 = scmp.ne.s32.totalorder %s5615_s19, %s4677_s30  ;;  %p4681_p6 = scmp.lt.u32.totalorder %s4677_s30, %s5615_s19 }
0x12fd   :  { %p4683_p7 = pnand %p4681_p6, %p4678_p5 }
0x12ff   :  { %4686 = shalt.err (!%p4683_p7)
}
0x1300   :  { %3735 = dma.vmem_to_hbm [thread:$0]  %s3730_s28, 256, %s5615_s19, [#allocation6], %s5631_s24, %s5631_s24, %s5630_s6  }
0x1301   :  { %4695 = dma.done.wait [#allocation6], 256  }
0x1302   :  { %4696 = vsyncadd [#allocation6], 4294967040 }
0x1303   :  { %3739 = vsyncpa [#allocation5], 1 }
0x1304   :  { %3740 = vsyncpa [#allocation8], 1 }
0x1305   :  { %3741 = vsyncpa [#allocation11], 1 }
0x1306   :  { %3742 = vsyncpa [#allocation14], 1 }
0x1307   :  { %3743 = vsyncpa [#allocation6], 1 }

</bundles_post_ra>
